<compile_context>
chip_gen: v7x
topology: tpu7x:2x2x1
jax: 0.10.0
libtpu: 0.0.40
codegen_flags: <defaults>
</compile_context>

<pallas_src>
import functools

import jax
import jax.numpy as jnp
from jax import lax
from jax.experimental import pallas as pl
from jax.experimental.pallas import tpu as pltpu


def _fused_kernel(x_se_ref, x_main_ref, w1_ref, b1_ref, w2t_ref,
                  gamma_ref, beta_ref, out_ref, *, eps):
    """One grid step over a chunk of TK mid (SE) channels.

    Per-step block shapes:
      x_se_ref   : [1, C_SE]    f32   (SE pooled input, resident)
      x_main_ref : [TK, HW]     f32   (channel-major main-activation chunk)
      w1_ref     : [TK, C_SE]   bf16  (conv2d171 weight chunk)
      b1_ref     : [TK, 1]      f32   (conv2d171 bias chunk)
      w2t_ref    : [TK, C_OUT]  bf16  (conv2d172 weight chunk, pre-transposed, streamed)
      gamma_ref  : [1, C_OUT]   f32   (BN scale, lane vector, resident)
      beta_ref   : [1, C_OUT]   f32
      out_ref    : [HW, C_OUT]  f32   (lane-dense resident accumulator + final output)
    """
    k = pl.program_id(0)

    @pl.when(k == 0)
    def _init():
        out_ref[...] = jnp.zeros_like(out_ref)

    # conv2d171 (1x1 conv + bias) + sigmoid -> per-mid-channel SE gate, [TK, 1].
    # f32 elementwise (VPU) + lane reduction (XLU) + sigmoid (EUP).
    gate = jnp.sum(w1_ref[...].astype(jnp.float32) * x_se_ref[...],
                   axis=1, keepdims=True) + b1_ref[...]
    gate = jax.nn.sigmoid(gate)

    # SE scaling of the main activation chunk (f32 VPU), cast to bf16 for the MXU.
    y = (x_main_ref[...] * gate).astype(jnp.bfloat16)            # [TK, HW]

    # conv2d172 (1x1, no bias), lane-dense accumulator [HW, C_OUT]:
    # contract over dim 0 of both operands (transposed-LHS matmul; the implied
    # transpose rides the otherwise-idle XLU/MXU input path), accumulated in f32
    # directly into the resident output block.
    out_ref[...] += lax.dot_general(
        y, w2t_ref[...],
        dimension_numbers=(((0,), (0,)), ((), ())),
        preferred_element_type=jnp.float32)

    # batchnorm2d102 in training mode: batch stats over N*H*W (N=1), biased
    # variance, eps, affine -- applied in place once at the last reduction step.
    @pl.when(k == pl.num_programs(0) - 1)
    def _finalize():
        z = out_ref[...]                                         # [HW, C_OUT]
        mean = jnp.mean(z, axis=0, keepdims=True)                # [1, C_OUT]
        var = jnp.mean(jnp.square(z - mean), axis=0, keepdims=True)
        inv = lax.rsqrt(var + eps)
        out_ref[...] = (z - mean) * inv * gamma_ref[...] + beta_ref[...]
    # TODO(synk): BatchNorm2d running_mean/running_var momentum updates (stateful
    # training-time buffer mutation) are not materialized; only the forward output is.


def prepare_params(w1, b1, w2, gamma, beta):
    """One-time parameter layout/dtype prep (outside the hot path)."""
    c_mid, c_se = w1.shape[0], w1.shape[1]
    c_out = w2.shape[0]
    w1b = jnp.asarray(w1).reshape(c_mid, c_se).astype(jnp.bfloat16)      # [C_MID, C_SE]
    b1c = jnp.asarray(b1).reshape(c_mid, 1).astype(jnp.float32)          # [C_MID, 1]
    w2t = jnp.asarray(w2).reshape(c_out, c_mid).T.astype(jnp.bfloat16)   # [C_MID, C_OUT]
    gamma_r = jnp.asarray(gamma).reshape(1, c_out).astype(jnp.float32)   # [1, C_OUT]
    beta_r = jnp.asarray(beta).reshape(1, c_out).astype(jnp.float32)
    return w1b, b1c, w2t, gamma_r, beta_r


def default_num_k_steps():
    """1 reduction step on v7x (per-step ~0.35us overhead dominates its roofline);
    2 steps elsewhere so the streamed w2 chunk overlaps the SE/matmul work."""
    try:
        kind = jax.devices()[0].device_kind.lower()
    except Exception:
        return 2
    return 1 if "v7" in kind else 2


@functools.partial(jax.jit, static_argnames=("eps", "num_k_steps"))
def fused_se_conv_bn(x535, x532, w1b, b1c, w2t, gamma_r, beta_r, *,
                     eps=1e-3, num_k_steps=2):
    """x535: [1, C_SE, 1, 1] f32, x532: [1, C_MID, H, W] f32 (NCHW).
    Params pre-laid-out by prepare_params.  Returns NCHW [1, C_OUT, H, W] f32."""
    n, c_se = x535.shape[0], x535.shape[1]
    _, c_mid, h, w = x532.shape
    c_out = w2t.shape[1]
    hw = h * w
    assert n == 1  # TODO(synk): for N>1 add a batch grid axis with cross-tile BN stats.
    assert w2t.shape[0] == c_mid and w1b.shape == (c_mid, c_se)
    assert c_mid % num_k_steps == 0
    tk = c_mid // num_k_steps
    assert tk % 8 == 0

    # Hot-path glue is free reshapes only (no pad / cast / transpose pre-pass).
    x_se = x535.reshape(1, c_se)            # [1, C_SE]   f32
    x_main = x532.reshape(c_mid, hw)        # [C_MID, HW] f32

    out = pl.pallas_call(
        functools.partial(_fused_kernel, eps=eps),
        out_shape=jax.ShapeDtypeStruct((hw, c_out), jnp.float32),
        grid_spec=pltpu.PrefetchScalarGridSpec(
            num_scalar_prefetch=0,
            grid=(num_k_steps,),
            in_specs=[
                pl.BlockSpec((1, c_se), lambda k: (0, 0)),      # x_se   (resident)
                pl.BlockSpec((tk, hw), lambda k: (k, 0)),       # x_main chunk
                pl.BlockSpec((tk, c_se), lambda k: (k, 0)),     # w1 chunk
                pl.BlockSpec((tk, 1), lambda k: (k, 0)),        # b1 chunk
                pl.BlockSpec((tk, c_out), lambda k: (k, 0)),    # w2^T chunk (streamed)
                pl.BlockSpec((1, c_out), lambda k: (0, 0)),     # gamma  (resident)
                pl.BlockSpec((1, c_out), lambda k: (0, 0)),     # beta   (resident)
            ],
            out_specs=pl.BlockSpec((hw, c_out), lambda k: (0, 0)),
        ),
        compiler_params=pltpu.CompilerParams(
            dimension_semantics=("arbitrary",)),
    )(x_se, x_main, w1b, b1c, w2t, gamma_r, beta_r)
    # TODO(synk): on v7x a second "parallel" grid axis over C_OUT (2 TensorCores) and
    # an fp8/int8 w2 stream would buy more; skipped to keep a single portable code path.

    # [HW, C_OUT] -> NCHW output (tiny 60 KB transpose, fused by XLA).
    return out.T.reshape(1, c_out, h, w)


def _reference(x535, x532, w1, b1, w2, gamma, beta, eps=1e-3):
    """Pure-JAX f32 reference mirroring the PyTorch forward (training-mode BN)."""
    se = jnp.einsum("nchw,oc->nohw", x535, w1) + b1[None, :, None, None]
    se = jax.nn.sigmoid(se)
    y = se * x532
    z = jnp.einsum("nchw,oc->nohw", y, w2)
    mean = jnp.mean(z, axis=(0, 2, 3), keepdims=True)
    var = jnp.mean((z - mean) ** 2, axis=(0, 2, 3), keepdims=True)
    z_hat = (z - mean) / jnp.sqrt(var + eps)
    return z_hat * gamma[None, :, None, None] + beta[None, :, None, None]


if __name__ == "__main__":
    key = jax.random.PRNGKey(0)
    k = jax.random.split(key, 8)

    N, C_SE, C_MID, C_OUT, H, W = 1, 76, 1824, 304, 7, 7

    # Inputs (shapes implied by the module's forward).
    x535 = jax.random.normal(k[0], (N, C_SE, 1, 1), dtype=jnp.float32)
    x532 = jax.random.normal(k[1], (N, C_MID, H, W), dtype=jnp.float32)

    # Deterministic synthetic parameters (shapes from the module __init__).
    w1 = 0.05 * jax.random.normal(k[2], (C_MID, C_SE), dtype=jnp.float32)   # conv2d171 weight
    b1 = 0.05 * jax.random.normal(k[3], (C_MID,), dtype=jnp.float32)        # conv2d171 bias
    w2 = 0.02 * jax.random.normal(k[4], (C_OUT, C_MID), dtype=jnp.float32)  # conv2d172 weight
    gamma = 1.0 + 0.1 * jax.random.normal(k[5], (C_OUT,), dtype=jnp.float32)
    beta = 0.1 * jax.random.normal(k[6], (C_OUT,), dtype=jnp.float32)

    params = prepare_params(w1, b1, w2, gamma, beta)
    n_k = default_num_k_steps()

    out = fused_se_conv_bn(x535, x532, *params, num_k_steps=n_k)
    out = jax.block_until_ready(out)

    ref = _reference(x535, x532, w1, b1, w2, gamma, beta)
    assert out.shape == (N, C_OUT, H, W), out.shape
    # bf16 MXU operands (f32 accumulation over K=1824) bound the error vs the f32
    # reference; max abs error is well below 3e-2 on O(1) BN-normalized outputs.
    err = float(jnp.max(jnp.abs(out - ref)))
    assert err < 3e-2, err

    print("KERNEL_OK")
</pallas_src>

<mosaic_0001>
module attributes {stable_mosaic.version = 11 : i64} {
  func.func @_fused_kernel(%arg0: i32, %arg1: memref<1x76xf32, #tpu.memory_space<vmem>>, %arg2: memref<912x49xf32, #tpu.memory_space<vmem>>, %arg3: memref<912x76xbf16, #tpu.memory_space<vmem>>, %arg4: memref<912x1xf32, #tpu.memory_space<vmem>>, %arg5: memref<912x304xbf16, #tpu.memory_space<vmem>>, %arg6: memref<1x304xf32, #tpu.memory_space<vmem>>, %arg7: memref<1x304xf32, #tpu.memory_space<vmem>>, %arg8: memref<49x304xf32, #tpu.memory_space<vmem>>) attributes {dimension_semantics = [#tpu.dimension_semantics<arbitrary>], iteration_bounds = array<i64: 2>, scalar_prefetch = 0 : i64, scratch_operands = 0 : i64, tpu.core_type = #tpu.core_type<tc>, window_params = [{pipeline_mode = #tpu.pipeline_mode<synchronous>, transform_indices = @transform_0, window_bounds = array<i64: 1, 76>}, {transform_indices = @transform_1, window_bounds = array<i64: 912, 49>}, {transform_indices = @transform_2, window_bounds = array<i64: 912, 76>}, {transform_indices = @transform_3, window_bounds = array<i64: 912, 1>}, {transform_indices = @transform_4, window_bounds = array<i64: 912, 304>}, {pipeline_mode = #tpu.pipeline_mode<synchronous>, transform_indices = @transform_5, window_bounds = array<i64: 1, 304>}, {pipeline_mode = #tpu.pipeline_mode<synchronous>, transform_indices = @transform_6, window_bounds = array<i64: 1, 304>}, {pipeline_mode = #tpu.pipeline_mode<synchronous>, transform_indices = @transform_7, window_bounds = array<i64: 49, 304>}]} {
    %c0_i32 = arith.constant 0 : i32
    %0 = arith.cmpi eq, %arg0, %c0_i32 : i32
    %1 = arith.extui %0 : i1 to i32
    %c0_i32_0 = arith.constant 0 : i32
    %2 = arith.cmpi ne, %1, %c0_i32_0 : i32
    scf.if %2 {
      %cst_17 = arith.constant 0.000000e+00 : f32
      %29 = vector.broadcast %cst_17 : f32 to vector<49x304xf32>
      %c0_18 = arith.constant 0 : index
      %c0_19 = arith.constant 0 : index
      %30 = vector.load %arg8[%c0_18, %c0_19] : memref<49x304xf32, #tpu.memory_space<vmem>>, vector<49x304xf32>
      tpu.vector_store %arg8[%c0_18, %c0_19], %29 {strides = array<i32>} : memref<49x304xf32, #tpu.memory_space<vmem>>, vector<49x304xf32>,
    } else {
    }
    %c0 = arith.constant 0 : index
    %c0_1 = arith.constant 0 : index
    %3 = vector.load %arg3[%c0, %c0_1] : memref<912x76xbf16, #tpu.memory_space<vmem>>, vector<912x76xbf16>
    %4 = arith.extf %3 : vector<912x76xbf16> to vector<912x76xf32>
    %c0_2 = arith.constant 0 : index
    %c0_3 = arith.constant 0 : index
    %5 = vector.load %arg1[%c0_2, %c0_3] : memref<1x76xf32, #tpu.memory_space<vmem>>, vector<1x76xf32>
    %6 = vector.broadcast %5 : vector<1x76xf32> to vector<912x76xf32>
    %7 = arith.mulf %4, %6 : vector<912x76xf32>
    %cst = arith.constant dense<0.000000e+00> : vector<912xf32>
    %8 = vector.multi_reduction <add>, %7, %cst [1] : vector<912x76xf32> to vector<912xf32>
    %9 = vector.shape_cast %8 : vector<912xf32> to vector<912x1xf32>
    %c0_4 = arith.constant 0 : index
    %c0_5 = arith.constant 0 : index
    %10 = vector.load %arg4[%c0_4, %c0_5] : memref<912x1xf32, #tpu.memory_space<vmem>>, vector<912x1xf32>
    %11 = arith.addf %9, %10 : vector<912x1xf32>
    %12 = arith.negf %11 : vector<912x1xf32>
    %13 = math.exp %12 : vector<912x1xf32>
    %cst_6 = arith.constant 1.000000e+00 : f32
    %14 = vector.broadcast %cst_6 : f32 to vector<912x1xf32>
    %15 = arith.addf %14, %13 : vector<912x1xf32>
    %16 = arith.divf %14, %15 : vector<912x1xf32>
    %c0_7 = arith.constant 0 : index
    %c0_8 = arith.constant 0 : index
    %17 = vector.load %arg2[%c0_7, %c0_8] : memref<912x49xf32, #tpu.memory_space<vmem>>, vector<912x49xf32>
    %18 = vector.broadcast %16 : vector<912x1xf32> to vector<912x49xf32>
    %19 = arith.mulf %17, %18 : vector<912x49xf32>
    %20 = arith.truncf %19 : vector<912x49xf32> to vector<912x49xbf16>
    %c0_9 = arith.constant 0 : index
    %c0_10 = arith.constant 0 : index
    %21 = vector.load %arg8[%c0_9, %c0_10] : memref<49x304xf32, #tpu.memory_space<vmem>>, vector<49x304xf32>
    %c0_11 = arith.constant 0 : index
    %c0_12 = arith.constant 0 : index
    %22 = vector.load %arg5[%c0_11, %c0_12] : memref<912x304xbf16, #tpu.memory_space<vmem>>, vector<912x304xbf16>
    %cst_13 = arith.constant dense<0.000000e+00> : vector<49x304xf32>
    %23 = tpu.matmul %20, %22, %cst_13 {dimension_numbers = #tpu.dot_dimension_numbers<[0], [0], [1], [1], [0, 1, 1, 1], [], []>} : vector<912x49xbf16>, vector<912x304xbf16>, vector<49x304xf32> -> vector<49x304xf32>
    %24 = arith.addf %21, %23 : vector<49x304xf32>
    %c0_14 = arith.constant 0 : index
    %c0_15 = arith.constant 0 : index
    %25 = vector.load %arg8[%c0_14, %c0_15] : memref<49x304xf32, #tpu.memory_space<vmem>>, vector<49x304xf32>
    tpu.vector_store %arg8[%c0_14, %c0_15], %24 {strides = array<i32>} : memref<49x304xf32, #tpu.memory_space<vmem>>, vector<49x304xf32>,
    %c1_i32 = arith.constant 1 : i32
    %26 = arith.cmpi eq, %arg0, %c1_i32 : i32
    %27 = arith.extui %26 : i1 to i32
    %c0_i32_16 = arith.constant 0 : i32
    %28 = arith.cmpi ne, %27, %c0_i32_16 : i32
    scf.if %28 {
      %c0_17 = arith.constant 0 : index
      %c0_18 = arith.constant 0 : index
      %29 = vector.load %arg8[%c0_17, %c0_18] : memref<49x304xf32, #tpu.memory_space<vmem>>, vector<49x304xf32>
      %cst_19 = arith.constant dense<0.000000e+00> : vector<304xf32>
      %30 = vector.multi_reduction <add>, %29, %cst_19 [0] : vector<49x304xf32> to vector<304xf32>
      %31 = vector.shape_cast %30 : vector<304xf32> to vector<1x304xf32>
      %cst_20 = arith.constant 4.900000e+01 : f32
      %32 = vector.broadcast %cst_20 : f32 to vector<1x304xf32>
      %33 = arith.divf %31, %32 : vector<1x304xf32>
      %34 = vector.broadcast %33 : vector<1x304xf32> to vector<49x304xf32>
      %35 = arith.subf %29, %34 : vector<49x304xf32>
      %36 = arith.mulf %35, %35 : vector<49x304xf32>
      %cst_21 = arith.constant dense<0.000000e+00> : vector<304xf32>
      %37 = vector.multi_reduction <add>, %36, %cst_21 [0] : vector<49x304xf32> to vector<304xf32>
      %38 = vector.shape_cast %37 : vector<304xf32> to vector<1x304xf32>
      %cst_22 = arith.constant 4.900000e+01 : f32
      %39 = vector.broadcast %cst_22 : f32 to vector<1x304xf32>
      %40 = arith.divf %38, %39 : vector<1x304xf32>
      %cst_23 = arith.constant 1.000000e-03 : f32
      %41 = vector.broadcast %cst_23 : f32 to vector<1x304xf32>
      %42 = arith.addf %40, %41 : vector<1x304xf32>
      %43 = math.rsqrt %42 : vector<1x304xf32>
      %44 = vector.broadcast %33 : vector<1x304xf32> to vector<49x304xf32>
      %45 = arith.subf %29, %44 : vector<49x304xf32>
      %46 = vector.broadcast %43 : vector<1x304xf32> to vector<49x304xf32>
      %47 = arith.mulf %45, %46 : vector<49x304xf32>
      %c0_24 = arith.constant 0 : index
      %c0_25 = arith.constant 0 : index
      %48 = vector.load %arg6[%c0_24, %c0_25] : memref<1x304xf32, #tpu.memory_space<vmem>>, vector<1x304xf32>
      %49 = vector.broadcast %48 : vector<1x304xf32> to vector<49x304xf32>
      %50 = arith.mulf %47, %49 : vector<49x304xf32>
      %c0_26 = arith.constant 0 : index
      %c0_27 = arith.constant 0 : index
      %51 = vector.load %arg7[%c0_26, %c0_27] : memref<1x304xf32, #tpu.memory_space<vmem>>, vector<1x304xf32>
      %52 = vector.broadcast %51 : vector<1x304xf32> to vector<49x304xf32>
      %53 = arith.addf %50, %52 : vector<49x304xf32>
      %c0_28 = arith.constant 0 : index
      %c0_29 = arith.constant 0 : index
      %54 = vector.load %arg8[%c0_28, %c0_29] : memref<49x304xf32, #tpu.memory_space<vmem>>, vector<49x304xf32>
      tpu.vector_store %arg8[%c0_28, %c0_29], %53 {strides = array<i32>} : memref<49x304xf32, #tpu.memory_space<vmem>>, vector<49x304xf32>,
    } else {
    }
    return
  }
  func.func @transform_0(%arg0: i32) -> (i32, i32) {
    %c0_i32 = arith.constant 0 : i32
    %c0_i32_0 = arith.constant 0 : i32
    %c0_i32_1 = arith.constant 0 : i32
    return %c0_i32, %c0_i32_0 : i32, i32
  }
  func.func @transform_1(%arg0: i32) -> (i32, i32) {
    %c0_i32 = arith.constant 0 : i32
    %c0_i32_0 = arith.constant 0 : i32
    return %arg0, %c0_i32 : i32, i32
  }
  func.func @transform_2(%arg0: i32) -> (i32, i32) {
    %c0_i32 = arith.constant 0 : i32
    %c0_i32_0 = arith.constant 0 : i32
    return %arg0, %c0_i32 : i32, i32
  }
  func.func @transform_3(%arg0: i32) -> (i32, i32) {
    %c0_i32 = arith.constant 0 : i32
    %c0_i32_0 = arith.constant 0 : i32
    return %arg0, %c0_i32 : i32, i32
  }
  func.func @transform_4(%arg0: i32) -> (i32, i32) {
    %c0_i32 = arith.constant 0 : i32
    %c0_i32_0 = arith.constant 0 : i32
    return %arg0, %c0_i32 : i32, i32
  }
  func.func @transform_5(%arg0: i32) -> (i32, i32) {
    %c0_i32 = arith.constant 0 : i32
    %c0_i32_0 = arith.constant 0 : i32
    %c0_i32_1 = arith.constant 0 : i32
    return %c0_i32, %c0_i32_0 : i32, i32
  }
  func.func @transform_6(%arg0: i32) -> (i32, i32) {
    %c0_i32 = arith.constant 0 : i32
    %c0_i32_0 = arith.constant 0 : i32
    %c0_i32_1 = arith.constant 0 : i32
    return %c0_i32, %c0_i32_0 : i32, i32
  }
  func.func @transform_7(%arg0: i32) -> (i32, i32) {
    %c0_i32 = arith.constant 0 : i32
    %c0_i32_0 = arith.constant 0 : i32
    %c0_i32_1 = arith.constant 0 : i32
    return %c0_i32, %c0_i32_0 : i32, i32
  }
}

</mosaic_0001>

<bundles_post_ra>
// kernel: fused_se_conv_bn.1
= control target key start
LH: loop header
LB: loop body
LE: loop exit
PB: predicated region body
PF: predicated region fallthrough
CT: control target
= control target key end

     0   :  { %s6561_s24 = smov 0   ;;  %s8420_s0 = inlined_call_operand.vmem [shape: f32[1,76], index: 0, kind: input, shape index: {}]   ;;  %s8421_s1 = inlined_call_operand.vmem [shape: f32[1824,49], index: 1, kind: input, shape index: {}]   ;;  %s8422_s2 = inlined_call_operand.vmem [shape: bf16[1824,76], index: 2, kind: input, shape index: {}]   ;;  %s8423_s3 = inlined_call_operand.vmem [shape: f32[1824,1], index: 3, kind: input, shape index: {}]   ;;  %s8424_s4 = inlined_call_operand.vmem [shape: bf16[1824,304], index: 4, kind: input, shape index: {}]   ;;  %s8425_s5 = inlined_call_operand.vmem [shape: f32[1,304], index: 5, kind: input, shape index: {}]   ;;  %s8426_s6 = inlined_call_operand.vmem [shape: f32[1,304], index: 6, kind: input, shape index: {}]   ;;  %s8427_s7 = inlined_call_operand.vmem [shape: f32[49,304], index: 7, kind: output, shape index: {}]  }
   0x1 LB: > { %s6567_s25 = sadd.s32 4294967295, %s6517_s24   ;;  %p5064_p0 = scmp.ge.s32.totalorder %s6517_s24, 1  ;;  %s6517_s24 = sphi %s6561_s24, %s17_s24  }
   0x2   : > { %p267_p1 = scmp.lt.s32.totalorder %s6517_s24, 3 }
   0x4   : > { %p268_p2 = pnand %p5064_p0, %p267_p1 }
   0x6   : > { %271 = sbr.rel (%p268_p2) target bundleno = 1317 (0x525), region = 48 }
   0xd   : > { %s310_s26 = smul.u32 114, %s6567_s25  ;;  %p5069_p4 = scmp.ne.s32.totalorder %s6567_s25, 0 }
   0xe   : > { %vm342_vm0 = vcmask (!%p5069_p4), 392192   ;;  %vm361_vm1 = vcmask (!%p5069_p4), 385024   ;;  %v6519_v0 = vmov (!%p5069_p4), 0.0  }
   0xf   : > { %p311_p3 = scmp.lt.s32.totalorder %s310_s26, 227  ;;  %340 = vst [vmem:[%s8427_s7] sm:$0xff] (!%p5069_p4), %v6519_v0  ;;  %341 = vst [vmem:[%s8427_s7 + $0x8] sm:$0xff] (!%p5069_p4), %v6519_v0 }
  0x10   : > { %339 = sbr.rel (%p5069_p4) target bundleno = 26 (0x1a), region = 52  ;;  %344 = vst [vmem:[%s8427_s7 + $0x18] sm:$0xff] (!%p5069_p4), %v6519_v0  ;;  %345 = vst [vmem:[%s8427_s7 + $0x20] sm:$0xff] (!%p5069_p4), %v6519_v0 }
  0x11   : > { %s8530_s26 = smov (!%p311_p3, %s310_s26), 227  ;;  %347 = vst [vmem:[%s8427_s7 + $0x30] sm:$0xff] (!%p5069_p4), %v6519_v0  ;;  %348 = vst [vmem:[%s8427_s7 + $0x38] sm:$0xff] (!%p5069_p4), %v6519_v0 }
  0x12   : > { %s5065_s27 = sshll.u32 %s8530_s26, 3  ;;  %s5066_s28 = sshll.u32 %s8530_s26, 2  ;;  %350 = vst [vmem:[%s8427_s7 + $0x48] sm:$0xff] (!%p5069_p4), %v6519_v0  ;;  %351 = vst [vmem:[%s8427_s7 + $0x50] sm:$0xff] (!%p5069_p4), %v6519_v0 }
  0x13   : > { %s6575_s8 = scalar_lea.vmem %s8421_s1, %s5065_s27  ;;  %s6580_s11 = scalar_lea.vmem %s8422_s2, %s5066_s28  ;;  %353 = vst [vmem:[%s8427_s7 + $0x60] sm:$0xff] (!%p5069_p4), %v6519_v0  ;;  %354 = vst [vmem:[%s8427_s7 + $0x68] sm:$0xff] (!%p5069_p4), %v6519_v0 }
  0x14   : > { %s6585_s14 = scalar_lea.vmem %s8423_s3, %s5065_s27  ;;  %s5807_s15 = smul.u32 12, %s8530_s26  ;;  %356 = vst [vmem:[%s8427_s7 + $0x78] sm:$0xff] (!%p5069_p4), %v6519_v0  ;;  %357 = vst [vmem:[%s8427_s7 + $0x80] sm:$0xff] (!%p5069_p4), %v6519_v0 }
  0x15   : > { %359 = vst [vmem:[%s8427_s7 + $0x90] sm:$0x1] (!%p5069_p4), %v6519_v0  ;;  %360 = vst [vmem:[%s8427_s7 + $0x98] sm:$0x1] (!%p5069_p4), %v6519_v0 }
  0x16   : > { %s6590_s18 = scalar_lea.vmem %s8424_s4, %s5807_s15  ;;  %343 = vst.msk [vmem:[%s8427_s7 + $0x10] sm:$0xff] (!%p5069_p4), %vm342_vm0, %v6519_v0  ;;  %346 = vst.msk [vmem:[%s8427_s7 + $0x28] sm:$0xff] (!%p5069_p4), %vm342_vm0, %v6519_v0 }
  0x17   : > { %349 = vst.msk [vmem:[%s8427_s7 + $0x40] sm:$0xff] %vm342_vm0, %v6519_v0  ;;  %352 = vst.msk [vmem:[%s8427_s7 + $0x58] sm:$0xff] %vm342_vm0, %v6519_v0 }
  0x18   : > { %355 = vst.msk [vmem:[%s8427_s7 + $0x70] sm:$0xff] %vm342_vm0, %v6519_v0  ;;  %358 = vst.msk [vmem:[%s8427_s7 + $0x88] sm:$0xff] %vm342_vm0, %v6519_v0 }
  0x19   : > { %362 = vst.msk [vmem:[%s8427_s7 + $0xa0] sm:$0x1] %vm361_vm1, %v6519_v0 }
  0x1a PF: > { %v5595_v1 = vld [vmem:[%s6580_s11 + $0x8] sm:$0xff]   ;;  %v6667_v2 = vld [vmem:[%s8420_s0] ss:$0 sm:$0xff]  ;;  %v5596_v8 = vld [vmem:[%s6580_s11 + $0x10] sm:$0xff]   ;;  %vm712_vm2 = vcmask 621568   ;;  %vm4111_vm3 = vcmask 130048  }
  0x1b   : > { %v5368_v3 = vld [vmem:[%s6580_s11] sm:$0xff]   ;;  %v5373_v4 = vunpack.c.l.bf16 %v5595_v1  ;;  %v5374_v6 = vunpack.c.h.bf16 %v5595_v1  ;;  %v5378_v9 = vunpack.c.h.bf16 %v5596_v8  ;;  %v5377_v10 = vunpack.c.l.bf16 %v5596_v8  ;;  %v5597_v15 = vld [vmem:[%s6580_s11 + $0x18] sm:$0xff]   ;;  %v5599_v31 = vld [vmem:[%s6580_s11 + $0x28] sm:$0xff]   ;;  %p5364_p5 = scmp.ne.s32.totalorder %s6567_s25, 1 }
  0x1c   : > { %v5369_v5 = vunpack.c.l.bf16 %v5368_v3  ;;  %v5370_v7 = vunpack.c.h.bf16 %v5368_v3  ;;  %v5382_v18 = vunpack.c.h.bf16 %v5597_v15  ;;  %v5381_v19 = vunpack.c.l.bf16 %v5597_v15  ;;  %v5598_v24 = vld [vmem:[%s6580_s11 + $0x20] sm:$0xff]   ;;  %v5600_v32 = vld [vmem:[%s6580_s11 + $0x30] sm:$0xff]   ;;  %v5601_v45 = vld [vmem:[%s6580_s11 + $0x38] sm:$0xff]  }
  0x1d   : > { %v600_v11 = vmul.f32 %v5373_v4, %v6667_v2  ;;  %v601_v13 = vmul.f32 %v5374_v6, %v6667_v2  ;;  %v603_v22 = vmul.f32 %v5378_v9, %v6667_v2  ;;  %v602_v23 = vmul.f32 %v5377_v10, %v6667_v2  ;;  %v5602_v46 = vld [vmem:[%s6580_s11 + $0x40] sm:$0xff]   ;;  %v5603_v59 = vld [vmem:[%s6580_s11 + $0x48] sm:$0xff]   ;;  %v5604_v3 = vld [vmem:[%s6580_s11 + $0x50] sm:$0xff]  }
  0x1e   : > { %v598_v12 = vmul.f32 %v5369_v5, %v6667_v2  ;;  %v599_v14 = vmul.f32 %v5370_v7, %v6667_v2  ;;  %v605_v25 = vmul.f32 %v5382_v18, %v6667_v2  ;;  %v604_v26 = vmul.f32 %v5381_v19, %v6667_v2  ;;  %v5605_v10 = vld [vmem:[%s6580_s11 + $0x58] sm:$0xff]  }
  0x1f   : > { %v719_v16 = vsel %vm712_vm2, %v600_v11, 0.0  ;;  %v722_v20 = vsel %vm712_vm2, %v601_v13, 0.0  ;;  %v728_v27 = vsel %vm712_vm2, %v603_v22, 0.0  ;;  %v725_v28 = vsel %vm712_vm2, %v602_v23, 0.0  ;;  %v5606_v13 = vld [vmem:[%s6580_s11 + $0x60] sm:$0xff]  }
  0x20   : > { %v713_v17 = vsel %vm712_vm2, %v598_v12, 0.0  ;;  %720 = vadd.xlane.f32.xlu1 %v719_v16  ;;  %v716_v21 = vsel %vm712_vm2, %v599_v14, 0.0  ;;  %v5386_v29 = vunpack.c.h.bf16 %v5598_v24  ;;  %v5385_v30 = vunpack.c.l.bf16 %v5598_v24 }
  0x21   : > { %714 = vadd.xlane.f32.xlu0 %v713_v17  ;;  %v734_v33 = vsel %vm712_vm2, %v605_v25, 0.0  ;;  %v731_v34 = vsel %vm712_vm2, %v604_v26, 0.0  ;;  %v5390_v37 = vunpack.c.h.bf16 %v5599_v31  ;;  %v5389_v38 = vunpack.c.l.bf16 %v5599_v31  ;;  %v5608_v31 = vld [vmem:[%s6580_s11 + $0x70] sm:$0xff]  }
  0x22   : > { %v607_v35 = vmul.f32 %v5386_v29, %v6667_v2  ;;  %v606_v36 = vmul.f32 %v5385_v30, %v6667_v2  ;;  %v5394_v39 = vunpack.c.h.bf16 %v5600_v32  ;;  %v5393_v40 = vunpack.c.l.bf16 %v5600_v32 }
  0x23   : > { %v609_v43 = vmul.f32 %v5390_v37, %v6667_v2  ;;  %v608_v44 = vmul.f32 %v5389_v38, %v6667_v2  ;;  %v5398_v48 = vunpack.c.h.bf16 %v5601_v45  ;;  %v5397_v52 = vunpack.c.l.bf16 %v5601_v45  ;;  %v5609_v38 = vld [vmem:[%s6580_s11 + $0x78] sm:$0xff]  }
  0x24   : > { %723 = vadd.xlane.f32.xlu1 %v722_v20  ;;  %v740_v41 = vsel %vm712_vm2, %v607_v35, 0.0  ;;  %v737_v42 = vsel %vm712_vm2, %v606_v36, 0.0  ;;  %v611_v47 = vmul.f32 %v5394_v39, %v6667_v2  ;;  %v610_v51 = vmul.f32 %v5393_v40, %v6667_v2  ;;  %v5607_v20 = vld [vmem:[%s6580_s11 + $0x68] sm:$0xff]  }
  0x25   : > { %717 = vadd.xlane.f32.xlu0 %v716_v21  ;;  %v746_v49 = vsel %vm712_vm2, %v609_v43, 0.0  ;;  %v743_v50 = vsel %vm712_vm2, %v608_v44, 0.0  ;;  %v613_v54 = vmul.f32 %v5398_v48, %v6667_v2  ;;  %v5402_v55 = vunpack.c.h.bf16 %v5602_v46 }
  0x26   : > { %v752_v53 = vsel %vm712_vm2, %v611_v47, 0.0  ;;  %v749_v56 = vsel %vm712_vm2, %v610_v51, 0.0  ;;  %v612_v57 = vmul.f32 %v5397_v52, %v6667_v2  ;;  %v5401_v58 = vunpack.c.l.bf16 %v5602_v46  ;;  %v5611_v52 = vld [vmem:[%s6580_s11 + $0x88] sm:$0xff]  }
  0x27   : > { %v758_v60 = vsel %vm712_vm2, %v613_v54, 0.0  ;;  %v615_v61 = vmul.f32 %v5402_v55, %v6667_v2  ;;  %v5406_v0 = vunpack.c.h.bf16 %v5603_v59  ;;  %v5405_v1 = vunpack.c.l.bf16 %v5603_v59  ;;  %v5612_v59 = vld [vmem:[%s6580_s11 + $0x90] sm:$0xff]  }
  0x28   : > { %729 = vadd.xlane.f32.xlu1 %v728_v27  ;;  %v755_v62 = vsel %vm712_vm2, %v612_v57, 0.0  ;;  %v614_v63 = vmul.f32 %v5401_v58, %v6667_v2  ;;  %v5410_v4 = vunpack.c.h.bf16 %v5604_v3  ;;  %v5409_v5 = vunpack.c.l.bf16 %v5604_v3 }
  0x29   : > { %726 = vadd.xlane.f32.xlu0 %v725_v28  ;;  %v764_v6 = vsel %vm712_vm2, %v615_v61, 0.0  ;;  %v617_v8 = vmul.f32 %v5406_v0, %v6667_v2  ;;  %v616_v9 = vmul.f32 %v5405_v1, %v6667_v2  ;;  %v5414_v12 = vunpack.c.h.bf16 %v5605_v10 }
  0x2a   : > { %v761_v7 = vsel %vm712_vm2, %v614_v63, 0.0  ;;  %v619_v11 = vmul.f32 %v5410_v4, %v6667_v2  ;;  %v618_v16 = vmul.f32 %v5409_v5, %v6667_v2  ;;  %v5413_v17 = vunpack.c.l.bf16 %v5605_v10  ;;  %v5614_v10 = vld [vmem:[%s6580_s11 + $0xa0] sm:$0xff]  }
  0x2b   : > { %v770_v14 = vsel %vm712_vm2, %v617_v8, 0.0  ;;  %v767_v15 = vsel %vm712_vm2, %v616_v9, 0.0  ;;  %v621_v18 = vmul.f32 %v5414_v12, %v6667_v2  ;;  %v5418_v19 = vunpack.c.h.bf16 %v5606_v13 }
  0x2c   : > { %735 = vadd.xlane.f32.xlu1 %v734_v33  ;;  %v776_v21 = vsel %vm712_vm2, %v619_v11, 0.0  ;;  %v773_v22 = vsel %vm712_vm2, %v618_v16, 0.0  ;;  %v620_v23 = vmul.f32 %v5413_v17, %v6667_v2  ;;  %v5417_v24 = vunpack.c.l.bf16 %v5606_v13  ;;  %v5615_v17 = vld [vmem:[%s6580_s11 + $0xa8] sm:$0xff]  }
  0x2d   : > { %732 = vadd.xlane.f32.xlu0 %v731_v34  ;;  %v782_v25 = vsel %vm712_vm2, %v621_v18, 0.0  ;;  %v623_v26 = vmul.f32 %v5418_v19, %v6667_v2  ;;  %v5422_v29 = vunpack.c.h.bf16 %v5607_v20  ;;  %v5421_v30 = vunpack.c.l.bf16 %v5607_v20 }
  0x2e   : > { %v779_v27 = vsel %vm712_vm2, %v620_v23, 0.0  ;;  %v622_v28 = vmul.f32 %v5417_v24, %v6667_v2  ;;  %v5426_v32 = vunpack.c.h.bf16 %v5608_v31  ;;  %v5425_v33 = vunpack.c.l.bf16 %v5608_v31  ;;  %v5616_v24 = vld [vmem:[%s6580_s11 + $0xb0] sm:$0xff]  }
  0x2f   : > { %v788_v34 = vsel %vm712_vm2, %v623_v26, 0.0  ;;  %v625_v36 = vmul.f32 %v5422_v29, %v6667_v2  ;;  %v624_v37 = vmul.f32 %v5421_v30, %v6667_v2  ;;  %v5430_v40 = vunpack.c.h.bf16 %v5609_v38 }
  0x30   : > { %741 = vadd.xlane.f32.xlu1 %v740_v41  ;;  %v785_v35 = vsel %vm712_vm2, %v622_v28, 0.0  ;;  %v627_v39 = vmul.f32 %v5426_v32, %v6667_v2  ;;  %v5610_v41 = vld [vmem:[%s6580_s11 + $0x80] sm:$0xff]   ;;  %v626_v44 = vmul.f32 %v5425_v33, %v6667_v2  ;;  %v5429_v45 = vunpack.c.l.bf16 %v5609_v38 }
  0x31   : > { %738 = vadd.xlane.f32.xlu0 %v737_v42  ;;  %v794_v42 = vsel %vm712_vm2, %v625_v36, 0.0  ;;  %v791_v43 = vsel %vm712_vm2, %v624_v37, 0.0  ;;  %v629_v46 = vmul.f32 %v5430_v40, %v6667_v2  ;;  %v5434_v47 = vunpack.c.h.bf16 %v5610_v41  ;;  %v5618_v38 = vld [vmem:[%s6580_s11 + $0xc0] sm:$0xff]  }
  0x32   : > { %v800_v48 = vsel %vm712_vm2, %v627_v39, 0.0  ;;  %v5433_v51 = vunpack.c.l.bf16 %v5610_v41  ;;  %v5438_v57 = vunpack.c.h.bf16 %v5611_v52  ;;  %v5437_v58 = vunpack.c.l.bf16 %v5611_v52 }
  0x33   : > { %v631_v54 = vmul.f32 %v5434_v47, %v6667_v2  ;;  %v5441_v61 = vunpack.c.l.bf16 %v5612_v59  ;;  %v5450_v12 = vunpack.c.h.bf16 %v5614_v10  ;;  %v5449_v16 = vunpack.c.l.bf16 %v5614_v10 }
  0x34   : > { %747 = vadd.xlane.f32.xlu1 %v746_v49  ;;  %v797_v49 = vsel %vm712_vm2, %v626_v44, 0.0  ;;  %v633_v1 = vmul.f32 %v5438_v57, %v6667_v2  ;;  %v632_v3 = vmul.f32 %v5437_v58, %v6667_v2  ;;  %v5453_v23 = vunpack.c.l.bf16 %v5615_v17 }
  0x35   : > { %744 = vadd.xlane.f32.xlu0 %v743_v50  ;;  %v628_v50 = vmul.f32 %v5429_v45, %v6667_v2  ;;  %v812_v63 = vsel %vm712_vm2, %v631_v54, 0.0  ;;  %v634_v8 = vmul.f32 %v5441_v61, %v6667_v2  ;;  %v639_v19 = vmul.f32 %v5450_v12, %v6667_v2  ;;  %v5619_v45 = vld [vmem:[%s6580_s11 + $0xc8] sm:$0xff]  }
  0x36   : > { %v5458_v26 = vunpack.c.h.bf16 %v5616_v24  ;;  %v640_v31 = vmul.f32 %v5453_v23, %v6667_v2  ;;  %v5466_v40 = vunpack.c.h.bf16 %v5618_v38  ;;  %v5465_v44 = vunpack.c.l.bf16 %v5618_v38 }
  0x37   : > { %v803_v55 = vsel %vm712_vm2, %v628_v50, 0.0  ;;  %v836_v28 = vsel %vm712_vm2, %v639_v19, 0.0  ;;  %v5469_v52 = vunpack.c.l.bf16 %v5619_v45  ;;  %vm4687_vm4 = vcmask 392192  }
  0x38   : > { %753 = vadd.xlane.f32.xlu1 %v752_v53  ;;  %v806_v53 = vsel %vm712_vm2, %v629_v46, 0.0  ;;  %v643_v33 = vmul.f32 %v5458_v26, %v6667_v2  ;;  %v5620_v46 = vld [vmem:[%s6580_s11 + $0xd0] sm:$0xff]   ;;  %v646_v50 = vmul.f32 %v5465_v44, %v6667_v2  ;;  %vm4706_vm5 = vcmask 385024  }
  0x39   : > { %750 = vadd.xlane.f32.xlu0 %v749_v56  ;;  %v630_v56 = vmul.f32 %v5433_v51, %v6667_v2  ;;  %v5470_v51 = vunpack.c.h.bf16 %v5619_v45  ;;  %v5474_v54 = vunpack.c.h.bf16 %v5620_v46  ;;  %vm4738_vm6 = vcmask (!%p5364_p5), 1040384  }
  0x3a   : > { %v848_v41 = vsel %vm712_vm2, %v643_v33, 0.0  ;;  %v857_v58 = vsel %vm712_vm2, %v646_v50, 0.0 }
  0x3b   : > { %v809_v0 = vsel %vm712_vm2, %v630_v56, 0.0  ;;  %v651_v61 = vmul.f32 %v5474_v54, %v6667_v2 }
  0x3c   : > { %759 = vadd.xlane.f32.xlu1 %v758_v60  ;;  %v5442_v60 = vunpack.c.h.bf16 %v5612_v59  ;;  %v649_v59 = vmul.f32 %v5470_v51, %v6667_v2 }
  0x3d   : > { %756 = vadd.xlane.f32.xlu0 %v755_v62  ;;  %v5613_v62 = vld [vmem:[%s6580_s11 + $0x98] sm:$0xff]  }
  0x3e   : > { %v5446_v4 = vunpack.c.h.bf16 %v5613_v62  ;;  %v635_v5 = vmul.f32 %v5442_v60, %v6667_v2  ;;  %v5445_v9 = vunpack.c.l.bf16 %v5613_v62  ;;  %v648_v60 = vmul.f32 %v5469_v52, %v6667_v2 }
  0x40   : > { %765 = vadd.xlane.f32.xlu1 %v764_v6  ;;  %v818_v6 = vsel %vm712_vm2, %v633_v1, 0.0  ;;  %v637_v11 = vmul.f32 %v5446_v4, %v6667_v2  ;;  %v824_v13 = vsel %vm712_vm2, %v635_v5, 0.0  ;;  %v5622_v4 = vld [vmem:[%s6580_s11 + $0xe0] sm:$0xff]   ;;  %v872_v5 = vsel %vm712_vm2, %v651_v61, 0.0 }
  0x41   : > { %762 = vadd.xlane.f32.xlu0 %v761_v7  ;;  %v815_v7 = vsel %vm712_vm2, %v632_v3, 0.0  ;;  %v5481_v10 = vunpack.c.l.bf16 %v5622_v4 }
  0x42   : > { %v830_v18 = vsel %vm712_vm2, %v637_v11, 0.0  ;;  %v5623_v11 = vld [vmem:[%s6580_s11 + $0xe8] sm:$0xff]  }
  0x44   : > { %771 = vadd.xlane.f32.xlu1 %v770_v14  ;;  %v821_v14 = vsel %vm712_vm2, %v634_v8, 0.0 }
  0x45   : > { %768 = vadd.xlane.f32.xlu0 %v767_v15  ;;  %v636_v15 = vmul.f32 %v5445_v9, %v6667_v2 }
  0x47   : > { %v827_v20 = vsel %vm712_vm2, %v636_v15, 0.0  ;;  %v5486_v15 = vunpack.c.h.bf16 %v5623_v11 }
  0x48   : > { %777 = vadd.xlane.f32.xlu1 %v776_v21  ;;  %v638_v21 = vmul.f32 %v5449_v16, %v6667_v2  ;;  %v5485_v16 = vunpack.c.l.bf16 %v5623_v11  ;;  %v5632_v11 = vld [vmem:[%s6580_s11 + $0x130] sm:$0xff]  }
  0x49   : > { %774 = vadd.xlane.f32.xlu0 %v773_v22  ;;  %v5454_v22 = vunpack.c.h.bf16 %v5615_v17  ;;  %v5624_v17 = vld [vmem:[%s6580_s11 + $0xf0] sm:$0xff]  }
  0x4a   : > { %v833_v29 = vsel %vm712_vm2, %v638_v21, 0.0  ;;  %v5489_v19 = vunpack.c.l.bf16 %v5624_v17  ;;  %v656_v23 = vmul.f32 %v5485_v16, %v6667_v2 }
  0x4b   : > { %v641_v30 = vmul.f32 %v5454_v22, %v6667_v2  ;;  %v657_v22 = vmul.f32 %v5486_v15, %v6667_v2 }
  0x4c   : > { %783 = vadd.xlane.f32.xlu1 %v782_v25  ;;  %v5617_v25 = vld [vmem:[%s6580_s11 + $0xb8] sm:$0xff]  }
  0x4d   : > { %780 = vadd.xlane.f32.xlu0 %v779_v27  ;;  %v5457_v27 = vunpack.c.l.bf16 %v5616_v24  ;;  %v5462_v32 = vunpack.c.h.bf16 %v5617_v25  ;;  %v5461_v37 = vunpack.c.l.bf16 %v5617_v25  ;;  %v5625_v24 = vld [vmem:[%s6580_s11 + $0xf8] sm:$0xff]  }
  0x4e   : > { %v5494_v26 = vunpack.c.h.bf16 %v5625_v24 }
  0x4f   : > { %v642_v36 = vmul.f32 %v5457_v27, %v6667_v2  ;;  %v645_v39 = vmul.f32 %v5462_v32, %v6667_v2  ;;  %v890_v27 = vsel %vm712_vm2, %v657_v22, 0.0 }
  0x50   : > { %789 = vadd.xlane.f32.xlu1 %v788_v34  ;;  %v842_v34 = vsel %vm712_vm2, %v641_v30, 0.0  ;;  %v5493_v30 = vunpack.c.l.bf16 %v5625_v24  ;;  %v661_v32 = vmul.f32 %v5494_v26, %v6667_v2 }
  0x51   : > { %786 = vadd.xlane.f32.xlu0 %v785_v35  ;;  %v839_v35 = vsel %vm712_vm2, %v640_v31, 0.0  ;;  %v854_v47 = vsel %vm712_vm2, %v645_v39, 0.0  ;;  %v5626_v31 = vld [vmem:[%s6580_s11 + $0x100] sm:$0xff]   ;;  %v8428_v39 = vmov 0  }
  0x52   : > { %v5498_v33 = vunpack.c.h.bf16 %v5626_v31  ;;  %v5497_v38 = vunpack.c.l.bf16 %v5626_v31  ;;  %5819 = vset.pattern.permute.xlu1 %v8428_v39  ;;  %5818 = vset.pattern.permute.xlu0 %v8428_v39 }
  0x54   : > { %795 = vadd.xlane.f32.xlu1 %v794_v42  ;;  %v845_v42 = vsel %vm712_vm2, %v642_v36, 0.0  ;;  %v6829_v36 = vld [vmem:[%s8420_s0] ss:$0 sm:$0xff] }
  0x55   : > { %792 = vadd.xlane.f32.xlu0 %v791_v43  ;;  %v644_v43 = vmul.f32 %v5461_v37, %v6667_v2  ;;  %v660_v37 = vmul.f32 %v6829_v36, %v5493_v30 }
  0x58   : > { %801 = vadd.xlane.f32.xlu1 %v800_v48  ;;  %v647_v48 = vmul.f32 %v5466_v40, %v6667_v2  ;;  %v902_v40 = vsel %vm712_vm2, %v661_v32, 0.0 }
  0x59   : > { %798 = vadd.xlane.f32.xlu0 %v797_v49  ;;  %v851_v49 = vsel %vm712_vm2, %v644_v43, 0.0  ;;  %v662_v43 = vmul.f32 %v6829_v36, %v5497_v38 }
  0x5a   : > { %v860_v57 = vsel %vm712_vm2, %v647_v48, 0.0 }
  0x5b   : > { %v905_v50 = vsel %vm712_vm2, %v662_v43, 0.0 }
  0x5c   : > { %807 = vadd.xlane.f32.xlu1 %v806_v53  ;;  %v5621_v53 = vld [vmem:[%s6580_s11 + $0xd8] sm:$0xff]  }
  0x5d   : > { %804 = vadd.xlane.f32.xlu0 %v803_v55  ;;  %v5473_v55 = vunpack.c.l.bf16 %v5620_v46  ;;  %v5478_v56 = vunpack.c.h.bf16 %v5621_v53  ;;  %v5477_v3 = vunpack.c.l.bf16 %v5621_v53  ;;  %v5628_v46 = vld [vmem:[%s6580_s11 + $0x110] sm:$0xff]   ;;  %v5629_v53 = vld [vmem:[%s6580_s11 + $0x118] sm:$0xff]  }
  0x5e   : > { %v5505_v48 = vunpack.c.l.bf16 %v5628_v46 }
  0x5f   : > { %v650_v62 = vmul.f32 %v5473_v55, %v6667_v2  ;;  %v653_v1 = vmul.f32 %v5478_v56, %v6667_v2  ;;  %v652_v9 = vmul.f32 %v5477_v3, %v6667_v2  ;;  %v5510_v55 = vunpack.c.h.bf16 %v5629_v53 }
  0x60   : > { %813 = vadd.xlane.f32.xlu1 %v812_v63  ;;  %v866_v63 = vsel %vm712_vm2, %v649_v59, 0.0  ;;  %v5509_v59 = vunpack.c.l.bf16 %v5629_v53 }
  0x61   : > { %810 = vadd.xlane.f32.xlu0 %v809_v0  ;;  %v863_v0 = vsel %vm712_vm2, %v648_v60, 0.0  ;;  %v878_v8 = vsel %vm712_vm2, %v653_v1, 0.0  ;;  %v5630_v60 = vld [vmem:[%s6580_s11 + $0x120] sm:$0xff]   ;;  %v669_v61 = vmul.f32 %v6829_v36, %v5510_v55 }
  0x62   : > { %v668_v1 = vmul.f32 %v6829_v36, %v5509_v59  ;;  %v5513_v3 = vunpack.c.l.bf16 %v5630_v60 }
  0x64   : > { %819 = vadd.xlane.f32.xlu1 %v818_v6  ;;  %v5482_v6 = vunpack.c.h.bf16 %v5622_v4  ;;  %v5631_v4 = vld [vmem:[%s6580_s11 + $0x128] sm:$0xff]  }
  0x65   : > { %816 = vadd.xlane.f32.xlu0 %v815_v7  ;;  %v869_v7 = vsel %vm712_vm2, %v650_v62, 0.0  ;;  %v5514_v62 = vunpack.c.h.bf16 %v5630_v60 }
  0x66   : > { %v655_v12 = vmul.f32 %v5482_v6, %v6667_v2 }
  0x67   : > { %v671_v6 = vmul.f32 %v6829_v36, %v5514_v62 }
  0x68   : > { %825 = vadd.xlane.f32.xlu1 %v824_v13  ;;  %v875_v13 = vsel %vm712_vm2, %v652_v9, 0.0  ;;  %v5518_v9 = vunpack.c.h.bf16 %v5631_v4 }
  0x69   : > { %822 = vadd.xlane.f32.xlu0 %v821_v14  ;;  %v654_v14 = vmul.f32 %v5481_v10, %v6667_v2  ;;  %v5517_v10 = vunpack.c.l.bf16 %v5631_v4  ;;  %v932_v16 = vsel %vm712_vm2, %v671_v6, 0.0 }
  0x6b   : > { %v881_v21 = vsel %vm712_vm2, %v654_v14, 0.0 }
  0x6c   : > { %831 = vadd.xlane.f32.xlu1 %v830_v18  ;;  %v5490_v18 = vunpack.c.h.bf16 %v5624_v17 }
  0x6d   : > { %828 = vadd.xlane.f32.xlu0 %v827_v20  ;;  %v884_v20 = vsel %vm712_vm2, %v655_v12, 0.0  ;;  %v5522_v12 = vunpack.c.h.bf16 %v5632_v11 }
  0x6e   : > { %v659_v25 = vmul.f32 %v5490_v18, %v6667_v2  ;;  %v673_v18 = vmul.f32 %v6829_v36, %v5518_v9 }
  0x70   : > { %837 = vadd.xlane.f32.xlu1 %v836_v28  ;;  %v887_v28 = vsel %vm712_vm2, %v656_v23, 0.0 }
  0x71   : > { %834 = vadd.xlane.f32.xlu0 %v833_v29  ;;  %v658_v29 = vmul.f32 %v5489_v19, %v6667_v2  ;;  %v5627_v2 = vld [vmem:[%s6580_s11 + $0x108] sm:$0xff]   ;;  %v672_v19 = vmul.f32 %v6829_v36, %v5517_v10 }
  0x72   : > { %v5502_v44 = vunpack.c.h.bf16 %v5627_v2  ;;  %v5501_v45 = vunpack.c.l.bf16 %v5627_v2  ;;  %v5635_v2 = vld [vmem:[%s6580_s11 + $0x148] sm:$0xff]  }
  0x73   : > { %v935_v26 = vsel %vm712_vm2, %v672_v19, 0.0 }
  0x74   : > { %843 = vadd.xlane.f32.xlu1 %v842_v34  ;;  %v896_v34 = vsel %vm712_vm2, %v659_v25, 0.0  ;;  %v665_v51 = vmul.f32 %v6829_v36, %v5502_v44  ;;  %v664_v52 = vmul.f32 %v6829_v36, %v5501_v45  ;;  %v938_v25 = vsel %vm712_vm2, %v673_v18, 0.0 }
  0x75   : > { %840 = vadd.xlane.f32.xlu0 %v839_v35  ;;  %v893_v35 = vsel %vm712_vm2, %v658_v29, 0.0  ;;  %v5634_v29 = vld [vmem:[%s6580_s11 + $0x140] sm:$0xff]  }
  0x76   : > { %v914_v56 = vsel %vm712_vm2, %v665_v51, 0.0  ;;  %v5530_v31 = vunpack.c.h.bf16 %v5634_v29  ;;  %v5529_v38 = vunpack.c.l.bf16 %v5634_v29 }
  0x78   : > { %849 = vadd.xlane.f32.xlu1 %v848_v41  ;;  %v663_v41 = vmul.f32 %v6829_v36, %v5498_v33  ;;  %v678_v45 = vmul.f32 %v6829_v36, %v5529_v38 }
  0x79   : > { %846 = vadd.xlane.f32.xlu0 %v845_v42  ;;  %v899_v42 = vsel %vm712_vm2, %v660_v37, 0.0 }
  0x7c   : > { %855 = vadd.xlane.f32.xlu1 %v854_v47  ;;  %v5506_v47 = vunpack.c.h.bf16 %v5628_v46  ;;  %v5534_v46 = vunpack.c.h.bf16 %v5635_v2 }
  0x7d   : > { %852 = vadd.xlane.f32.xlu0 %v851_v49  ;;  %v908_v49 = vsel %vm712_vm2, %v663_v41, 0.0  ;;  %v679_v41 = vmul.f32 %v6829_v36, %v5530_v31 }
  0x7e   : > { %v667_v54 = vmul.f32 %v6829_v36, %v5506_v47  ;;  %v5533_v47 = vunpack.c.l.bf16 %v5635_v2  ;;  %v681_v55 = vmul.f32 %v6829_v36, %v5534_v46 }
  0x7f   : > { %v956_v53 = vsel %vm712_vm2, %v679_v41, 0.0 }
  0x80   : > { %861 = vadd.xlane.f32.xlu1 %v860_v57  ;;  %v911_v57 = vsel %vm712_vm2, %v664_v52, 0.0  ;;  %v962_v62 = vsel %vm712_vm2, %v681_v55, 0.0 }
  0x81   : > { %858 = vadd.xlane.f32.xlu0 %v857_v58  ;;  %v666_v58 = vmul.f32 %v6829_v36, %v5505_v48  ;;  %v5636_v48 = vld [vmem:[%s6580_s11 + $0x150] sm:$0xff]  }
  0x84   : > { %867 = vadd.xlane.f32.xlu1 %v866_v63  ;;  %v920_v63 = vsel %vm712_vm2, %v667_v54, 0.0  ;;  %v953_v54 = vsel %vm712_vm2, %v678_v45, 0.0 }
  0x85   : > { %864 = vadd.xlane.f32.xlu0 %v863_v0  ;;  %v917_v0 = vsel %vm712_vm2, %v666_v58, 0.0 }
  0x88   : > { %873 = vadd.xlane.f32.xlu1 %v872_v5  ;;  %v926_v5 = vsel %vm712_vm2, %v669_v61, 0.0 }
  0x89   : > { %870 = vadd.xlane.f32.xlu0 %v869_v7  ;;  %v923_v7 = vsel %vm712_vm2, %v668_v1, 0.0 }
  0x8c   : > { %879 = vadd.xlane.f32.xlu1 %v878_v8  ;;  %v670_v8 = vmul.f32 %v6829_v36, %v5513_v3  ;;  %v5638_v3 = vld [vmem:[%s6580_s11 + $0x160] sm:$0xff]  }
  0x8d   : > { %876 = vadd.xlane.f32.xlu0 %v875_v13  ;;  %v5521_v13 = vunpack.c.l.bf16 %v5632_v11  ;;  %v5545_v11 = vunpack.c.l.bf16 %v5638_v3 }
  0x8e   : > { %v929_v17 = vsel %vm712_vm2, %v670_v8, 0.0 }
  0x90   : > { %885 = vadd.xlane.f32.xlu1 %v884_v20  ;;  %v5633_v20 = vld [vmem:[%s6580_s11 + $0x138] sm:$0xff]  }
  0x91   : > { %882 = vadd.xlane.f32.xlu0 %v881_v21  ;;  %v675_v21 = vmul.f32 %v6829_v36, %v5522_v12  ;;  %v5526_v22 = vunpack.c.h.bf16 %v5633_v20  ;;  %v5639_v12 = vld [vmem:[%s6580_s11 + $0x168] sm:$0xff]  }
  0x93   : > { %v677_v30 = vmul.f32 %v6829_v36, %v5526_v22  ;;  %v5549_v22 = vunpack.c.l.bf16 %v5639_v12 }
  0x94   : > { %891 = vadd.xlane.f32.xlu1 %v890_v27  ;;  %v674_v27 = vmul.f32 %v6829_v36, %v5521_v13 }
  0x95   : > { %888 = vadd.xlane.f32.xlu0 %v887_v28  ;;  %v5525_v28 = vunpack.c.l.bf16 %v5633_v20  ;;  %v686_v20 = vmul.f32 %v6829_v36, %v5545_v11 }
  0x97   : > { %v676_v37 = vmul.f32 %v6829_v36, %v5525_v28  ;;  %v977_v31 = vsel %vm712_vm2, %v686_v20, 0.0 }
  0x98   : > { %897 = vadd.xlane.f32.xlu1 %v896_v34  ;;  %v944_v34 = vsel %vm712_vm2, %v675_v21, 0.0  ;;  %v5550_v21 = vunpack.c.h.bf16 %v5639_v12 }
  0x99   : > { %894 = vadd.xlane.f32.xlu0 %v893_v35  ;;  %v941_v35 = vsel %vm712_vm2, %v674_v27, 0.0  ;;  %v947_v44 = vsel %vm712_vm2, %v676_v37, 0.0  ;;  %v5641_v37 = vld [vmem:[%s6580_s11 + $0x178] sm:$0xff]  }
  0x9a   : > { %v5558_v2 = vunpack.c.h.bf16 %v5641_v37 }
  0x9c   : > { %903 = vadd.xlane.f32.xlu1 %v902_v40  ;;  %v950_v40 = vsel %vm712_vm2, %v677_v30, 0.0 }
  0x9d   : > { %900 = vadd.xlane.f32.xlu0 %v899_v42 }
  0xa0   : > { %909 = vadd.xlane.f32.xlu1 %v908_v49  ;;  %v5538_v49 = vunpack.c.h.bf16 %v5636_v48 }
  0xa1   : > { %906 = vadd.xlane.f32.xlu0 %v905_v50  ;;  %v5537_v50 = vunpack.c.l.bf16 %v5636_v48  ;;  %v5642_v48 = vld [vmem:[%s6580_s11 + $0x180] sm:$0xff]  }
  0xa2   : > { %v683_v58 = vmul.f32 %v6829_v36, %v5538_v49  ;;  %v693_v49 = vmul.f32 %v6829_v36, %v5558_v2 }
  0xa4   : > { %915 = vadd.xlane.f32.xlu1 %v914_v56  ;;  %v680_v56 = vmul.f32 %v6829_v36, %v5533_v47  ;;  %v968_v8 = vsel %vm712_vm2, %v683_v58, 0.0  ;;  %v5557_v47 = vunpack.c.l.bf16 %v5641_v37  ;;  %v5561_v58 = vunpack.c.l.bf16 %v5642_v48 }
  0xa5   : > { %912 = vadd.xlane.f32.xlu0 %v911_v57  ;;  %v5637_v57 = vld [vmem:[%s6580_s11 + $0x158] sm:$0xff]  }
  0xa6   : > { %v5542_v59 = vunpack.c.h.bf16 %v5637_v57  ;;  %v5541_v1 = vunpack.c.l.bf16 %v5637_v57  ;;  %v692_v57 = vmul.f32 %v6829_v36, %v5557_v47 }
  0xa8   : > { %921 = vadd.xlane.f32.xlu1 %v920_v63  ;;  %v959_v63 = vsel %vm712_vm2, %v680_v56, 0.0  ;;  %v685_v4 = vmul.f32 %v6829_v36, %v5542_v59  ;;  %v684_v10 = vmul.f32 %v6829_v36, %v5541_v1  ;;  %v5643_v59 = vld [vmem:[%s6580_s11 + $0x188] sm:$0xff]  }
  0xa9   : > { %918 = vadd.xlane.f32.xlu0 %v917_v0  ;;  %v682_v0 = vmul.f32 %v6829_v36, %v5537_v50  ;;  %v5562_v50 = vunpack.c.h.bf16 %v5642_v48 }
  0xaa   : > { %v974_v13 = vsel %vm712_vm2, %v685_v4, 0.0  ;;  %v971_v19 = vsel %vm712_vm2, %v684_v10, 0.0  ;;  %v995_v4 = vsel %vm712_vm2, %v692_v57, 0.0 }
  0xab   : > { %v965_v9 = vsel %vm712_vm2, %v682_v0, 0.0 }
  0xac   : > { %927 = vadd.xlane.f32.xlu1 %v926_v5  ;;  %v5546_v5 = vunpack.c.h.bf16 %v5638_v3  ;;  %v998_v3 = vsel %vm712_vm2, %v693_v49, 0.0 }
  0xad   : > { %924 = vadd.xlane.f32.xlu0 %v923_v7  ;;  %v6860_v14 = vpop.xlane.xlu1 %720 }
  0xae   : > { %v6862_v15 = vpop.xlane.xlu0 %714 }
  0xb0   : > { %933 = vadd.xlane.f32.xlu1 %v932_v16  ;;  %v687_v16 = vmul.f32 %v6829_v36, %v5546_v5  ;;  %v694_v5 = vmul.f32 %v6829_v36, %v5561_v58  ;;  %v1056_v58 = vld [vmem:[%s6585_s14 + $0x8] sm:$0xff] }
  0xb1   : > { %930 = vadd.xlane.f32.xlu0 %v929_v17  ;;  %v6870_v23 = vpop.xlane.xlu1 %723 }
  0xb2   : > { %v6872_v24 = vpop.xlane.xlu0 %717  ;;  %v980_v30 = vsel %vm712_vm2, %v687_v16, 0.0  ;;  %v1001_v16 = vsel %vm712_vm2, %v694_v5, 0.0 }
  0xb4   : > { %939 = vadd.xlane.f32.xlu1 %v938_v25  ;;  %v5640_v25 = vld [vmem:[%s6580_s11 + $0x170] sm:$0xff]  }
  0xb5   : > { %936 = vadd.xlane.f32.xlu0 %v935_v26  ;;  %v6879_v32 = vpop.xlane.xlu1 %729  ;;  %v5554_v26 = vunpack.c.h.bf16 %v5640_v25  ;;  %v5553_v27 = vunpack.c.l.bf16 %v5640_v25 }
  0xb6   : > { %v6881_v33 = vpop.xlane.xlu0 %726 }
  0xb7   : > { %v691_v38 = vmul.f32 %v6829_v36, %v5554_v26  ;;  %v690_v46 = vmul.f32 %v6829_v36, %v5553_v27 }
  0xb8   : > { %945 = vadd.xlane.f32.xlu1 %v944_v34  ;;  %v689_v34 = vmul.f32 %v6829_v36, %v5550_v21 }
  0xb9   : > { %942 = vadd.xlane.f32.xlu0 %v941_v35  ;;  %v6889_v42 = vpop.xlane.xlu1 %735  ;;  %v688_v35 = vmul.f32 %v6829_v36, %v5549_v22  ;;  %v992_v55 = vsel %vm712_vm2, %v691_v38, 0.0  ;;  %v989_v56 = vsel %vm712_vm2, %v690_v46, 0.0  ;;  %v5645_v22 = vld [vmem:[%s6580_s11 + $0x198] sm:$0xff]   ;;  %v5646_v38 = vld [vmem:[%s6580_s11 + $0x1a0] sm:$0xff]  }
  0xba   : > { %v6891_v43 = vpop.xlane.xlu0 %732  ;;  %v5574_v25 = vunpack.c.h.bf16 %v5645_v22  ;;  %v5573_v26 = vunpack.c.l.bf16 %v5645_v22  ;;  %v5578_v49 = vunpack.c.h.bf16 %v5646_v38 }
  0xbb   : > { %v983_v45 = vsel %vm712_vm2, %v688_v35, 0.0 }
  0xbc   : > { %951 = vadd.xlane.f32.xlu1 %v950_v40  ;;  %v701_v2 = vmul.f32 %v6829_v36, %v5574_v25 }
  0xbd   : > { %948 = vadd.xlane.f32.xlu0 %v947_v44  ;;  %v6896_v51 = vpop.xlane.xlu1 %741  ;;  %v986_v44 = vsel %vm712_vm2, %v689_v34, 0.0 }
  0xbe   : > { %v6898_v52 = vpop.xlane.xlu0 %738 }
  0xc0   : > { %957 = vadd.xlane.f32.xlu1 %v956_v53 }
  0xc1   : > { %954 = vadd.xlane.f32.xlu0 %v953_v54  ;;  %v6906_v60 = vpop.xlane.xlu1 %747 }
  0xc2   : > { %v6908_v61 = vpop.xlane.xlu0 %744 }
  0xc4   : > { %963 = vadd.xlane.f32.xlu1 %v962_v62  ;;  %v695_v62 = vmul.f32 %v6829_v36, %v5562_v50  ;;  %v5577_v50 = vunpack.c.l.bf16 %v5646_v38 }
  0xc5   : > { %960 = vadd.xlane.f32.xlu0 %v959_v63  ;;  %v6915_v6 = vpop.xlane.xlu1 %753  ;;  %v5566_v63 = vunpack.c.h.bf16 %v5643_v59 }
  0xc6   : > { %v6917_v7 = vpop.xlane.xlu0 %750  ;;  %v1004_v10 = vsel %vm712_vm2, %v695_v62, 0.0 }
  0xc7   : > { %v697_v11 = vmul.f32 %v6829_v36, %v5566_v63  ;;  %v703_v63 = vmul.f32 %v6829_v36, %v5578_v49 }
  0xc8   : > { %969 = vadd.xlane.f32.xlu1 %v968_v8  ;;  %v5565_v8 = vunpack.c.l.bf16 %v5643_v59 }
  0xc9   : > { %966 = vadd.xlane.f32.xlu0 %v965_v9  ;;  %v6925_v17 = vpop.xlane.xlu1 %759  ;;  %v5644_v9 = vld [vmem:[%s6580_s11 + $0x190] sm:$0xff]  }
  0xca   : > { %v6927_v18 = vpop.xlane.xlu0 %756  ;;  %v5570_v20 = vunpack.c.h.bf16 %v5644_v9  ;;  %v5569_v21 = vunpack.c.l.bf16 %v5644_v9  ;;  %v1057_v9 = vld [vmem:[%s6585_s14 + $0x10] sm:$0xff] }
  0xcc   : > { %975 = vadd.xlane.f32.xlu1 %v974_v13  ;;  %v699_v35 = vmul.f32 %v6829_v36, %v5570_v20  ;;  %v698_v37 = vmul.f32 %v6829_v36, %v5569_v21  ;;  %v1028_v21 = vsel %vm712_vm2, %v703_v63, 0.0 }
  0xcd   : > { %972 = vadd.xlane.f32.xlu0 %v971_v19  ;;  %v6932_v28 = vpop.xlane.xlu1 %765  ;;  %v696_v19 = vmul.f32 %v6829_v36, %v5565_v8  ;;  %v5648_v8 = vld [vmem:[%s6580_s11 + $0x1b0] sm:$0xff]  }
  0xce   : > { %v6934_v29 = vpop.xlane.xlu0 %762  ;;  %v1016_v47 = vsel %vm712_vm2, %v699_v35, 0.0  ;;  %v1013_v48 = vsel %vm712_vm2, %v698_v37, 0.0 }
  0xcf   : > { %v1007_v34 = vsel %vm712_vm2, %v696_v19, 0.0 }
  0xd0   : > { %981 = vadd.xlane.f32.xlu1 %v980_v30 }
  0xd1   : > { %978 = vadd.xlane.f32.xlu0 %v977_v31  ;;  %v6942_v40 = vpop.xlane.xlu1 %771  ;;  %v1010_v31 = vsel %vm712_vm2, %v697_v11, 0.0  ;;  %v5586_v11 = vunpack.c.h.bf16 %v5648_v8 }
  0xd2   : > { %v6944_v41 = vpop.xlane.xlu0 %768 }
  0xd3   : > { %v707_v37 = vmul.f32 %v6829_v36, %v5586_v11 }
  0xd4   : > { %987 = vadd.xlane.f32.xlu1 %v986_v44  ;;  %v700_v44 = vmul.f32 %v6829_v36, %v5573_v26 }
  0xd5   : > { %984 = vadd.xlane.f32.xlu0 %v983_v45  ;;  %v6951_v53 = vpop.xlane.xlu1 %777 }
  0xd6   : > { %v6953_v54 = vpop.xlane.xlu0 %774  ;;  %v1019_v57 = vsel %vm712_vm2, %v700_v44, 0.0 }
  0xd8   : > { %993 = vadd.xlane.f32.xlu1 %v992_v55  ;;  %v5647_v55 = vld [vmem:[%s6580_s11 + $0x1a8] sm:$0xff]  }
  0xd9   : > { %990 = vadd.xlane.f32.xlu0 %v989_v56  ;;  %v6960_v0 = vpop.xlane.xlu1 %783  ;;  %v1022_v56 = vsel %vm712_vm2, %v701_v2, 0.0  ;;  %v5581_v5 = vunpack.c.l.bf16 %v5647_v55  ;;  %v1058_v2 = vld [vmem:[%s6585_s14 + $0x18] sm:$0xff] }
  0xda   : > { %v6962_v1 = vpop.xlane.xlu0 %780  ;;  %v1172_v63 = vadd.f32 %v1058_v2, %v6870_v23 }
  0xdb   : > { %v704_v26 = vmul.f32 %v6829_v36, %v5581_v5  ;;  %v1059_v5 = vld [vmem:[%s6585_s14 + $0x20] sm:$0xff] }
  0xdc   : > { %999 = vadd.xlane.f32.xlu1 %v998_v3  ;;  %v702_v3 = vmul.f32 %v6829_v36, %v5577_v50 }
  0xdd   : > { %996 = vadd.xlane.f32.xlu0 %v995_v4  ;;  %v6970_v12 = vpop.xlane.xlu1 %789  ;;  %v5582_v4 = vunpack.c.h.bf16 %v5647_v55  ;;  %v1031_v49 = vsel %vm712_vm2, %v704_v26, 0.0  ;;  %v1060_v26 = vld [vmem:[%s6585_s14 + $0x28] sm:$0xff] }
  0xde   : > { %v6972_v13 = vpop.xlane.xlu0 %786  ;;  %v1025_v22 = vsel %vm712_vm2, %v702_v3, 0.0  ;;  %v1040_v3 = vsel %vm712_vm2, %v707_v37, 0.0 }
  0xdf   : > { %v705_v25 = vmul.f32 %v6829_v36, %v5582_v4 }
  0xe0   : > { %1005 = vadd.xlane.f32.xlu1 %v1004_v10  ;;  %v1170_v10 = vadd.f32 %v1056_v58, %v6872_v24  ;;  %v1171_v24 = vadd.f32 %v1057_v9, %v6860_v14  ;;  %v1064_v58 = vld [vmem:[%s6585_s14 + $0x48] sm:$0xff] }
  0xe1   : > { %1002 = vadd.xlane.f32.xlu0 %v1001_v16  ;;  %v6977_v27 = vpop.xlane.xlu1 %795  ;;  %v5585_v16 = vunpack.c.l.bf16 %v5648_v8 }
  0xe2   : > { %v6979_v30 = vpop.xlane.xlu0 %792  ;;  %v5072_v35 = vmul.f32 -1.442695, %v1170_v10 }
  0xe3   : > { %v706_v38 = vmul.f32 %v6829_v36, %v5585_v16 }
  0xe4   : > { %1011 = vadd.xlane.f32.xlu1 %v1010_v31  ;;  %v5649_v31 = vld [vmem:[%s6580_s11 + $0x1b8] sm:$0xff]   ;;  %6048 = vpow2.f32 %v5072_v35 }
  0xe5   : > { %1008 = vadd.xlane.f32.xlu0 %v1007_v34  ;;  %v6988_v45 = vpop.xlane.xlu1 %801  ;;  %v1055_v34 = vld [vmem:[%s6585_s14] sm:$0xff]  ;;  %v5590_v14 = vunpack.c.h.bf16 %v5649_v31  ;;  %v5589_v50 = vunpack.c.l.bf16 %v5649_v31  ;;  %v1037_v4 = vsel %vm712_vm2, %v706_v38, 0.0  ;;  %v1173_v31 = vadd.f32 %v1059_v5, %v6881_v33 }
  0xe6   : > { %v6990_v46 = vpop.xlane.xlu0 %798  ;;  %v1169_v55 = vadd.f32 %v1055_v34, %v6862_v15  ;;  %v1174_v33 = vadd.f32 %v1060_v26, %v6879_v32 }
  0xe7   : > { %v709_v15 = vmul.f32 %v6829_v36, %v5590_v14  ;;  %v708_v10 = vmul.f32 %v6829_v36, %v5589_v50  ;;  %v5075_v14 = vmul.f32 -1.442695, %v1173_v31 }
  0xe8   : > { %1017 = vadd.xlane.f32.xlu1 %v1016_v47  ;;  %v5071_v16 = vmul.f32 -1.442695, %v1169_v55 }
  0xe9   : > { %1014 = vadd.xlane.f32.xlu0 %v1013_v48  ;;  %v6998_v59 = vpop.xlane.xlu1 %807  ;;  %v1034_v48 = vsel %vm712_vm2, %v705_v25, 0.0  ;;  %v5074_v25 = vmul.f32 -1.442695, %v1172_v63  ;;  %v1046_v35 = vsel %vm712_vm2, %v709_v15, 0.0  ;;  %v1043_v37 = vsel %vm712_vm2, %v708_v10, 0.0  ;;  %v1062_v15 = vld [vmem:[%s6585_s14 + $0x38] sm:$0xff] }
  0xea   : > { %v7000_v62 = vpop.xlane.xlu0 %804  ;;  %v5076_v63 = vmul.f32 -1.442695, %v1174_v33  ;;  %v1176_v26 = vadd.f32 %v1062_v15, %v6889_v42 }
  0xec   : > { %1023 = vadd.xlane.f32.xlu1 %v1022_v56  ;;  %v5650_v56 = vld [vmem:[%s6580_s11 + $0x1c0] sm:$0xff]  }
  0xed   : > { %1020 = vadd.xlane.f32.xlu0 %v1019_v57  ;;  %v7007_v19 = vpop.xlane.xlu1 %813  ;;  %v5073_v57 = vmul.f32 -1.442695, %v1171_v24  ;;  %v5594_v11 = vunpack.c.h.bf16 %v5650_v56  ;;  %v5593_v23 = vunpack.c.l.bf16 %v5650_v56 }
  0xee   : > { %v7009_v20 = vpop.xlane.xlu0 %810 }
  0xef   : > { %6050 = vpow2.f32 %v5073_v57  ;;  %v711_v38 = vmul.f32 %v6829_v36, %v5594_v11  ;;  %v6049_v57 = vpop.eup %6048 }
  0xf0   : > { %1029 = vadd.xlane.f32.xlu1 %v1028_v21  ;;  %v1178_v21 = vadd.f32 %v1064_v58, %v6896_v51  ;;  %v710_v51 = vmul.f32 %v6829_v36, %v5593_v23  ;;  %6052 = vpow2.f32 %v5071_v16  ;;  %v1061_v58 = vld [vmem:[%s6585_s14 + $0x30] sm:$0xff]  ;;  %v1626_v5 = vadd.f32 1.0, %v6049_v57 }
  0xf1   : > { %1026 = vadd.xlane.f32.xlu0 %v1025_v22  ;;  %v7021_v44 = vpop.xlane.xlu1 %819  ;;  %v1066_v22 = vld [vmem:[%s6585_s14 + $0x58] sm:$0xff]  ;;  %6054 = vpow2.f32 %v5074_v25  ;;  %v1052_v56 = vsel %vm712_vm2, %v711_v38, 0.0  ;;  %v1175_v10 = vadd.f32 %v1061_v58, %v6891_v43  ;;  %v1065_v58 = vld [vmem:[%s6585_s14 + $0x50] sm:$0xff] }
  0xf2   : > { %v7023_v47 = vpop.xlane.xlu0 %816  ;;  %v5080_v2 = vmul.f32 -1.442695, %v1178_v21  ;;  %v1049_v36 = vsel %vm712_vm2, %v710_v51, 0.0  ;;  %v1072_v21 = vld [vmem:[%s6585_s14 + $0x88] sm:$0xff]  ;;  %v1179_v15 = vadd.f32 %v1065_v58, %v6908_v61 }
  0xf3   : > { %v5077_v31 = vmul.f32 -1.442695, %v1175_v10 }
  0xf4   : > { %1035 = vadd.xlane.f32.xlu1 %v1034_v48  ;;  %v1180_v48 = vadd.f32 %v1066_v22, %v6906_v60  ;;  %6056 = vpow2.f32 %v5080_v2 }
  0xf5   : > { %1032 = vadd.xlane.f32.xlu0 %v1031_v49  ;;  %v7034_v8 = vpop.xlane.xlu1 %825  ;;  %v1068_v49 = vld [vmem:[%s6585_s14 + $0x68] sm:$0xff]  ;;  %6058 = vpow2.f32 %v5075_v14 }
  0xf6   : > { %v7036_v9 = vpop.xlane.xlu0 %822  ;;  %v5082_v60 = vmul.f32 -1.442695, %v1180_v48  ;;  %v1182_v32 = vadd.f32 %v1068_v49, %v6915_v6  ;;  %v1074_v48 = vld [vmem:[%s6585_s14 + $0x98] sm:$0xff]  ;;  %v5078_v49 = vmul.f32 -1.442695, %v1176_v26 }
  0xf8   : > { %1041 = vadd.xlane.f32.xlu1 %v1040_v3  ;;  %v1070_v3 = vld [vmem:[%s6585_s14 + $0x78] sm:$0xff]  ;;  %6060 = vpow2.f32 %v5082_v60  ;;  %v5084_v16 = vmul.f32 -1.442695, %v1182_v32 }
  0xf9   : > { %1038 = vadd.xlane.f32.xlu0 %v1037_v4  ;;  %v7044_v24 = vpop.xlane.xlu1 %831  ;;  %v6051_v4 = vpop.eup %6050  ;;  %v1184_v6 = vadd.f32 %v1070_v3, %v6925_v17  ;;  %6062 = vpow2.f32 %v5076_v63  ;;  %v1186_v17 = vadd.f32 %v1072_v21, %v6932_v28  ;;  %v1188_v28 = vadd.f32 %v1074_v48, %v6942_v40  ;;  %v1076_v63 = vld [vmem:[%s6585_s14 + $0xa8] sm:$0xff] }
  0xfa   : > { %v7046_v34 = vpop.xlane.xlu0 %828  ;;  %v6053_v22 = vpop.eup %6052  ;;  %v1627_v25 = vadd.f32 1.0, %v6051_v4  ;;  %6064 = vrcp.f32 %v1626_v5  ;;  %v1190_v40 = vadd.f32 %v1076_v63, %v6951_v53 }
  0xfb   : > { %v6055_v38 = vpop.eup %6054  ;;  %6066 = vpow2.f32 %v5084_v16  ;;  %v5086_v51 = vmul.f32 -1.442695, %v1184_v6  ;;  %v1625_v2 = vadd.f32 1.0, %v6053_v22  ;;  %v5088_v60 = vmul.f32 -1.442695, %v1186_v17  ;;  %v1067_v6 = vld [vmem:[%s6585_s14 + $0x60] sm:$0xff] }
  0xfc   : > { %1047 = vadd.xlane.f32.xlu1 %v1046_v35  ;;  %v1063_v35 = vld [vmem:[%s6585_s14 + $0x40] sm:$0xff]  ;;  %6068 = vrcp.f32 %v1627_v25  ;;  %v1628_v14 = vadd.f32 1.0, %v6055_v38  ;;  %v5090_v21 = vmul.f32 -1.442695, %v1188_v28  ;;  %v1181_v61 = vadd.f32 %v1067_v6, %v6917_v7 }
  0xfd   : > { %1044 = vadd.xlane.f32.xlu0 %v1043_v37  ;;  %v7055_v50 = vpop.xlane.xlu1 %837  ;;  %v1177_v42 = vadd.f32 %v1063_v35, %v6898_v52  ;;  %6070 = vpow2.f32 %v5077_v31  ;;  %v5081_v35 = vmul.f32 -1.442695, %v1179_v15  ;;  %v5092_v53 = vmul.f32 -1.442695, %v1190_v40 }
  0xfe   : > { %8430 = vst [vmem:[#allocation2_spill] sm:$0xff] %v7055_v50  ;;  %v7057_v55 = vpop.xlane.xlu0 %834  ;;  %v6057_v33 = vpop.eup %6056  ;;  %6072 = vpow2.f32 %v5086_v51  ;;  %v1967_v50 = vld [vmem:[%s6575_s8] sm:$0xff] }
  0xff   : > { %8431 = vst [vmem:[#allocation3_spill] sm:$0xff] %v7057_v55  ;;  %v6059_v57 = vpop.eup %6058  ;;  %6074 = vrcp.f32 %v1625_v2  ;;  %v1634_v32 = vadd.f32 1.0, %v6057_v33  ;;  %v5079_v4 = vmul.f32 -1.442695, %v1177_v42  ;;  %v1069_v2 = vld [vmem:[%s6585_s14 + $0x70] sm:$0xff] }
 0x100   : > { %1053 = vadd.xlane.f32.xlu1 %v1052_v56  ;;  %6076 = vpow2.f32 %v5078_v49  ;;  %v1629_v5 = vadd.f32 1.0, %v6059_v57  ;;  %v1183_v7 = vadd.f32 %v1069_v2, %v6927_v18  ;;  %v5874_v55 = vld [vmem:[%s6590_s18 + $0xc0] ss:$12 sps:$4 sm:$0xff]  }
 0x101   : > { %1050 = vadd.xlane.f32.xlu0 %v1049_v36  ;;  %v7066_v11 = vpop.xlane.xlu1 %843  ;;  %6078 = vrcp.f32 %v1628_v14  ;;  %v5083_v14 = vmul.f32 -1.442695, %v1181_v61 }
 0x102   : > { %8432 = vst [vmem:[#allocation4_spill] sm:$0xff] %v7066_v11  ;;  %v7068_v23 = vpop.xlane.xlu0 %840  ;;  %v6061_v3 = vpop.eup %6060  ;;  %6080 = vpow2.f32 %v5088_v60 }
 0x103   : > { %8433 = vst [vmem:[#allocation5_spill] sm:$0xff] %v7068_v23  ;;  %v6063_v52 = vpop.eup %6062  ;;  %6082 = vrcp.f32 %v1634_v32  ;;  %v1636_v25 = vadd.f32 1.0, %v6061_v3  ;;  %v1071_v32 = vld [vmem:[%s6585_s14 + $0x80] sm:$0xff] }
 0x104   : > { %v6065_v22 = vpop.eup %6064  ;;  %v1630_v31 = vadd.f32 1.0, %v6063_v52  ;;  %6084 = vpow2.f32 %v5079_v4  ;;  %v1185_v18 = vadd.f32 %v1071_v32, %v6934_v29  ;;  %v5852_v23 = vld [vmem:[%s6590_s18 + $0x4f8] ss:$12 sps:$4 sm:$0xff]  }
 0x105   : > { %v7074_v37 = vpop.xlane.xlu1 %849  ;;  %v6067_v26 = vpop.eup %6066  ;;  %6086 = vrcp.f32 %v1629_v5  ;;  %v5085_v5 = vmul.f32 -1.442695, %v1183_v7 }
 0x106   : > { %8434 = vst [vmem:[#allocation6_spill] sm:$0xff] %v7074_v37  ;;  %v7076_v43 = vpop.xlane.xlu0 %846  ;;  %v6069_v17 = vpop.eup %6068  ;;  %6088 = vpow2.f32 %v5090_v21  ;;  %v1638_v33 = vadd.f32 1.0, %v6067_v26  ;;  %v5087_v61 = vmul.f32 -1.442695, %v1185_v18 }
 0x107   : > { %8435 = vst [vmem:[#allocation7_spill] sm:$0xff] %v7076_v43  ;;  %v6071_v48 = vpop.eup %6070  ;;  %6090 = vrcp.f32 %v1636_v25  ;;  %v5828_v43 = vld [vmem:[%s6590_s18 + $0x498] ss:$12 sps:$4 sm:$0xff]  }
 0x108   : > { %v6073_v49 = vpop.eup %6072  ;;  %6092 = vrcp.f32 %v1630_v31  ;;  %v1631_v28 = vadd.f32 1.0, %v6071_v48 }
 0x109   : > { %v7081_v56 = vpop.xlane.xlu1 %855  ;;  %v6075_v42 = vpop.eup %6074  ;;  %6094 = vpow2.f32 %v5081_v35  ;;  %v1640_v3 = vadd.f32 1.0, %v6073_v49 }
 0x10a   : > { %8436 = vst [vmem:[#allocation8_spill] sm:$0xff] %v7081_v56  ;;  %v7083_v36 = vpop.xlane.xlu0 %852  ;;  %v6077_v60 = vpop.eup %6076  ;;  %6096 = vpow2.f32 %v5092_v53 }
 0x10b   : > { %8437 = vst [vmem:[#allocation9_spill] sm:$0xff] %v7083_v36  ;;  %v6079_v63 = vpop.eup %6078  ;;  %6098 = vrcp.f32 %v1638_v33  ;;  %v1632_v40 = vadd.f32 1.0, %v6077_v60  ;;  %v1075_v33 = vld [vmem:[%s6585_s14 + $0xa0] sm:$0xff] }
 0x10c   : > { %v6081_v4 = vpop.eup %6080  ;;  %6100 = vpow2.f32 %v5083_v14 }
 0x10d   : > { %v7089_v10 = vpop.xlane.xlu1 %861  ;;  %v6083_v52 = vpop.eup %6082  ;;  %6102 = vrcp.f32 %v1631_v28  ;;  %v1642_v26 = vadd.f32 1.0, %v6081_v4 }
 0x10e   : > { %v7091_v16 = vpop.xlane.xlu0 %858  ;;  %v6085_v21 = vpop.eup %6084  ;;  %6104 = vrcp.f32 %v1640_v3  ;;  %v1077_v3 = vld [vmem:[%s6585_s14 + $0xb0] sm:$0xff] }
 0x10f   : > { %v6087_v25 = vpop.eup %6086  ;;  %6106 = vpow2.f32 %v5085_v5  ;;  %v1633_v48 = vadd.f32 1.0, %v6085_v21 }
 0x110   : > { %v6089_v31 = vpop.eup %6088  ;;  %6108 = vrcp.f32 %v1632_v40  ;;  %v1191_v40 = vadd.f32 %v1077_v3, %v6962_v1 }
 0x111   : > { %v7096_v38 = vpop.xlane.xlu1 %867  ;;  %2088 = vperm.xlu1 %5819, %v6065_v22   ;;  %v1073_v22 = vld [vmem:[%s6585_s14 + $0x90] sm:$0xff]  ;;  %v6091_v35 = vpop.eup %6090  ;;  %6110 = vrcp.f32 %v1642_v26 }
 0x112   : > { %v7098_v51 = vpop.xlane.xlu0 %864  ;;  %v1187_v29 = vadd.f32 %v1073_v22, %v6944_v41  ;;  %v6093_v53 = vpop.eup %6092  ;;  %6112 = vpow2.f32 %v5087_v61  ;;  %v1189_v41 = vadd.f32 %v1075_v33, %v6953_v54  ;;  %v5093_v61 = vmul.f32 -1.442695, %v1191_v40 }
 0x113   : > { %v6095_v49 = vpop.eup %6094  ;;  %6114 = vrcp.f32 %v1633_v48 }
 0x114   : > { %v6097_v14 = vpop.eup %6096  ;;  %v5089_v60 = vmul.f32 -1.442695, %v1187_v29  ;;  %v5091_v21 = vmul.f32 -1.442695, %v1189_v41 }
 0x115   : > { %v7102_v57 = vpop.xlane.xlu1 %873  ;;  %2093 = vperm.xlu1 %5819, %v6069_v17   ;;  %v6099_v7 = vpop.eup %6098 }
 0x116   : > { %v7104_v58 = vpop.xlane.xlu0 %870  ;;  %v6101_v4 = vpop.eup %6100 }
 0x117   : > { %2083 = vperm.xlu0 %5818, %v6075_v42   ;;  %v1644_v42 = vadd.f32 1.0, %v6089_v31  ;;  %v6103_v5 = vpop.eup %6102 }
 0x118   : > { %v6105_v18 = vpop.eup %6104 }
 0x119   : > { %v7108_v15 = vpop.xlane.xlu1 %879  ;;  %2098 = vperm.xlu1 %5819, %v6079_v63   ;;  %v1635_v63 = vadd.f32 1.0, %v6095_v49  ;;  %6116 = vrcp.f32 %v1644_v42  ;;  %v6107_v26 = vpop.eup %6106 }
 0x11a   : > { %v7110_v6 = vpop.xlane.xlu0 %876  ;;  %6118 = vpow2.f32 %v5089_v60  ;;  %v6109_v31 = vpop.eup %6108  ;;  %v1639_v1 = vadd.f32 1.0, %v6107_v26 }
 0x11b   : > { %2128 = vperm.xlu0 %5818, %v6083_v52   ;;  %v1646_v52 = vadd.f32 1.0, %v6097_v14  ;;  %6120 = vrcp.f32 %v1635_v63 }
 0x11d   : > { %v7114_v17 = vpop.xlane.xlu1 %885  ;;  %2103 = vperm.xlu1 %5819, %v6087_v25   ;;  %v1637_v25 = vadd.f32 1.0, %v6101_v4  ;;  %6122 = vrcp.f32 %v1646_v52 }
 0x11e   : > { %8438 = vst [vmem:[#allocation10_spill] sm:$0xff] %v7114_v17  ;;  %v7116_v2 = vpop.xlane.xlu0 %882  ;;  %6124 = vpow2.f32 %v5091_v21 }
 0x11f   : > { %8439 = vst [vmem:[#allocation11_spill] sm:$0xff] %v7116_v2  ;;  %2138 = vperm.xlu0 %5818, %v6091_v35   ;;  %v6111_v35 = vpop.eup %6110  ;;  %6126 = vrcp.f32 %v1637_v25 }
 0x120   : > { %v6113_v48 = vpop.eup %6112  ;;  %6128 = vpow2.f32 %v5093_v61 }
 0x121   : > { %v7120_v28 = vpop.xlane.xlu1 %891  ;;  %2108 = vperm.xlu1 %5819, %v6093_v53   ;;  %v6115_v33 = vpop.eup %6114  ;;  %6130 = vrcp.f32 %v1639_v1 }
 0x122   : > { %8440 = vst [vmem:[#allocation12_spill] sm:$0xff] %v7120_v28  ;;  %v7122_v32 = vpop.xlane.xlu0 %888 }
 0x123   : > { %8441 = vst [vmem:[#allocation13_spill] sm:$0xff] %v7122_v32  ;;  %2148 = vperm.xlu0 %5818, %v6099_v7   ;;  %v6117_v49 = vpop.eup %6116  ;;  %v1641_v7 = vadd.f32 1.0, %v6113_v48  ;;  %v5840_v32 = vld [vmem:[%s6590_s18 + $0x4c8] ss:$12 sps:$4 sm:$0xff]  }
 0x124   : > { %v6119_v60 = vpop.eup %6118 }
 0x125   : > { %v7126_v22 = vpop.xlane.xlu1 %897  ;;  %2113 = vperm.xlu1 %5819, %v6103_v5   ;;  %v6121_v41 = vpop.eup %6120  ;;  %6132 = vrcp.f32 %v1641_v7  ;;  %v1643_v52 = vadd.f32 1.0, %v6119_v60 }
 0x126   : > { %8442 = vst [vmem:[#allocation14_spill] sm:$0xff] %v7126_v22  ;;  %v7128_v54 = vpop.xlane.xlu0 %894  ;;  %v1991_v22 = vld [vmem:[%s6575_s8 + $0xc0] sm:$0xff] }
 0x127   : > { %8443 = vst [vmem:[#allocation15_spill] sm:$0xff] %v7128_v54  ;;  %2158 = vperm.xlu0 %5818, %v6105_v18   ;;  %v6123_v63 = vpop.eup %6122  ;;  %6134 = vrcp.f32 %v1643_v52 }
 0x128   : > { %v6125_v5 = vpop.eup %6124 }
 0x129   : > { %v7130_v29 = vpop.xlane.xlu1 %903  ;;  %2118 = vperm.xlu1 %5819, %v6109_v31   ;;  %v6127_v18 = vpop.eup %6126  ;;  %v1645_v25 = vadd.f32 1.0, %v6125_v5 }
 0x12a   : > { %8444 = vst [vmem:[#allocation16_spill] sm:$0xff] %v7130_v29  ;;  %v7132_v53 = vpop.xlane.xlu0 %900  ;;  %v6129_v26 = vpop.eup %6128 }
 0x12b   : > { %8445 = vst [vmem:[#allocation17_spill] sm:$0xff] %v7132_v53  ;;  %2168 = vperm.xlu0 %5818, %v6111_v35   ;;  %v6131_v31 = vpop.eup %6130  ;;  %6136 = vrcp.f32 %v1645_v25  ;;  %v1647_v1 = vadd.f32 1.0, %v6129_v26 }
 0x12d   : > { %v7134_v42 = vpop.xlane.xlu1 %909  ;;  %2123 = vperm.xlu1 %5819, %v6115_v33   ;;  %6138 = vrcp.f32 %v1647_v1 }
 0x12e   : > { %8446 = vst [vmem:[#allocation18_spill] sm:$0xff] %v7134_v42  ;;  %v7136_v14 = vpop.xlane.xlu0 %906 }
 0x12f   : > { %8447 = vst [vmem:[#allocation19_spill] sm:$0xff] %v7136_v14  ;;  %2178 = vperm.xlu0 %5818, %v6117_v49   ;;  %v6133_v48 = vpop.eup %6132  ;;  %v1156_v14 = vld [vmem:[%s6585_s14 + $0x328] sm:$0xff] }
 0x131   : > { %v7138_v3 = vpop.xlane.xlu1 %915  ;;  %2133 = vperm.xlu1 %5819, %v6121_v41   ;;  %v6135_v7 = vpop.eup %6134 }
 0x132   : > { %8448 = vst [vmem:[#allocation20_spill] sm:$0xff] %v7138_v3  ;;  %v7140_v4 = vpop.xlane.xlu0 %912  ;;  %v1078_v3 = vld [vmem:[%s6585_s14 + $0xb8] sm:$0xff] }
 0x133   : > { %8449 = vst [vmem:[#allocation21_spill] sm:$0xff] %v7140_v4  ;;  %2188 = vperm.xlu0 %5818, %v6123_v63  }
 0x135   : > { %v7142_v21 = vpop.xlane.xlu1 %921  ;;  %2143 = vperm.xlu1 %5819, %v6127_v18   ;;  %v6137_v63 = vpop.eup %6136 }
 0x136   : > { %8450 = vst [vmem:[#allocation22_spill] sm:$0xff] %v7142_v21  ;;  %v7144_v40 = vpop.xlane.xlu0 %918  ;;  %v1152_v21 = vld [vmem:[%s6585_s14 + $0x308] sm:$0xff] }
 0x137   : > { %8451 = vst [vmem:[#allocation23_spill] sm:$0xff] %v7144_v40  ;;  %v6139_v18 = vpop.eup %6138  ;;  %v1079_v40 = vld [vmem:[%s6585_s14 + $0xc0] sm:$0xff] }
 0x139   : > { %v7146_v35 = vpop.xlane.xlu1 %927  ;;  %2153 = vperm.xlu1 %5819, %v6131_v31  }
 0x13a   : > { %8452 = vst [vmem:[#allocation24_spill] sm:$0xff] %v7146_v35  ;;  %v7148_v61 = vpop.xlane.xlu0 %924 }
 0x13b   : > { %8453 = vst [vmem:[#allocation25_spill] sm:$0xff] %v7148_v61 }
 0x13d   : > { %v7150_v33 = vpop.xlane.xlu1 %933  ;;  %2163 = vperm.xlu1 %5819, %v6133_v48  }
 0x13e   : > { %8454 = vst [vmem:[#allocation26_spill] sm:$0xff] %v7150_v33  ;;  %v7152_v49 = vpop.xlane.xlu0 %930 }
 0x13f   : > { %8455 = vst [vmem:[#allocation27_spill] sm:$0xff] %v7152_v49 }
 0x141   : > { %v7154_v60 = vpop.xlane.xlu1 %939  ;;  %2173 = vperm.xlu1 %5819, %v6135_v7  }
 0x142   : > { %8456 = vst [vmem:[#allocation28_spill] sm:$0xff] %v7154_v60  ;;  %v7156_v41 = vpop.xlane.xlu0 %936 }
 0x143   : > { %8457 = vst [vmem:[#allocation29_spill] sm:$0xff] %v7156_v41 }
 0x145   : > { %v7158_v52 = vpop.xlane.xlu1 %945  ;;  %2183 = vperm.xlu1 %5819, %v6137_v63  }
 0x146   : > { %8458 = vst [vmem:[#allocation30_spill] sm:$0xff] %v7158_v52  ;;  %v7160_v5 = vpop.xlane.xlu0 %942 }
 0x147   : > { %8459 = vst [vmem:[#allocation31_spill] sm:$0xff] %v7160_v5 }
 0x149   : > { %v7162_v25 = vpop.xlane.xlu1 %951  ;;  %2193 = vperm.xlu1 %5819, %v6139_v18  }
 0x14a   : > { %8460 = vst [vmem:[#allocation32_spill] sm:$0xff] %v7162_v25  ;;  %v7164_v26 = vpop.xlane.xlu0 %948 }
 0x14b   : > { %8461 = vst [vmem:[#allocation33_spill] sm:$0xff] %v7164_v26 }
 0x14d   : > { %v7166_v31 = vpop.xlane.xlu1 %957 }
 0x14e   : > { %8462 = vst [vmem:[#allocation34_spill] sm:$0xff] %v7166_v31  ;;  %v7168_v1 = vpop.xlane.xlu0 %954 }
 0x14f   : > { %8463 = vst [vmem:[#allocation35_spill] sm:$0xff] %v7168_v1  ;;  %v1988_v1 = vld [vmem:[%s6575_s8 + $0xa8] sm:$0xff] }
 0x151   : > { %v7170_v48 = vpop.xlane.xlu1 %963 }
 0x152   : > { %8464 = vst [vmem:[#allocation36_spill] sm:$0xff] %v7170_v48  ;;  %v7172_v7 = vpop.xlane.xlu0 %960 }
 0x153   : > { %8465 = vst [vmem:[#allocation37_spill] sm:$0xff] %v7172_v7  ;;  %v1153_v7 = vld [vmem:[%s6585_s14 + $0x310] sm:$0xff] }
 0x155   : > { %v7174_v39 = vpop.xlane.xlu1 %969 }
 0x156   : > { %8466 = vst [vmem:[#allocation38_spill] sm:$0xff] %v7174_v39  ;;  %v7176_v63 = vpop.xlane.xlu0 %966  ;;  %v1151_v39 = vld [vmem:[%s6585_s14 + $0x300] sm:$0xff] }
 0x157   : > { %8467 = vst [vmem:[#allocation39_spill] sm:$0xff] %v7176_v63  ;;  %v1155_v63 = vld [vmem:[%s6585_s14 + $0x320] sm:$0xff] }
 0x159   : > { %v7178_v52 = vpop.xlane.xlu1 %975 }
 0x15a   : > { %8468 = vst [vmem:[#allocation40_spill] sm:$0xff] %v7178_v52  ;;  %v7180_v18 = vpop.xlane.xlu0 %972 }
 0x15b   : > { %8469 = vst [vmem:[#allocation41_spill] sm:$0xff] %v7180_v18 }
 0x15d   : > { %v7182_v25 = vpop.xlane.xlu1 %981 }
 0x15e   : > { %8470 = vst [vmem:[#allocation42_spill] sm:$0xff] %v7182_v25  ;;  %v7184_v60 = vpop.xlane.xlu0 %978 }
 0x15f   : > { %8471 = vst [vmem:[#allocation43_spill] sm:$0xff] %v7184_v60 }
 0x161   : > { %v7186_v26 = vpop.xlane.xlu1 %987 }
 0x162   : > { %8472 = vst [vmem:[#allocation44_spill] sm:$0xff] %v7186_v26  ;;  %v7188_v33 = vpop.xlane.xlu0 %984 }
 0x163   : > { %8473 = vst [vmem:[#allocation45_spill] sm:$0xff] %v7188_v33  ;;  %v1154_v33 = vld [vmem:[%s6585_s14 + $0x318] sm:$0xff] }
 0x165   : > { %v7190_v5 = vpop.xlane.xlu1 %993 }
 0x166   : > { %8474 = vst [vmem:[#allocation46_spill] sm:$0xff] %v7190_v5  ;;  %v7192_v35 = vpop.xlane.xlu0 %990 }
 0x167   : > { %8475 = vst [vmem:[#allocation47_spill] sm:$0xff] %v7192_v35  ;;  %v1192_v35 = vadd.f32 %v1078_v3, %v6960_v0  ;;  %v1193_v3 = vadd.f32 %v1079_v40, %v6972_v13  ;;  %v1160_v40 = vld [vmem:[%s6585_s14 + $0x348] sm:$0xff] }
 0x169   : > { %v7194_v41 = vpop.xlane.xlu1 %999 }
 0x16a   : > { %8476 = vst [vmem:[#allocation48_spill] sm:$0xff] %v7194_v41  ;;  %v7196_v52 = vpop.xlane.xlu0 %996  ;;  %v1080_v41 = vld [vmem:[%s6585_s14 + $0xc8] sm:$0xff] }
 0x16b   : > { %8477 = vst [vmem:[#allocation49_spill] sm:$0xff] %v7196_v52 }
 0x16d   : > { %v1006_v25 = vpop.xlane.xlu1 %1005 }
 0x16e   : > { %v1003_v49 = vpop.xlane.xlu0 %1002  ;;  %v1266_v26 = vadd.f32 %v1152_v21, %v1006_v25  ;;  %v1194_v25 = vadd.f32 %v1080_v41, %v6970_v12  ;;  %v5095_v41 = vmul.f32 -1.442695, %v1193_v3  ;;  %v1082_v3 = vld [vmem:[%s6585_s14 + $0xd8] sm:$0xff] }
 0x16f   : > { %v1265_v60 = vadd.f32 %v1151_v39, %v1003_v49  ;;  %v5094_v49 = vmul.f32 -1.442695, %v1192_v35 }
 0x170   : > { %v5168_v5 = vmul.f32 -1.442695, %v1266_v26 }
 0x171   : > { %v1012_v61 = vpop.xlane.xlu1 %1011  ;;  %v5167_v18 = vmul.f32 -1.442695, %v1265_v60 }
 0x172   : > { %v1009_v4 = vpop.xlane.xlu0 %1008  ;;  %v1268_v52 = vadd.f32 %v1154_v33, %v1012_v61  ;;  %6140 = vpow2.f32 %v5168_v5  ;;  %v1081_v33 = vld [vmem:[%s6585_s14 + $0xd0] sm:$0xff] }
 0x173   : > { %v1267_v42 = vadd.f32 %v1153_v7, %v1009_v4  ;;  %6142 = vpow2.f32 %v5167_v18  ;;  %v1158_v4 = vld [vmem:[%s6585_s14 + $0x338] sm:$0xff]  ;;  %v1157_v7 = vld [vmem:[%s6585_s14 + $0x330] sm:$0xff]  ;;  %v1195_v31 = vadd.f32 %v1081_v33, %v6979_v30 }
 0x174   : > { %v5170_v21 = vmul.f32 -1.442695, %v1268_v52  ;;  %v1161_v33 = vld [vmem:[%s6585_s14 + $0x350] sm:$0xff] }
 0x175   : > { %v5169_v39 = vmul.f32 -1.442695, %v1267_v42  ;;  %v1018_v26 = vpop.xlane.xlu1 %1017  ;;  %v5096_v42 = vmul.f32 -1.442695, %v1194_v25  ;;  %v5097_v25 = vmul.f32 -1.442695, %v1195_v31 }
 0x176   : > { %v1015_v0 = vpop.xlane.xlu0 %1014  ;;  %v1270_v60 = vadd.f32 %v1156_v14, %v1018_v26  ;;  %6144 = vpow2.f32 %v5170_v21  ;;  %v1159_v21 = vld [vmem:[%s6585_s14 + $0x340] sm:$0xff] }
 0x177   : > { %v1269_v61 = vadd.f32 %v1155_v63, %v1015_v0  ;;  %6146 = vpow2.f32 %v5169_v39 }
 0x178   : > { %v5172_v5 = vmul.f32 -1.442695, %v1270_v60  ;;  %6148 = vpow2.f32 %v5094_v49 }
 0x179   : > { %v5171_v52 = vmul.f32 -1.442695, %v1269_v61  ;;  %v1024_v35 = vpop.xlane.xlu1 %1023 }
 0x17a   : > { %v1021_v12 = vpop.xlane.xlu0 %1020  ;;  %v1272_v13 = vadd.f32 %v1158_v4, %v1024_v35  ;;  %6150 = vpow2.f32 %v5172_v5  ;;  %v1196_v35 = vadd.f32 %v1082_v3, %v6977_v27 }
 0x17b   : > { %v1271_v14 = vadd.f32 %v1157_v7, %v1021_v12  ;;  %6152 = vpow2.f32 %v5171_v52 }
 0x17c   : > { %v5174_v63 = vmul.f32 -1.442695, %v1272_v13  ;;  %6154 = vpow2.f32 %v5096_v42  ;;  %v6141_v49 = vpop.eup %6140  ;;  %v1083_v13 = vld [vmem:[%s6585_s14 + $0xe0] sm:$0xff] }
 0x17d   : > { %v5173_v18 = vmul.f32 -1.442695, %v1271_v14  ;;  %v1030_v39 = vpop.xlane.xlu1 %1029  ;;  %6156 = vpow2.f32 %v5095_v41  ;;  %v1722_v60 = vadd.f32 1.0, %v6141_v49  ;;  %v6143_v61 = vpop.eup %6142  ;;  %v1197_v27 = vadd.f32 %v1083_v13, %v6990_v46 }
 0x17e   : > { %v1027_v26 = vpop.xlane.xlu0 %1026  ;;  %v1274_v0 = vadd.f32 %v1160_v40, %v1030_v39  ;;  %6158 = vpow2.f32 %v5174_v63  ;;  %v1721_v7 = vadd.f32 1.0, %v6143_v61 }
 0x17f   : > { %v1273_v30 = vadd.f32 %v1159_v21, %v1027_v26  ;;  %6160 = vpow2.f32 %v5173_v18  ;;  %v1162_v21 = vld [vmem:[%s6585_s14 + $0x358] sm:$0xff] }
 0x180   : > { %v6145_v4 = vpop.eup %6144  ;;  %6162 = vrcp.f32 %v1722_v60  ;;  %v5176_v12 = vmul.f32 -1.442695, %v1274_v0  ;;  %v5098_v60 = vmul.f32 -1.442695, %v1196_v35 }
 0x181   : > { %v1036_v5 = vpop.xlane.xlu1 %1035  ;;  %v6147_v42 = vpop.eup %6146  ;;  %6164 = vpow2.f32 %v5097_v25  ;;  %v1724_v31 = vadd.f32 1.0, %v6145_v4  ;;  %v5175_v40 = vmul.f32 -1.442695, %v1273_v30  ;;  %v1163_v30 = vld [vmem:[%s6585_s14 + $0x360] sm:$0xff] }
 0x182   : > { %v1033_v52 = vpop.xlane.xlu0 %1032  ;;  %v6149_v41 = vpop.eup %6148  ;;  %6166 = vrcp.f32 %v1721_v7  ;;  %v1723_v14 = vadd.f32 1.0, %v6147_v42  ;;  %v1084_v7 = vld [vmem:[%s6585_s14 + $0xe8] sm:$0xff] }
 0x183   : > { %v1275_v63 = vadd.f32 %v1161_v33, %v1033_v52  ;;  %6168 = vrcp.f32 %v1724_v31  ;;  %v1648_v4 = vadd.f32 1.0, %v6149_v41  ;;  %v1276_v52 = vadd.f32 %v1162_v21, %v1036_v5  ;;  %v1085_v5 = vld [vmem:[%s6585_s14 + $0xf0] sm:$0xff] }
 0x184   : > { %v6151_v18 = vpop.eup %6150  ;;  %6170 = vrcp.f32 %v1723_v14 }
 0x185   : > { %v1042_v39 = vpop.xlane.xlu1 %1041  ;;  %v6153_v49 = vpop.eup %6152  ;;  %v1726_v25 = vadd.f32 1.0, %v6151_v18  ;;  %6172 = vpow2.f32 %v5176_v12  ;;  %v5177_v61 = vmul.f32 -1.442695, %v1275_v63  ;;  %v5099_v12 = vmul.f32 -1.442695, %v1197_v27  ;;  %v1167_v18 = vld [vmem:[%s6585_s14 + $0x380] sm:$0xff] }
 0x186   : > { %v1039_v26 = vpop.xlane.xlu0 %1038  ;;  %v6155_v0 = vpop.eup %6154  ;;  %v1725_v3 = vadd.f32 1.0, %v6153_v49  ;;  %6174 = vpow2.f32 %v5175_v40  ;;  %v1198_v63 = vadd.f32 %v1084_v7, %v6988_v45  ;;  %v5178_v21 = vmul.f32 -1.442695, %v1276_v52 }
 0x187   : > { %v6157_v33 = vpop.eup %6156  ;;  %6176 = vrcp.f32 %v1726_v25  ;;  %v1277_v13 = vadd.f32 %v1163_v30, %v1039_v26 }
 0x188   : > { %v6159_v42 = vpop.eup %6158  ;;  %6178 = vrcp.f32 %v1725_v3  ;;  %v1649_v40 = vadd.f32 1.0, %v6157_v33  ;;  %v1199_v33 = vadd.f32 %v1085_v5, %v7000_v62 }
 0x189   : > { %v7224_v31 = vpop.xlane.xlu1 %1047  ;;  %v6161_v46 = vpop.eup %6160  ;;  %6180 = vpow2.f32 %v5098_v60  ;;  %v1728_v3 = vadd.f32 1.0, %v6159_v42  ;;  %v5179_v26 = vmul.f32 -1.442695, %v1277_v13  ;;  %v1650_v42 = vadd.f32 1.0, %v6155_v0 }
 0x18a   : > { %v7226_v35 = vpop.xlane.xlu0 %1044  ;;  %v6163_v14 = vpop.eup %6162  ;;  %v1727_v41 = vadd.f32 1.0, %v6161_v46  ;;  %6182 = vpow2.f32 %v5177_v61  ;;  %v5100_v61 = vmul.f32 -1.442695, %v1198_v63  ;;  %v1168_v46 = vld [vmem:[%s6585_s14 + $0x388] sm:$0xff]  ;;  %v5101_v62 = vmul.f32 -1.442695, %v1199_v33 }
 0x18b   : > { %v6165_v49 = vpop.eup %6164  ;;  %6184 = vrcp.f32 %v1648_v4  ;;  %2568 = vperm.xlu1 %5819, %v6163_v14   ;;  %v1164_v4 = vld [vmem:[%s6585_s14 + $0x368] sm:$0xff] }
 0x18c   : > { %v6167_v25 = vpop.eup %6166  ;;  %6186 = vrcp.f32 %v1727_v41  ;;  %v1278_v13 = vadd.f32 %v1164_v4, %v1042_v39  ;;  %v1651_v5 = vadd.f32 1.0, %v6165_v49 }
 0x18d   : > { %v1054_v48 = vpop.xlane.xlu1 %1053  ;;  %v6169_v27 = vpop.eup %6168  ;;  %6188 = vpow2.f32 %v5099_v12  ;;  %2563 = vperm.xlu0 %5818, %v6167_v25  }
 0x18e   : > { %v1051_v60 = vpop.xlane.xlu0 %1050  ;;  %v6171_v30 = vpop.eup %6170  ;;  %6190 = vrcp.f32 %v1649_v40 }
 0x18f   : > { %v1281_v45 = vadd.f32 %v1167_v18, %v1051_v60  ;;  %v6173_v7 = vpop.eup %6172  ;;  %6192 = vpow2.f32 %v5178_v21  ;;  %2578 = vperm.xlu1 %5819, %v6169_v27   ;;  %v1282_v21 = vadd.f32 %v1168_v46, %v1054_v48  ;;  %v5180_v27 = vmul.f32 -1.442695, %v1278_v13 }
 0x190   : > { %v6175_v52 = vpop.eup %6174  ;;  %6194 = vrcp.f32 %v1728_v3  ;;  %v1730_v25 = vadd.f32 1.0, %v6173_v7  ;;  %v1165_v3 = vld [vmem:[%s6585_s14 + $0x370] sm:$0xff] }
 0x191   : > { %v7234_v14 = vpop.permute.xlu1 %2088  ;;  %v6177_v41 = vpop.eup %6176  ;;  %v1729_v12 = vadd.f32 1.0, %v6175_v52  ;;  %6196 = vpow2.f32 %v5179_v26  ;;  %2573 = vperm.xlu0 %5818, %v6171_v30   ;;  %v5183_v40 = vmul.f32 -1.442695, %v1281_v45  ;;  %v1086_v26 = vld [vmem:[%s6585_s14 + $0xf8] sm:$0xff]  ;;  %v5184_v49 = vmul.f32 -1.442695, %v1282_v21 }
 0x192   : > { %v6179_v63 = vpop.eup %6178  ;;  %6198 = vpow2.f32 %v5100_v61  ;;  %v1279_v48 = vadd.f32 %v1165_v3, %v7226_v35  ;;  %v1200_v52 = vadd.f32 %v1086_v26, %v6998_v59 }
 0x193   : > { %v6181_v18 = vpop.eup %6180  ;;  %6200 = vrcp.f32 %v1729_v12  ;;  %2588 = vperm.xlu1 %5819, %v6177_v41   ;;  %v1166_v41 = vld [vmem:[%s6585_s14 + $0x378] sm:$0xff] }
 0x194   : > { %v6183_v0 = vpop.eup %6182  ;;  %6202 = vrcp.f32 %v1650_v42  ;;  %v1652_v7 = vadd.f32 1.0, %v6181_v18  ;;  %v5181_v13 = vmul.f32 -1.442695, %v1279_v48  ;;  %v1280_v18 = vadd.f32 %v1166_v41, %v7224_v31 }
 0x195   : > { %v6185_v60 = vpop.eup %6184  ;;  %6204 = vpow2.f32 %v5183_v40  ;;  %2583 = vperm.xlu0 %5818, %v6179_v63   ;;  %v1731_v45 = vadd.f32 1.0, %v6183_v0  ;;  %v7238_v30 = vpop.permute.xlu1 %2093 }
 0x196   : > { %v6187_v39 = vpop.eup %6186  ;;  %6206 = vpow2.f32 %v5101_v62 }
 0x197   : > { %v6189_v61 = vpop.eup %6188  ;;  %6208 = vrcp.f32 %v1651_v5  ;;  %2593 = vperm.xlu1 %5819, %v6187_v39   ;;  %v5102_v5 = vmul.f32 -1.442695, %v1200_v52 }
 0x198   : > { %v6191_v33 = vpop.eup %6190  ;;  %6210 = vrcp.f32 %v1730_v25  ;;  %v1653_v46 = vadd.f32 1.0, %v6189_v61 }
 0x199   : > { %v6193_v4 = vpop.eup %6192  ;;  %6212 = vpow2.f32 %v5180_v27  ;;  %2198 = vperm.xlu0 %5818, %v6185_v60   ;;  %v7243_v35 = vpop.permute.xlu1 %2098  ;;  %v5182_v27 = vmul.f32 -1.442695, %v1280_v18 }
 0x19a   : > { %v6195_v42 = vpop.eup %6194  ;;  %6214 = vrcp.f32 %v1731_v45  ;;  %v1732_v63 = vadd.f32 1.0, %v6193_v4 }
 0x19b   : > { %v6197_v12 = vpop.eup %6196  ;;  %6216 = vpow2.f32 %v5184_v49  ;;  %2203 = vperm.xlu1 %5819, %v6191_v33  }
 0x19c   : > { %v6199_v40 = vpop.eup %6198  ;;  %6218 = vrcp.f32 %v1652_v7  ;;  %v1733_v21 = vadd.f32 1.0, %v6197_v12 }
 0x19d   : > { %v6201_v62 = vpop.eup %6200  ;;  %2598 = vperm.xlu0 %5818, %v6195_v42   ;;  %6220 = vrcp.f32 %v1653_v46  ;;  %v1654_v3 = vadd.f32 1.0, %v6199_v40  ;;  %v7246_v45 = vpop.permute.xlu1 %2103 }
 0x19e   : > { %v6203_v59 = vpop.eup %6202  ;;  %6222 = vpow2.f32 %v5181_v13 }
 0x19f   : > { %v6205_v0 = vpop.eup %6204  ;;  %2603 = vperm.xlu1 %5819, %v6201_v62   ;;  %6224 = vrcp.f32 %v1732_v63 }
 0x1a0   : > { %v6207_v25 = vpop.eup %6206  ;;  %6226 = vpow2.f32 %v5102_v5  ;;  %v1737_v26 = vadd.f32 1.0, %v6205_v0 }
 0x1a1   : > { %v6209_v60 = vpop.eup %6208  ;;  %2208 = vperm.xlu0 %5818, %v6203_v59   ;;  %6228 = vrcp.f32 %v1733_v21  ;;  %v1655_v4 = vadd.f32 1.0, %v6207_v25  ;;  %v7248_v42 = vpop.permute.xlu1 %2108 }
 0x1a2   : > { %v6211_v39 = vpop.eup %6210  ;;  %6230 = vrcp.f32 %v1654_v3 }
 0x1a3   : > { %v6213_v31 = vpop.eup %6212  ;;  %2213 = vperm.xlu1 %5819, %v6209_v60   ;;  %6232 = vpow2.f32 %v5182_v27  ;;  %v7254_v27 = vpop.permute.xlu0 %2083 }
 0x1a4   : > { %v6215_v61 = vpop.eup %6214  ;;  %v1734_v48 = vadd.f32 1.0, %v6213_v31  ;;  %6234 = vrcp.f32 %v1737_v26 }
 0x1a5   : > { %v6217_v49 = vpop.eup %6216  ;;  %2608 = vperm.xlu0 %5818, %v6211_v39   ;;  %v7250_v5 = vpop.permute.xlu1 %2113 }
 0x1a6   : > { %v6219_v33 = vpop.eup %6218  ;;  %v1738_v52 = vadd.f32 1.0, %v6217_v49  ;;  %6236 = vrcp.f32 %v1734_v48 }
 0x1a7   : > { %2613 = vperm.xlu1 %5819, %v6215_v61   ;;  %v6221_v7 = vpop.eup %6220  ;;  %6238 = vrcp.f32 %v1655_v4  ;;  %v7258_v61 = vpop.permute.xlu0 %2128 }
 0x1a8   : > { %v6223_v46 = vpop.eup %6222  ;;  %6240 = vrcp.f32 %v1738_v52 }
 0x1a9   : > { %2218 = vperm.xlu0 %5818, %v6219_v33   ;;  %v6225_v41 = vpop.eup %6224  ;;  %v1735_v40 = vadd.f32 1.0, %v6223_v46  ;;  %v7252_v25 = vpop.permute.xlu1 %2118 }
 0x1aa   : > { %v6227_v12 = vpop.eup %6226 }
 0x1ab   : > { %2223 = vperm.xlu1 %5819, %v6221_v7   ;;  %v6229_v13 = vpop.eup %6228  ;;  %v1656_v62 = vadd.f32 1.0, %v6227_v12  ;;  %6242 = vrcp.f32 %v1735_v40  ;;  %v7262_v33 = vpop.permute.xlu0 %2138  ;;  %v1984_v40 = vld [vmem:[%s6575_s8 + $0x88] sm:$0xff] }
 0x1ac   : > { %v6231_v63 = vpop.eup %6230 }
 0x1ad   : > { %2618 = vperm.xlu0 %5818, %v6225_v41   ;;  %v6233_v18 = vpop.eup %6232  ;;  %6244 = vrcp.f32 %v1656_v62  ;;  %v7256_v26 = vpop.permute.xlu1 %2123 }
 0x1ae   : > { %v6235_v59 = vpop.eup %6234  ;;  %v1736_v21 = vadd.f32 1.0, %v6233_v18 }
 0x1af   : > { %2623 = vperm.xlu1 %5819, %v6229_v13   ;;  %v7266_v7 = vpop.permute.xlu0 %2148  ;;  %v1983_v13 = vld [vmem:[%s6575_s8 + $0x80] sm:$0xff] }
 0x1b0   : > { %v6237_v0 = vpop.eup %6236  ;;  %6246 = vrcp.f32 %v1736_v21 }
 0x1b1   : > { %2228 = vperm.xlu0 %5818, %v6231_v63   ;;  %v6239_v3 = vpop.eup %6238  ;;  %v7260_v48 = vpop.permute.xlu1 %2133 }
 0x1b2   : > { %v6241_v60 = vpop.eup %6240 }
 0x1b3   : > { %2643 = vperm.xlu1 %5819, %v6235_v59   ;;  %v7270_v46 = vpop.permute.xlu0 %2158  ;;  %v1985_v59 = vld [vmem:[%s6575_s8 + $0x90] sm:$0xff] }
 0x1b5   : > { %2628 = vperm.xlu0 %5818, %v6237_v0   ;;  %v6243_v39 = vpop.eup %6242  ;;  %v7264_v4 = vpop.permute.xlu1 %2143  ;;  %v1986_v0 = vld [vmem:[%s6575_s8 + $0x98] sm:$0xff] }
 0x1b7   : > { %2233 = vperm.xlu1 %5819, %v6239_v3   ;;  %v6245_v31 = vpop.eup %6244  ;;  %v2169_v12 = vpop.permute.xlu0 %2168 }
 0x1b8   : > { %v2668_v21 = vmul.f32 %v2169_v12, %v1984_v40 }
 0x1b9   : > { %2648 = vperm.xlu0 %5818, %v6241_v60   ;;  %v7268_v52 = vpop.permute.xlu1 %2153 }
 0x1ba   : > { %v6247_v49 = vpop.eup %6246 }
 0x1bb   : > { %2633 = vperm.xlu1 %5819, %v6243_v39   ;;  %v2179_v18 = vpop.permute.xlu0 %2178  ;;  %v1987_v39 = vld [vmem:[%s6575_s8 + $0xa0] sm:$0xff] }
 0x1bd   : > { %2238 = vperm.xlu0 %5818, %v6245_v31   ;;  %v2164_v41 = vpop.permute.xlu1 %2163 }
 0x1be   : > { %v2667_v62 = vmul.f32 %v2164_v41, %v1983_v13 }
 0x1bf   : > { %v2189_v36 = vpop.permute.xlu0 %2188 }
 0x1c0   : > { %v2773_v3 = vpack.c.bf16 %v2668_v21, %v2667_v62  ;;  %v2672_v56 = vmul.f32 %v2189_v36, %v1988_v1  ;;  %v1989_v36 = vld [vmem:[%s6575_s8 + $0xb0] sm:$0xff]  ;;  %v5822_v1 = vld [vmem:[%s6590_s18 + $0x480] ss:$12 sps:$4 sm:$0xff]  }
 0x1c1   : > { %2638 = vperm.xlu0 %5818, %v6247_v49   ;;  %v2174_v63 = vpop.permute.xlu1 %2173  ;;  %v2670_v49 = vmul.f32 %v2179_v18, %v1986_v0 }
 0x1c2   : > { %v2669_v60 = vmul.f32 %v2174_v63, %v1985_v59 }
 0x1c4   : > { %v2774_v53 = vpack.c.bf16 %v2670_v49, %v2669_v60  ;;  %v5827_v49 = vld [vmem:[%s6590_s18] ss:$12 sps:$4 sm:$0xff]  }
 0x1c5   : > { %v2184_v31 = vpop.permute.xlu1 %2183 }
 0x1c6   : > { %v2671_v29 = vmul.f32 %v2184_v31, %v1987_v39  ;;  %v5823_v39 = vld [vmem:[%s6590_s18 + $0x4] ss:$12 sps:$4 sm:$0xff]   ;;  %v5825_v31 = vld [vmem:[%s6590_s18 + $0x49c] ss:$12 sps:$4 sm:$0xff]  }
 0x1c7   : > { %4124 = vmatprep.subr.bf16.mxu0 %v5823_v39 }
 0x1c8   : > { %v2775_v41 = vpack.c.bf16 %v2672_v56, %v2671_v29  ;;  %v1990_v29 = vld [vmem:[%s6575_s8 + $0xb8] sm:$0xff]  ;;  %4125 = vmatpush1.bf16.msra.mxu0 %v5827_v49  ;;  %v5835_v49 = vld [vmem:[%s6590_s18 + $0x34] ss:$12 sps:$4 sm:$0xff]  }
 0x1c9   : > { %v2194_v12 = vpop.permute.xlu1 %2193 }
 0x1ca   : > { %v2673_v0 = vmul.f32 %v2194_v12, %v1989_v36  ;;  %v5829_v36 = vld [vmem:[%s6590_s18 + $0x1c] ss:$12 sps:$4 sm:$0xff]  }
 0x1cb   : > { %4126 = vmatprep.subr.bf16.mxu0 %v5829_v36  ;;  %v1993_v36 = vld [vmem:[%s6575_s8 + $0xd0] sm:$0xff] }
 0x1df   : > { %3087 = vxpose.xlu0.c.b16.start [1/8] (narrow) %v2773_v3, 64 }
 0x1e3   : > { %3088 = vxpose.xlu0.c.b16.cont [2/8] (narrow) %v2774_v53, 64  ;;  %v5820_v53 = vld [vmem:[%s6590_s18 + $0x484] ss:$12 sps:$4 sm:$0xff]  }
 0x1e4   : > { %4337 = vmatprep.subr.bf16.mxu1 %v5820_v53  ;;  %v1992_v53 = vld [vmem:[%s6575_s8 + $0xc8] sm:$0xff] }
 0x1e5   : > { %4338 = vmatpush1.bf16.msra.mxu1 %v5822_v1  ;;  %v5833_v1 = vld [vmem:[%s6590_s18 + $0x18] ss:$12 sps:$4 sm:$0xff]  }
 0x1e6   : > { %4339 = vmatprep.subr.bf16.mxu1 %v5825_v31  ;;  %4127 = vmatpush1.bf16.msra.mxu0 %v5833_v1  ;;  %v5845_v1 = vld [vmem:[%s6590_s18 + $0x48] ss:$12 sps:$4 sm:$0xff]  }
 0x1e7   : > { %3089 = vxpose.xlu0.c.b16.cont [3/8] (narrow) %v2775_v41, 64  ;;  %4128 = vmatprep.subr.bf16.mxu0 %v5835_v49  ;;  %v5847_v49 = vld [vmem:[%s6590_s18 + $0x64] ss:$12 sps:$4 sm:$0xff]  }
 0x1e9   : > { %4340 = vmatpush1.bf16.msra.mxu1 %v5828_v43  ;;  %v5837_v43 = vld [vmem:[%s6590_s18 + $0x4cc] ss:$12 sps:$4 sm:$0xff]  }
 0x20a   : > { %v7278_v13 = vpop.permute.xlu1 %2568 }
 0x20c   : > { %v7280_v40 = vpop.permute.xlu0 %2563 }
 0x20e   : > { %v7282_v63 = vpop.permute.xlu1 %2578 }
 0x210   : > { %v7284_v62 = vpop.permute.xlu0 %2573 }
 0x212   : > { %v7286_v18 = vpop.permute.xlu1 %2588 }
 0x214   : > { %v7288_v59 = vpop.permute.xlu0 %2583 }
 0x216   : > { %v7291_v56 = vpop.permute.xlu1 %2593 }
 0x218   : > { %v2199_v21 = vpop.permute.xlu0 %2198 }
 0x219   : > { %v2674_v3 = vmul.f32 %v2199_v21, %v1990_v29  ;;  %v5831_v29 = vld [vmem:[%s6590_s18 + $0x4b4] ss:$12 sps:$4 sm:$0xff]   ;;  %v5834_v21 = vld [vmem:[%s6590_s18 + $0x4b0] ss:$12 sps:$4 sm:$0xff]  }
 0x21a   : > { %v2204_v60 = vpop.permute.xlu1 %2203  ;;  %4341 = vmatprep.subr.bf16.mxu1 %v5831_v29  ;;  %v5843_v29 = vld [vmem:[%s6590_s18 + $0x4e4] ss:$12 sps:$4 sm:$0xff]  }
 0x21b   : > { %v2776_v41 = vpack.c.bf16 %v2674_v3, %v2673_v0  ;;  %v2675_v3 = vmul.f32 %v2204_v60, %v1991_v22  ;;  %4342 = vmatpush1.bf16.msra.mxu1 %v5834_v21  ;;  %v1994_v22 = vld [vmem:[%s6575_s8 + $0xd8] sm:$0xff]  ;;  %v5846_v21 = vld [vmem:[%s6590_s18 + $0x4e0] ss:$12 sps:$4 sm:$0xff]  }
 0x21c   : > { %v7300_v54 = vpop.permute.xlu0 %2598  ;;  %4343 = vmatprep.subr.bf16.mxu1 %v5837_v43  ;;  %v5851_v43 = vld [vmem:[%s6590_s18 + $0x60] ss:$12 sps:$4 sm:$0xff]  }
 0x21d   : > { %3090 = vxpose.xlu0.c.b16.cont [4/8] (narrow) %v2776_v41, 64  ;;  %v5839_v41 = vld [vmem:[%s6590_s18 + $0x30] ss:$12 sps:$4 sm:$0xff]  }
 0x21e   : > { %v7304_v12 = vpop.permute.xlu1 %2603  ;;  %4129 = vmatpush1.bf16.msra.mxu0 %v5839_v41 }
 0x21f   : > { %4344 = vmatpush1.bf16.msra.mxu1 %v5840_v32  ;;  %v5849_v32 = vld [vmem:[%s6590_s18 + $0x4fc] ss:$12 sps:$4 sm:$0xff]  }
 0x220   : > { %v2209_v0 = vpop.permute.xlu0 %2208  ;;  %4345 = vmatprep.subr.bf16.mxu1 %v5843_v29  ;;  %v5855_v29 = vld [vmem:[%s6590_s18 + $0x514] ss:$12 sps:$4 sm:$0xff]  }
 0x221   : > { %v2676_v39 = vmul.f32 %v2209_v0, %v1992_v53  ;;  %v5841_v53 = vld [vmem:[%s6590_s18 + $0x4c] ss:$12 sps:$4 sm:$0xff]  }
 0x222   : > { %v2214_v31 = vpop.permute.xlu1 %2213  ;;  %4130 = vmatprep.subr.bf16.mxu0 %v5841_v53  ;;  %v1995_v53 = vld [vmem:[%s6575_s8 + $0xe0] sm:$0xff] }
 0x223   : > { %v2777_v37 = vpack.c.bf16 %v2676_v39, %v2675_v3  ;;  %v2677_v3 = vmul.f32 %v2214_v31, %v1993_v36  ;;  %4131 = vmatpush1.bf16.msra.mxu0 %v5845_v1  ;;  %4346 = vmatpush1.bf16.msra.mxu1 %v5846_v21  ;;  %v1996_v31 = vld [vmem:[%s6575_s8 + $0xe8] sm:$0xff]  ;;  %v5857_v1 = vld [vmem:[%s6590_s18 + $0x78] ss:$12 sps:$4 sm:$0xff]   ;;  %v5858_v21 = vld [vmem:[%s6590_s18 + $0x510] ss:$12 sps:$4 sm:$0xff]  }
 0x224   : > { %v7314_v28 = vpop.permute.xlu0 %2608  ;;  %4132 = vmatprep.subr.bf16.mxu0 %v5847_v49  ;;  %4347 = vmatprep.subr.bf16.mxu1 %v5849_v32  ;;  %v5859_v49 = vld [vmem:[%s6590_s18 + $0x94] ss:$12 sps:$4 sm:$0xff]   ;;  %v5861_v32 = vld [vmem:[%s6590_s18 + $0x52c] ss:$12 sps:$4 sm:$0xff]  }
 0x225   : > { %3091 = vxpose.xlu0.c.b16.cont [5/8] (narrow) %v2777_v37, 64 }
 0x226   : > { %v7318_v60 = vpop.permute.xlu1 %2613 }
 0x227   : > { %4133 = vmatpush1.bf16.msra.mxu0 %v5851_v43  ;;  %4348 = vmatpush1.bf16.msra.mxu1 %v5852_v23  ;;  %v5863_v23 = vld [vmem:[%s6590_s18 + $0x90] ss:$12 sps:$4 sm:$0xff]  }
 0x228   : > { %v2219_v0 = vpop.permute.xlu0 %2218  ;;  %4349 = vmatprep.subr.bf16.mxu1 %v5855_v29  ;;  %v5869_v29 = vld [vmem:[%s6590_s18 + $0xa8] ss:$12 sps:$4 sm:$0xff]  }
 0x229   : > { %v2678_v37 = vmul.f32 %v2219_v0, %v1994_v22  ;;  %v5853_v22 = vld [vmem:[%s6590_s18 + $0x7c] ss:$12 sps:$4 sm:$0xff]  }
 0x22a   : > { %v2224_v39 = vpop.permute.xlu1 %2223  ;;  %4134 = vmatprep.subr.bf16.mxu0 %v5853_v22  ;;  %v2079_v22 = vld [vmem:[%s6575_s8 + $0x380] sm:$0xff] }
 0x22b   : > { %v2778_v41 = vpack.c.bf16 %v2678_v37, %v2677_v3  ;;  %v2679_v3 = vmul.f32 %v2224_v39, %v1995_v53  ;;  %4135 = vmatpush1.bf16.msra.mxu0 %v5857_v1  ;;  %4350 = vmatpush1.bf16.msra.mxu1 %v5858_v21  ;;  %v2080_v39 = vld [vmem:[%s6575_s8 + $0x388] sm:$0xff] }
 0x22c   : > { %v7328_v11 = vpop.permute.xlu0 %2618  ;;  %4136 = vmatprep.subr.bf16.mxu0 %v5859_v49  ;;  %4351 = vmatprep.subr.bf16.mxu1 %v5861_v32  ;;  %v5865_v53 = vld [vmem:[%s6590_s18 + $0xac] ss:$12 sps:$4 sm:$0xff]  }
 0x22d   : > { %3092 = vxpose.xlu0.c.b16.cont [6/8] (narrow) %v2778_v41, 64  ;;  %v5864_v41 = vld [vmem:[%s6590_s18 + $0x528] ss:$12 sps:$4 sm:$0xff]   ;;  %v5870_v1 = vld [vmem:[%s6590_s18 + $0x540] ss:$12 sps:$4 sm:$0xff]   ;;  %v1998_v32 = vld [vmem:[%s6575_s8 + $0xf8] sm:$0xff] }
 0x22e   : > { %v7332_v36 = vpop.permute.xlu1 %2623 }
 0x22f   : > { %8478 = vst [vmem:[#allocation50_spill] sm:$0xff] %v7332_v36  ;;  %4137 = vmatpush1.bf16.msra.mxu0 %v5863_v23  ;;  %4352 = vmatpush1.bf16.msra.mxu1 %v5864_v41  ;;  %v5871_v23 = vld [vmem:[%s6590_s18 + $0xc4] ss:$12 sps:$4 sm:$0xff]  }
 0x230   : > { %v2229_v0 = vpop.permute.xlu0 %2228  ;;  %4138 = vmatprep.subr.bf16.mxu0 %v5865_v53  ;;  %v5876_v53 = vld [vmem:[%s6590_s18 + $0xdc] ss:$12 sps:$4 sm:$0xff]  }
 0x231   : > { %v2680_v37 = vmul.f32 %v2229_v0, %v1996_v31  ;;  %v5867_v31 = vld [vmem:[%s6590_s18 + $0x544] ss:$12 sps:$4 sm:$0xff]  }
 0x232   : > { %v2644_v2 = vpop.permute.xlu1 %2643  ;;  %4353 = vmatprep.subr.bf16.mxu1 %v5867_v31  ;;  %v5879_v31 = vld [vmem:[%s6590_s18 + $0xd8] ss:$12 sps:$4 sm:$0xff]  }
 0x233   : > { %v2779_v43 = vpack.c.bf16 %v2680_v37, %v2679_v3  ;;  %v2763_v0 = vmul.f32 %v2644_v2, %v2079_v22  ;;  %v1997_v3 = vld [vmem:[%s6575_s8 + $0xf0] sm:$0xff]  ;;  %4139 = vmatpush1.bf16.msra.mxu0 %v5869_v29  ;;  %4354 = vmatpush1.bf16.msra.mxu1 %v5870_v1  ;;  %v2651_v29 = vmul.f32 %v7254_v27, %v1967_v50 }
 0x234   : > { %v7342_v17 = vpop.permute.xlu0 %2628  ;;  %4140 = vmatprep.subr.bf16.mxu0 %v5871_v23  ;;  %v1103_v23 = vld [vmem:[%s6585_s14 + $0x180] sm:$0xff] }
 0x235   : > { %3093 = vxpose.xlu0.c.b16.cont [7/8] (narrow) %v2779_v43, 64  ;;  %v5873_v43 = vld [vmem:[%s6590_s18 + $0xc8] ss:$12 sps:$4 sm:$0xff]  }
 0x236   : > { %v2234_v49 = vpop.permute.xlu1 %2233  ;;  %5651 = vmatprep.subr.bf16.mxu1 %v5873_v43  ;;  %v1972_v43 = vld [vmem:[%s6575_s8 + $0x28] sm:$0xff] }
 0x237   : > { %v2681_v2 = vmul.f32 %v2234_v49, %v1997_v3  ;;  %4141 = vmatpush1.bf16.msra.mxu0 %v5874_v55  ;;  %v1969_v55 = vld [vmem:[%s6575_s8 + $0x10] sm:$0xff] }
 0x238   : > { %v2649_v21 = vpop.permute.xlu0 %2648  ;;  %4142 = vmatprep.subr.bf16.mxu0 %v5876_v53  ;;  %v5881_v49 = vld [vmem:[%s6590_s18 + $0xf4] ss:$12 sps:$4 sm:$0xff]   ;;  %v2066_v53 = vld [vmem:[%s6575_s8 + $0x318] sm:$0xff] }
 0x239   : > { %v2764_v37 = vmul.f32 %v2649_v21, %v2080_v39  ;;  %v1968_v39 = vld [vmem:[%s6575_s8 + $0x8] sm:$0xff]  ;;  %v1970_v21 = vld [vmem:[%s6575_s8 + $0x18] sm:$0xff] }
 0x23a   : > { %v2652_v3 = vmul.f32 %v7234_v14, %v1968_v39  ;;  %v2654_v27 = vmul.f32 %v7243_v35, %v1970_v21  ;;  %v2653_v39 = vmul.f32 %v7238_v30, %v1969_v55  ;;  %v1217_v35 = vadd.f32 %v1103_v23, %v7091_v16  ;;  %v1106_v55 = vld [vmem:[%s6585_s14 + $0x198] sm:$0xff] }
 0x23b   : > { %v2821_v41 = vpack.c.bf16 %v2764_v37, %v2763_v0  ;;  %v1104_v0 = vld [vmem:[%s6585_s14 + $0x188] sm:$0xff]  ;;  %v2063_v37 = vld [vmem:[%s6575_s8 + $0x300] sm:$0xff]  ;;  %4143 = vmatpush1.bf16.msra.mxu0 %v5879_v31  ;;  %v2065_v31 = vld [vmem:[%s6575_s8 + $0x310] sm:$0xff]  ;;  %v2750_v30 = vmul.f32 %v7282_v63, %v2066_v53 }
 0x23c   : > { %v2239_v36 = vpop.permute.xlu0 %2238  ;;  %v2765_v50 = vpack.c.bf16 %v2652_v3, %v2651_v29  ;;  %4144 = vmatprep.subr.bf16.mxu0 %v5881_v49  ;;  %v1971_v29 = vld [vmem:[%s6575_s8 + $0x20] sm:$0xff]  ;;  %v2766_v21 = vpack.c.bf16 %v2654_v27, %v2653_v39  ;;  %v2656_v3 = vmul.f32 %v7248_v42, %v1972_v43  ;;  %v2068_v42 = vld [vmem:[%s6575_s8 + $0x328] sm:$0xff]  ;;  %v5119_v63 = vmul.f32 -1.442695, %v1217_v35  ;;  %v1089_v53 = vld [vmem:[%s6585_s14 + $0x110] sm:$0xff] }
 0x23d   : > { %v2682_v22 = vmul.f32 %v2239_v36, %v1998_v32  ;;  %3183 = vxpose.xlu1.c.b16.start.end [1/1] (short) (narrow) %v2821_v41, 64  ;;  %v2064_v36 = vld [vmem:[%s6575_s8 + $0x308] sm:$0xff]  ;;  %v5884_v32 = vld [vmem:[%s6590_s18 + $0xf0] ss:$12 sps:$4 sm:$0xff]   ;;  %v2747_v41 = vmul.f32 %v7280_v40, %v2063_v37  ;;  %v1087_v40 = vld [vmem:[%s6585_s14 + $0x100] sm:$0xff]  ;;  %v2655_v49 = vmul.f32 %v7246_v45, %v1971_v29 }
 0x23e   : > { %v2748_v14 = vmul.f32 %v7278_v13, %v2064_v36  ;;  %v5886_v13 = vld [vmem:[%s6590_s18 + $0x10c] ss:$12 sps:$4 sm:$0xff]   ;;  %v2749_v36 = vmul.f32 %v7284_v62, %v2065_v31  ;;  %v1201_v23 = vadd.f32 %v1087_v40, %v7009_v20  ;;  %v5891_v62 = vld [vmem:[%s6590_s18 + $0x124] ss:$12 sps:$4 sm:$0xff]   ;;  %v1220_v31 = vadd.f32 %v1106_v55, %v7096_v38 }
 0x23f   : > { %v2780_v1 = vpack.c.bf16 %v2682_v22, %v2681_v2  ;;  %v1088_v2 = vld [vmem:[%s6585_s14 + $0x108] sm:$0xff]  ;;  %v1218_v22 = vadd.f32 %v1104_v0, %v7089_v10  ;;  %4145 = vmatpush1.bf16.msra.mxu0 %v5884_v32  ;;  %v1974_v10 = vld [vmem:[%s6575_s8 + $0x38] sm:$0xff]  ;;  %v2067_v32 = vld [vmem:[%s6575_s8 + $0x320] sm:$0xff]  ;;  %v2767_v27 = vpack.c.bf16 %v2656_v3, %v2655_v49 }
 0x240   : > { %v2813_v0 = vpack.c.bf16 %v2748_v14, %v2747_v41  ;;  %4146 = vmatprep.subr.bf16.mxu0 %v5886_v13  ;;  %v1202_v16 = vadd.f32 %v1088_v2, %v7007_v19  ;;  %v1105_v19 = vld [vmem:[%s6585_s14 + $0x190] sm:$0xff]  ;;  %v2658_v43 = vmul.f32 %v7252_v25, %v1974_v10  ;;  %v5894_v14 = vld [vmem:[%s6590_s18 + $0x120] ss:$12 sps:$4 sm:$0xff]   ;;  %v1090_v41 = vld [vmem:[%s6585_s14 + $0x118] sm:$0xff]  ;;  %v2814_v45 = vpack.c.bf16 %v2750_v30, %v2749_v36 }
 0x241   : > { %3094 = vxpose.xlu0.c.b16.end [8/8] (narrow) %v2780_v1, 64  ;;  %v5889_v1 = vld [vmem:[%s6590_s18 + $0x108] ss:$12 sps:$4 sm:$0xff]   ;;  %v5120_v37 = vmul.f32 -1.442695, %v1218_v22  ;;  %v1975_v2 = vld [vmem:[%s6575_s8 + $0x40] sm:$0xff]  ;;  %v2752_v22 = vmul.f32 %v7286_v18, %v2068_v42  ;;  %v2751_v20 = vmul.f32 %v7288_v59, %v2067_v32  ;;  %v1219_v59 = vadd.f32 %v1105_v19, %v7098_v51 }
 0x242   : > { %v5104_v39 = vmul.f32 -1.442695, %v1202_v16  ;;  %v2070_v35 = vld [vmem:[%s6575_s8 + $0x338] sm:$0xff]  ;;  %v5103_v18 = vmul.f32 -1.442695, %v1201_v23  ;;  %v1976_v29 = vld [vmem:[%s6575_s8 + $0x48] sm:$0xff]  ;;  %v1203_v36 = vadd.f32 %v1089_v53, %v7023_v47 }
 0x243   : > { %4147 = vmatpush1.bf16.msra.mxu0 %v5889_v1  ;;  %6248 = vpow2.f32 %v5120_v37  ;;  %v5896_v13 = vld [vmem:[%s6590_s18 + $0x13c] ss:$12 sps:$4 sm:$0xff]   ;;  %v1204_v1 = vadd.f32 %v1090_v41, %v7021_v44  ;;  %v5899_v3 = vld [vmem:[%s6590_s18 + $0x138] ss:$12 sps:$4 sm:$0xff]   ;;  %v2815_v30 = vpack.c.bf16 %v2752_v22, %v2751_v20  ;;  %v2754_v51 = vmul.f32 %v7300_v54, %v2070_v35  ;;  %v5901_v47 = vld [vmem:[%s6590_s18 + $0x154] ss:$12 sps:$4 sm:$0xff]  }
 0x244   : > { %4148 = vmatprep.subr.bf16.mxu0 %v5891_v62  ;;  %6250 = vpow2.f32 %v5119_v63  ;;  %v1092_v38 = vld [vmem:[%s6585_s14 + $0x128] sm:$0xff]  ;;  %v1091_v10 = vld [vmem:[%s6585_s14 + $0x120] sm:$0xff]  ;;  %v5122_v16 = vmul.f32 -1.442695, %v1220_v31  ;;  %v2660_v55 = vmul.f32 %v7258_v61, %v1976_v29  ;;  %v5121_v49 = vmul.f32 -1.442695, %v1219_v59 }
 0x245   : > { %3071 = vxpose.xlu0.c.b16.start [1/8] (narrow) %v2765_v50, 64  ;;  %v1973_v50 = vld [vmem:[%s6575_s8 + $0x30] sm:$0xff]  ;;  %6252 = vpow2.f32 %v5104_v39  ;;  %v1108_v44 = vld [vmem:[%s6585_s14 + $0x1a8] sm:$0xff]  ;;  %v1107_v37 = vld [vmem:[%s6585_s14 + $0x1a0] sm:$0xff]  ;;  %v1206_v54 = vadd.f32 %v1092_v38, %v7034_v8  ;;  %v5106_v23 = vmul.f32 -1.442695, %v1204_v1  ;;  %v1205_v63 = vadd.f32 %v1091_v10, %v7036_v9 }
 0x246   : > { %v2657_v25 = vmul.f32 %v7250_v5, %v1973_v50  ;;  %v2659_v5 = vmul.f32 %v7256_v26, %v1975_v2  ;;  %v2072_v26 = vld [vmem:[%s6575_s8 + $0x348] sm:$0xff]  ;;  %6254 = vpow2.f32 %v5103_v18  ;;  %v1978_v42 = vld [vmem:[%s6575_s8 + $0x58] sm:$0xff]  ;;  %v2071_v19 = vld [vmem:[%s6575_s8 + $0x340] sm:$0xff]  ;;  %v5105_v41 = vmul.f32 -1.442695, %v1203_v36 }
 0x247   : > { %4149 = vmatpush1.bf16.msra.mxu0 %v5894_v14  ;;  %v1094_v61 = vld [vmem:[%s6585_s14 + $0x138] sm:$0xff]  ;;  %v1979_v8 = vld [vmem:[%s6575_s8 + $0x60] sm:$0xff]  ;;  %v1093_v2 = vld [vmem:[%s6585_s14 + $0x130] sm:$0xff]  ;;  %6256 = vpow2.f32 %v5122_v16  ;;  %v1221_v9 = vadd.f32 %v1107_v37, %v7104_v58  ;;  %v2755_v20 = vmul.f32 %v7304_v12, %v2071_v19  ;;  %v5107_v58 = vmul.f32 -1.442695, %v1205_v63 }
 0x248   : > { %v2768_v40 = vpack.c.bf16 %v2658_v43, %v2657_v25  ;;  %4150 = vmatprep.subr.bf16.mxu0 %v5896_v13  ;;  %v2769_v50 = vpack.c.bf16 %v2660_v55, %v2659_v5  ;;  %v1222_v43 = vadd.f32 %v1108_v44, %v7102_v57  ;;  %v5108_v57 = vmul.f32 -1.442695, %v1206_v54  ;;  %v5906_v39 = vld [vmem:[%s6590_s18 + $0x16c] ss:$12 sps:$4 sm:$0xff]   ;;  %v2073_v25 = vld [vmem:[%s6575_s8 + $0x350] sm:$0xff] }
 0x249   : > { %3072 = vxpose.xlu0.c.b16.cont [2/8] (narrow) %v2766_v21, 64  ;;  %v2069_v21 = vld [vmem:[%s6575_s8 + $0x330] sm:$0xff]  ;;  %v1208_v22 = vadd.f32 %v1094_v61, %v7044_v24  ;;  %6258 = vpow2.f32 %v5121_v49  ;;  %v2663_v31 = vmul.f32 %v7264_v4, %v1979_v8  ;;  %v1207_v13 = vadd.f32 %v1093_v2, %v7046_v34  ;;  %v1110_v38 = vld [vmem:[%s6585_s14 + $0x1b8] sm:$0xff]  ;;  %v2076_v4 = vld [vmem:[%s6575_s8 + $0x368] sm:$0xff]  ;;  %v2639_v49 = vpop.permute.xlu0 %2638 }
 0x24a   : > { %3167 = vxpose.xlu1.c.b16.start [1/8] (narrow) %v2813_v0, 64  ;;  %v1977_v0 = vld [vmem:[%s6575_s8 + $0x50] sm:$0xff]  ;;  %v2753_v32 = vmul.f32 %v7291_v56, %v2069_v21  ;;  %v2756_v56 = vmul.f32 %v7314_v28, %v2072_v26  ;;  %v1980_v28 = vld [vmem:[%s6575_s8 + $0x68] sm:$0xff]  ;;  %6260 = vpow2.f32 %v5106_v23  ;;  %v5124_v59 = vmul.f32 -1.442695, %v1222_v43  ;;  %v1982_v10 = vld [vmem:[%s6575_s8 + $0x78] sm:$0xff] }
 0x24b   : > { %4151 = vmatpush1.bf16.msra.mxu0 %v5899_v3  ;;  %v2661_v62 = vmul.f32 %v7260_v48, %v1977_v0  ;;  %v2074_v48 = vld [vmem:[%s6575_s8 + $0x358] sm:$0xff]  ;;  %v5909_v35 = vld [vmem:[%s6590_s18 + $0x168] ss:$12 sps:$4 sm:$0xff]   ;;  %6262 = vpow2.f32 %v5105_v41  ;;  %v5123_v1 = vmul.f32 -1.442695, %v1221_v9  ;;  %v2757_v0 = vmul.f32 %v7318_v60, %v2073_v25  ;;  %v8480_v43 = vld [vmem:[#allocation2_spill] sm:$0xff] }
 0x24c   : > { %v2816_v14 = vpack.c.bf16 %v2754_v51, %v2753_v32  ;;  %4152 = vmatprep.subr.bf16.mxu0 %v5901_v47  ;;  %v1981_v24 = vld [vmem:[%s6575_s8 + $0x70] sm:$0xff]  ;;  %v2817_v29 = vpack.c.bf16 %v2756_v56, %v2755_v20  ;;  %v2758_v12 = vmul.f32 %v7328_v11, %v2074_v48  ;;  %6264 = vpow2.f32 %v5108_v57  ;;  %v2075_v51 = vld [vmem:[%s6575_s8 + $0x360] sm:$0xff]  ;;  %v2078_v54 = vld [vmem:[%s6575_s8 + $0x378] sm:$0xff] }
 0x24d   : > { %3073 = vxpose.xlu0.c.b16.cont [3/8] (narrow) %v2767_v27, 64  ;;  %v5904_v27 = vld [vmem:[%s6590_s18 + $0x150] ss:$12 sps:$4 sm:$0xff]   ;;  %v6249_v53 = vpop.eup %6248  ;;  %v5110_v5 = vmul.f32 -1.442695, %v1208_v22  ;;  %6266 = vpow2.f32 %v5107_v58  ;;  %v1224_v16 = vadd.f32 %v1110_v38, %v7108_v15  ;;  %v2760_v37 = vmul.f32 %v7342_v17, %v2076_v4  ;;  %v8479_v32 = vld [vmem:[#allocation50_spill] sm:$0xff] }
 0x24e   : > { %3168 = vxpose.xlu1.c.b16.cont [2/8] (narrow) %v2814_v45, 64  ;;  %v2662_v45 = vmul.f32 %v7262_v33, %v1978_v42  ;;  %v6251_v18 = vpop.eup %6250  ;;  %v1674_v21 = vadd.f32 1.0, %v6249_v53  ;;  %v1109_v3 = vld [vmem:[%s6585_s14 + $0x1b0] sm:$0xff]  ;;  %6268 = vpow2.f32 %v5124_v59  ;;  %v2818_v44 = vpack.c.bf16 %v2758_v12, %v2757_v0  ;;  %v1096_v42 = vld [vmem:[%s6585_s14 + $0x148] sm:$0xff]  ;;  %v1095_v17 = vld [vmem:[%s6585_s14 + $0x140] sm:$0xff] }
 0x24f   : > { %4153 = vmatpush1.bf16.msra.mxu0 %v5904_v27  ;;  %v6253_v11 = vpop.eup %6252  ;;  %v1673_v34 = vadd.f32 1.0, %v6251_v18  ;;  %v5109_v55 = vmul.f32 -1.442695, %v1207_v13  ;;  %6270 = vpow2.f32 %v5123_v1  ;;  %v1223_v60 = vadd.f32 %v1109_v3, %v7110_v6  ;;  %v2077_v61 = vld [vmem:[%s6575_s8 + $0x370] sm:$0xff]  ;;  %v2634_v6 = vpop.permute.xlu1 %2633  ;;  %v1112_v56 = vld [vmem:[%s6585_s14 + $0x1c8] sm:$0xff]  ;;  %v1114_v3 = vld [vmem:[%s6585_s14 + $0x1d8] sm:$0xff] }
 0x250   : > { %v2770_v33 = vpack.c.bf16 %v2662_v45, %v2661_v62  ;;  %4154 = vmatprep.subr.bf16.mxu0 %v5906_v39  ;;  %v6255_v36 = vpop.eup %6254  ;;  %v2666_v26 = vmul.f32 %v7270_v46, %v1982_v10  ;;  %6272 = vrcp.f32 %v1674_v21  ;;  %v2759_v47 = vmul.f32 %v8479_v32, %v2075_v51  ;;  %v8481_v41 = vld [vmem:[#allocation3_spill] sm:$0xff]  ;;  %v1111_v45 = vld [vmem:[%s6585_s14 + $0x1c0] sm:$0xff]  ;;  %v1097_v13 = vld [vmem:[%s6585_s14 + $0x150] sm:$0xff] }
 0x251   : > { %3074 = vxpose.xlu0.c.b16.cont [4/8] (narrow) %v2768_v40, 64  ;;  %v2664_v40 = vmul.f32 %v7266_v7, %v1980_v28  ;;  %v2665_v7 = vmul.f32 %v7268_v52, %v1981_v24  ;;  %v1658_v52 = vadd.f32 1.0, %v6253_v11  ;;  %v6257_v15 = vpop.eup %6256  ;;  %v1657_v23 = vadd.f32 1.0, %v6255_v36  ;;  %v8482_v39 = vld [vmem:[#allocation10_spill] sm:$0xff]  ;;  %v8483_v25 = vld [vmem:[#allocation11_spill] sm:$0xff]  ;;  %v1098_v24 = vld [vmem:[%s6585_s14 + $0x158] sm:$0xff] }
 0x252   : > { %3169 = vxpose.xlu1.c.b16.cont [3/8] (narrow) %v2815_v30, 64  ;;  %6274 = vrcp.f32 %v1673_v34  ;;  %v5126_v46 = vmul.f32 -1.442695, %v1224_v16  ;;  %v2819_v62 = vpack.c.bf16 %v2760_v37, %v2759_v47  ;;  %v2762_v19 = vmul.f32 %v2639_v49, %v2078_v54  ;;  %v8484_v4 = vld [vmem:[#allocation4_spill] sm:$0xff]  ;;  %v8485_v0 = vld [vmem:[#allocation5_spill] sm:$0xff] }
 0x253   : > { %4155 = vmatpush1.bf16.msra.mxu0 %v5909_v35  ;;  %v2771_v30 = vpack.c.bf16 %v2664_v40, %v2663_v31  ;;  %v2772_v63 = vpack.c.bf16 %v2666_v26, %v2665_v7  ;;  %6276 = vpow2.f32 %v5110_v5  ;;  %v1210_v8 = vadd.f32 %v1096_v42, %v8480_v43  ;;  %v8487_v26 = vld [vmem:[#allocation13_spill] sm:$0xff]  ;;  %v1100_v42 = vld [vmem:[%s6585_s14 + $0x168] sm:$0xff] }
 0x254   : > { %6278 = vpow2.f32 %v5109_v55  ;;  %v1209_v2 = vadd.f32 %v1095_v17, %v8481_v41  ;;  %v1676_v9 = vadd.f32 1.0, %v6257_v15  ;;  %v2761_v48 = vmul.f32 %v2634_v6, %v2077_v61  ;;  %v1116_v17 = vld [vmem:[%s6585_s14 + $0x1e8] sm:$0xff]  ;;  %v8488_v61 = vld [vmem:[#allocation6_spill] sm:$0xff] }
 0x255   : > { %3075 = vxpose.xlu0.c.b16.cont [5/8] (narrow) %v2769_v50, 64  ;;  %v6259_v50 = vpop.eup %6258  ;;  %6280 = vrcp.f32 %v1658_v52  ;;  %v1226_v53 = vadd.f32 %v1112_v56, %v8482_v39  ;;  %v5112_v31 = vmul.f32 -1.442695, %v1210_v8  ;;  %v1225_v35 = vadd.f32 %v1111_v45, %v8483_v25  ;;  %v8489_v8 = vld [vmem:[#allocation14_spill] sm:$0xff] }
 0x256   : > { %3170 = vxpose.xlu1.c.b16.cont [4/8] (narrow) %v2816_v14, 64  ;;  %v6261_v27 = vpop.eup %6260  ;;  %v5125_v14 = vmul.f32 -1.442695, %v1223_v60  ;;  %6282 = vrcp.f32 %v1657_v23  ;;  %v1675_v22 = vadd.f32 1.0, %v6259_v50  ;;  %v2820_v58 = vpack.c.bf16 %v2762_v19, %v2761_v48  ;;  %v1115_v19 = vld [vmem:[%s6585_s14 + $0x1e0] sm:$0xff]  ;;  %v8490_v48 = vld [vmem:[#allocation15_spill] sm:$0xff] }
 0x257   : > { %v6263_v57 = vpop.eup %6262  ;;  %v1660_v20 = vadd.f32 1.0, %v6261_v27  ;;  %6284 = vpow2.f32 %v5126_v46  ;;  %v5111_v59 = vmul.f32 -1.442695, %v1209_v2  ;;  %v5128_v38 = vmul.f32 -1.442695, %v1226_v53  ;;  %v1099_v45 = vld [vmem:[%s6585_s14 + $0x160] sm:$0xff] }
 0x258   : > { %v6265_v28 = vpop.eup %6264  ;;  %6286 = vpow2.f32 %v5125_v14  ;;  %v1659_v12 = vadd.f32 1.0, %v6263_v57  ;;  %v1212_v5 = vadd.f32 %v1098_v24, %v8484_v4  ;;  %v5127_v21 = vmul.f32 -1.442695, %v1225_v35  ;;  %v8492_v35 = vld [vmem:[#allocation8_spill] sm:$0xff]  ;;  %v1118_v24 = vld [vmem:[%s6585_s14 + $0x1f8] sm:$0xff] }
 0x259   : > { %3076 = vxpose.xlu0.c.b16.cont [6/8] (narrow) %v2770_v33, 64  ;;  %v6267_v33 = vpop.eup %6266  ;;  %6288 = vrcp.f32 %v1676_v9  ;;  %v1211_v11 = vadd.f32 %v1097_v13, %v8485_v0  ;;  %v1662_v16 = vadd.f32 1.0, %v6265_v28  ;;  %v1214_v6 = vadd.f32 %v1100_v42, %v8488_v61  ;;  %v1117_v13 = vld [vmem:[%s6585_s14 + $0x1f0] sm:$0xff]  ;;  %v1136_v61 = vld [vmem:[%s6585_s14 + $0x288] sm:$0xff] }
 0x25a   : > { %3171 = vxpose.xlu1.c.b16.cont [5/8] (narrow) %v2817_v29, 64  ;;  %v6269_v18 = vpop.eup %6268  ;;  %6290 = vrcp.f32 %v1675_v22  ;;  %v5114_v60 = vmul.f32 -1.442695, %v1212_v5  ;;  %v1661_v47 = vadd.f32 1.0, %v6267_v33  ;;  %v1230_v14 = vadd.f32 %v1116_v17, %v8489_v8  ;;  %v8491_v33 = vld [vmem:[#allocation7_spill] sm:$0xff]  ;;  %v8493_v5 = vld [vmem:[#allocation16_spill] sm:$0xff] }
 0x25b   : > { %v6271_v29 = vpop.eup %6270  ;;  %6292 = vrcp.f32 %v1660_v20  ;;  %v1678_v34 = vadd.f32 1.0, %v6269_v18  ;;  %v5113_v52 = vmul.f32 -1.442695, %v1211_v11  ;;  %v5116_v9 = vmul.f32 -1.442695, %v1214_v6  ;;  %v1102_v20 = vld [vmem:[%s6585_s14 + $0x178] sm:$0xff] }
 0x25c   : > { %v6273_v1 = vpop.eup %6272  ;;  %6294 = vpow2.f32 %v5112_v31  ;;  %v1677_v51 = vadd.f32 1.0, %v6271_v29  ;;  %v1229_v57 = vadd.f32 %v1115_v19, %v8490_v48  ;;  %v5132_v53 = vmul.f32 -1.442695, %v1230_v14  ;;  %v1101_v0 = vld [vmem:[%s6585_s14 + $0x170] sm:$0xff]  ;;  %v8494_v11 = vld [vmem:[#allocation17_spill] sm:$0xff]  ;;  %v8496_v6 = vld [vmem:[#allocation35_spill] sm:$0xff] }
 0x25d   : > { %3077 = vxpose.xlu0.c.b16.cont [7/8] (narrow) %v2771_v30, 64  ;;  %v6275_v40 = vpop.eup %6274  ;;  %6296 = vpow2.f32 %v5111_v59  ;;  %v1113_v30 = vld [vmem:[%s6585_s14 + $0x1d0] sm:$0xff]  ;;  %v1213_v31 = vadd.f32 %v1099_v45, %v8491_v33  ;;  %v1216_v18 = vadd.f32 %v1102_v20, %v8492_v35  ;;  %v1139_v8 = vld [vmem:[%s6585_s14 + $0x2a0] sm:$0xff] }
 0x25e   : > { %3172 = vxpose.xlu1.c.b16.cont [6/8] (narrow) %v2818_v44, 64  ;;  %v6277_v10 = vpop.eup %6276  ;;  %6298 = vrcp.f32 %v1659_v12  ;;  %v8486_v44 = vld [vmem:[#allocation12_spill] sm:$0xff]  ;;  %v1227_v54 = vadd.f32 %v1113_v30, %v8487_v26  ;;  %v5131_v59 = vmul.f32 -1.442695, %v1229_v57  ;;  %v1119_v45 = vld [vmem:[%s6585_s14 + $0x200] sm:$0xff] }
 0x25f   : > { %v6279_v7 = vpop.eup %6278  ;;  %6300 = vpow2.f32 %v5128_v38  ;;  %v1228_v37 = vadd.f32 %v1114_v3, %v8486_v44  ;;  %v1664_v41 = vadd.f32 1.0, %v6277_v10  ;;  %v5115_v4 = vmul.f32 -1.442695, %v1213_v31  ;;  %v8495_v44 = vld [vmem:[#allocation9_spill] sm:$0xff] }
 0x260   : > { %v6281_v36 = vpop.eup %6280  ;;  %6302 = vpow2.f32 %v5127_v21  ;;  %v5129_v50 = vmul.f32 -1.442695, %v1227_v54  ;;  %v1663_v28 = vadd.f32 1.0, %v6279_v7  ;;  %v1232_v21 = vadd.f32 %v1118_v24, %v8493_v5  ;;  %v1141_v5 = vld [vmem:[%s6585_s14 + $0x2b0] sm:$0xff] }
 0x261   : > { %3078 = vxpose.xlu0.c.b16.end [8/8] (narrow) %v2772_v63, 64  ;;  %v6283_v55 = vpop.eup %6282  ;;  %6304 = vrcp.f32 %v1678_v34  ;;  %v5130_v23 = vmul.f32 -1.442695, %v1228_v37  ;;  %v5118_v10 = vmul.f32 -1.442695, %v1216_v18  ;;  %v1231_v34 = vadd.f32 %v1117_v13, %v8494_v11  ;;  %v8501_v13 = vld [vmem:[#allocation23_spill] sm:$0xff] }
 0x262   : > { %3173 = vxpose.xlu1.c.b16.cont [7/8] (narrow) %v2819_v62, 64  ;;  %v6285_v49 = vpop.eup %6284  ;;  %6306 = vrcp.f32 %v1677_v51  ;;  %v1215_v37 = vadd.f32 %v1101_v0, %v8495_v44  ;;  %v1121_v11 = vld [vmem:[%s6585_s14 + $0x210] sm:$0xff]  ;;  %v8503_v44 = vld [vmem:[#allocation41_spill] sm:$0xff] }
 0x263   : > { %v6287_v32 = vpop.eup %6286  ;;  %6308 = vrcp.f32 %v1662_v16  ;;  %v1680_v62 = vadd.f32 1.0, %v6285_v49  ;;  %v5133_v26 = vmul.f32 -1.442695, %v1231_v34 }
 0x264   : > { %v6289_v15 = vpop.eup %6288  ;;  %6310 = vpow2.f32 %v5114_v60  ;;  %v1679_v43 = vadd.f32 1.0, %v6287_v32 }
 0x265   : > { %v6291_v63 = vpop.eup %6290  ;;  %6312 = vpow2.f32 %v5113_v52  ;;  %v1135_v52 = vld [vmem:[%s6585_s14 + $0x280] sm:$0xff] }
 0x266   : > { %3174 = vxpose.xlu1.c.b16.end [8/8] (narrow) %v2820_v58, 64  ;;  %v6293_v46 = vpop.eup %6292  ;;  %6314 = vrcp.f32 %v1661_v47  ;;  %v1138_v47 = vld [vmem:[%s6585_s14 + $0x298] sm:$0xff] }
 0x267   : > { %v6295_v27 = vpop.eup %6294  ;;  %6316 = vpow2.f32 %v5130_v23  ;;  %v5117_v23 = vmul.f32 -1.442695, %v1215_v37  ;;  %v1255_v37 = vadd.f32 %v1141_v5, %v8503_v44 }
 0x268   : > { %v6297_v56 = vpop.eup %6296  ;;  %6318 = vpow2.f32 %v5129_v50  ;;  %v1666_v7 = vadd.f32 1.0, %v6295_v27  ;;  %v1249_v50 = vadd.f32 %v1135_v52, %v8496_v6 }
 0x269   : > { %v6299_v2 = vpop.eup %6298  ;;  %6320 = vrcp.f32 %v1680_v62  ;;  %v8497_v62 = vld [vmem:[#allocation36_spill] sm:$0xff] }
 0x26a   : > { %2328 = vperm.xlu0 %5818, %v6273_v1   ;;  %2323 = vperm.xlu1 %5819, %v6275_v40   ;;  %v6301_v22 = vpop.eup %6300  ;;  %6322 = vrcp.f32 %v1679_v43  ;;  %v1252_v19 = vadd.f32 %v1138_v47, %v8497_v62  ;;  %v5151_v48 = vmul.f32 -1.442695, %v1249_v50 }
 0x26b   : > { %v6303_v39 = vpop.eup %6302  ;;  %6324 = vrcp.f32 %v1664_v41  ;;  %v1682_v12 = vadd.f32 1.0, %v6301_v22  ;;  %v8498_v41 = vld [vmem:[#allocation34_spill] sm:$0xff] }
 0x26c   : > { %v6305_v58 = vpop.eup %6304  ;;  %6326 = vpow2.f32 %v5116_v9  ;;  %v1681_v38 = vadd.f32 1.0, %v6303_v39  ;;  %v5154_v22 = vmul.f32 -1.442695, %v1252_v19 }
 0x26d   : > { %v6307_v25 = vpop.eup %6306  ;;  %6328 = vrcp.f32 %v1663_v28  ;;  %v8499_v28 = vld [vmem:[#allocation39_spill] sm:$0xff] }
 0x26e   : > { %2248 = vperm.xlu0 %5818, %v6281_v36   ;;  %2243 = vperm.xlu1 %5819, %v6283_v55   ;;  %v6309_v29 = vpop.eup %6308  ;;  %6330 = vpow2.f32 %v5132_v53  ;;  %v1665_v36 = vadd.f32 1.0, %v6297_v56  ;;  %v5134_v55 = vmul.f32 -1.442695, %v1232_v21  ;;  %v1253_v20 = vadd.f32 %v1139_v8, %v8499_v28  ;;  %v8508_v28 = vld [vmem:[#allocation20_spill] sm:$0xff] }
 0x26f   : > { %v6311_v1 = vpop.eup %6310  ;;  %6332 = vpow2.f32 %v5131_v59 }
 0x270   : > { %v6313_v40 = vpop.eup %6312  ;;  %6334 = vrcp.f32 %v1682_v12 }
 0x271   : > { %v6315_v3 = vpop.eup %6314  ;;  %6336 = vrcp.f32 %v1681_v38  ;;  %v5155_v38 = vmul.f32 -1.442695, %v1253_v20 }
 0x272   : > { %2338 = vperm.xlu0 %5818, %v6289_v15   ;;  %2333 = vperm.xlu1 %5819, %v6291_v63   ;;  %v6317_v30 = vpop.eup %6316  ;;  %6338 = vpow2.f32 %v5115_v4  ;;  %v1668_v63 = vadd.f32 1.0, %v6311_v1 }
 0x273   : > { %v6319_v51 = vpop.eup %6318  ;;  %6340 = vpow2.f32 %v5118_v10  ;;  %v1684_v49 = vadd.f32 1.0, %v6317_v30 }
 0x274   : > { %v6321_v16 = vpop.eup %6320  ;;  %6342 = vrcp.f32 %v1666_v7  ;;  %v1683_v32 = vadd.f32 1.0, %v6319_v51  ;;  %v1125_v7 = vld [vmem:[%s6585_s14 + $0x230] sm:$0xff] }
 0x275   : > { %v6323_v60 = vpop.eup %6322  ;;  %6344 = vrcp.f32 %v1665_v36 }
 0x276   : > { %2258 = vperm.xlu0 %5818, %v6293_v46   ;;  %2253 = vperm.xlu1 %5819, %v6299_v2   ;;  %v6325_v54 = vpop.eup %6324  ;;  %6346 = vpow2.f32 %v5134_v55  ;;  %v1667_v46 = vadd.f32 1.0, %v6313_v40  ;;  %v1250_v2 = vadd.f32 %v1136_v61, %v8498_v41  ;;  %v5157_v61 = vmul.f32 -1.442695, %v1255_v37 }
 0x277   : > { %v6327_v42 = vpop.eup %6326  ;;  %6348 = vpow2.f32 %v5133_v26  ;;  %v8504_v26 = vld [vmem:[#allocation21_spill] sm:$0xff] }
 0x278   : > { %v6329_v15 = vpop.eup %6328  ;;  %6350 = vrcp.f32 %v1684_v49  ;;  %v1670_v43 = vadd.f32 1.0, %v6327_v42  ;;  %v5152_v18 = vmul.f32 -1.442695, %v1250_v2  ;;  %v8505_v42 = vld [vmem:[#allocation25_spill] sm:$0xff]  ;;  %v8507_v2 = vld [vmem:[#allocation43_spill] sm:$0xff] }
 0x279   : > { %v6331_v17 = vpop.eup %6330  ;;  %6352 = vrcp.f32 %v1683_v32  ;;  %v1239_v32 = vadd.f32 %v1125_v7, %v8505_v42  ;;  %v1142_v42 = vld [vmem:[%s6585_s14 + $0x2b8] sm:$0xff] }
 0x27a   : > { %2348 = vperm.xlu0 %5818, %v6305_v58   ;;  %2343 = vperm.xlu1 %5819, %v6307_v25   ;;  %v6333_v27 = vpop.eup %6332  ;;  %6354 = vpow2.f32 %v5117_v23  ;;  %v1686_v56 = vadd.f32 1.0, %v6331_v17  ;;  %v1123_v58 = vld [vmem:[%s6585_s14 + $0x220] sm:$0xff]  ;;  %v8500_v25 = vld [vmem:[#allocation19_spill] sm:$0xff]  ;;  %v8506_v23 = vld [vmem:[#allocation37_spill] sm:$0xff] }
 0x27b   : > { %v6335_v14 = vpop.eup %6334  ;;  %6356 = vrcp.f32 %v1668_v63  ;;  %v1685_v53 = vadd.f32 1.0, %v6333_v27  ;;  %v1233_v35 = vadd.f32 %v1119_v45, %v8500_v25  ;;  %v1237_v1 = vadd.f32 %v1123_v58, %v8501_v13  ;;  %v1140_v58 = vld [vmem:[%s6585_s14 + $0x2a8] sm:$0xff] }
 0x27c   : > { %v6337_v9 = vpop.eup %6336  ;;  %6358 = vrcp.f32 %v1667_v46  ;;  %v1143_v46 = vld [vmem:[%s6585_s14 + $0x2c0] sm:$0xff]  ;;  %v5141_v19 = vmul.f32 -1.442695, %v1239_v32  ;;  %v8509_v25 = vld [vmem:[#allocation27_spill] sm:$0xff] }
 0x27d   : > { %v6339_v57 = vpop.eup %6338  ;;  %6360 = vrcp.f32 %v1670_v43  ;;  %v5135_v0 = vmul.f32 -1.442695, %v1233_v35  ;;  %v5139_v36 = vmul.f32 -1.442695, %v1237_v1  ;;  %v1122_v43 = vld [vmem:[%s6585_s14 + $0x218] sm:$0xff] }
 0x27e   : > { %2268 = vperm.xlu0 %5818, %v6309_v29   ;;  %2263 = vperm.xlu1 %5819, %v6315_v3   ;;  %v6341_v39 = vpop.eup %6340  ;;  %6362 = vrcp.f32 %v1686_v56  ;;  %v1669_v24 = vadd.f32 1.0, %v6339_v57  ;;  %v1120_v29 = vld [vmem:[%s6585_s14 + $0x208] sm:$0xff]  ;;  %v8502_v3 = vld [vmem:[#allocation18_spill] sm:$0xff]  ;;  %v1236_v20 = vadd.f32 %v1122_v43, %v8508_v28 }
 0x27f   : > { %v6343_v31 = vpop.eup %6342  ;;  %6364 = vpow2.f32 %v5151_v48  ;;  %v1672_v4 = vadd.f32 1.0, %v6341_v39  ;;  %v1234_v10 = vadd.f32 %v1120_v29, %v8502_v3  ;;  %v1127_v48 = vld [vmem:[%s6585_s14 + $0x240] sm:$0xff]  ;;  %v1145_v29 = vld [vmem:[%s6585_s14 + $0x2d0] sm:$0xff]  ;;  %v8515_v43 = vld [vmem:[#allocation47_spill] sm:$0xff] }
 0x280   : > { %v6345_v59 = vpop.eup %6344  ;;  %6366 = vpow2.f32 %v5154_v22  ;;  %v1241_v35 = vadd.f32 %v1127_v48, %v8509_v25  ;;  %v5138_v1 = vmul.f32 -1.442695, %v1236_v20 }
 0x281   : > { %v6347_v12 = vpop.eup %6346  ;;  %6368 = vrcp.f32 %v1685_v53  ;;  %v5136_v52 = vmul.f32 -1.442695, %v1234_v10 }
 0x282   : > { %2358 = vperm.xlu0 %5818, %v6321_v16   ;;  %2353 = vperm.xlu1 %5819, %v6323_v60   ;;  %v6349_v40 = vpop.eup %6348  ;;  %6370 = vpow2.f32 %v5152_v18  ;;  %v1688_v30 = vadd.f32 1.0, %v6347_v12  ;;  %v1137_v16 = vld [vmem:[%s6585_s14 + $0x290] sm:$0xff]  ;;  %v5143_v10 = vmul.f32 -1.442695, %v1241_v35 }
 0x283   : > { %v6351_v21 = vpop.eup %6350  ;;  %6372 = vrcp.f32 %v1669_v24  ;;  %v1687_v60 = vadd.f32 1.0, %v6349_v40  ;;  %v1251_v17 = vadd.f32 %v1137_v16, %v8506_v23  ;;  %v8512_v16 = vld [vmem:[#allocation22_spill] sm:$0xff] }
 0x284   : > { %v6353_v34 = vpop.eup %6352  ;;  %6374 = vpow2.f32 %v5155_v38  ;;  %v8510_v38 = vld [vmem:[#allocation38_spill] sm:$0xff] }
 0x285   : > { %v6355_v51 = vpop.eup %6354  ;;  %6376 = vrcp.f32 %v1672_v4  ;;  %v5153_v8 = vmul.f32 -1.442695, %v1251_v17  ;;  %v1254_v40 = vadd.f32 %v1140_v58, %v8510_v38  ;;  %v1147_v23 = vld [vmem:[%s6585_s14 + $0x2e0] sm:$0xff] }
 0x286   : > { %2278 = vperm.xlu0 %5818, %v6325_v54   ;;  %2273 = vperm.xlu1 %5819, %v6329_v15   ;;  %v6357_v55 = vpop.eup %6356  ;;  %v1235_v54 = vadd.f32 %v1121_v11, %v8504_v26  ;;  %6378 = vpow2.f32 %v5135_v0  ;;  %v1671_v15 = vadd.f32 1.0, %v6355_v51  ;;  %v1129_v0 = vld [vmem:[%s6585_s14 + $0x250] sm:$0xff]  ;;  %v8511_v11 = vld [vmem:[#allocation45_spill] sm:$0xff]  ;;  %v8518_v38 = vld [vmem:[#allocation42_spill] sm:$0xff] }
 0x287   : > { %v6359_v49 = vpop.eup %6358  ;;  %6380 = vrcp.f32 %v1688_v30  ;;  %v5156_v37 = vmul.f32 -1.442695, %v1254_v40  ;;  %v8513_v26 = vld [vmem:[#allocation29_spill] sm:$0xff] }
 0x288   : > { %v6361_v47 = vpop.eup %6360  ;;  %6382 = vpow2.f32 %v5139_v36  ;;  %v5137_v50 = vmul.f32 -1.442695, %v1235_v54  ;;  %v1243_v54 = vadd.f32 %v1129_v0, %v8513_v26 }
 0x289   : > { %v6363_v63 = vpop.eup %6362  ;;  %6384 = vrcp.f32 %v1687_v60 }
 0x28a   : > { %2368 = vperm.xlu0 %5818, %v6335_v14   ;;  %2363 = vperm.xlu1 %5819, %v6337_v9   ;;  %v6365_v6 = vpop.eup %6364  ;;  %6386 = vpow2.f32 %v5136_v52  ;;  %v1257_v9 = vadd.f32 %v1143_v46, %v8507_v2  ;;  %v5145_v46 = vmul.f32 -1.442695, %v1243_v54 }
 0x28b   : > { %v7505_v33 = vpop.trf.xlu0  ;;  %v6367_v62 = vpop.eup %6366  ;;  %6388 = vrcp.f32 %v1671_v15  ;;  %v1705_v41 = vadd.f32 1.0, %v6365_v6 }
 0x28c   : > { %4156 = vmatprep.mubr.bf16.mxu0 %v7505_v33  ;;  %v6369_v27 = vpop.eup %6368  ;;  %6390 = vpow2.f32 %v5157_v61  ;;  %v1708_v57 = vadd.f32 1.0, %v6367_v62  ;;  %v5159_v18 = vmul.f32 -1.442695, %v1257_v9  ;;  %v8514_v62 = vld [vmem:[#allocation40_spill] sm:$0xff] }
 0x28d   : > { %v6371_v56 = vpop.eup %6370  ;;  %6392 = vpow2.f32 %v5137_v50  ;;  %v1126_v50 = vld [vmem:[%s6585_s14 + $0x238] sm:$0xff] }
 0x28e   : > { %2288 = vperm.xlu0 %5818, %v6343_v31   ;;  %2283 = vperm.xlu1 %5819, %v6345_v59   ;;  %v6373_v45 = vpop.eup %6372  ;;  %6394 = vpow2.f32 %v5141_v19  ;;  %v1706_v53 = vadd.f32 1.0, %v6371_v56  ;;  %v1256_v19 = vadd.f32 %v1142_v42, %v8514_v62 }
 0x28f   : > { %v7522_v14 = vpop.trf.xlu0  ;;  %v6375_v22 = vpop.eup %6374  ;;  %6396 = vpow2.f32 %v5153_v8  ;;  %v1261_v8 = vadd.f32 %v1147_v23, %v8515_v43 }
 0x290   : > { %v6377_v39 = vpop.eup %6376  ;;  %6398 = vrcp.f32 %v1705_v41  ;;  %v1709_v24 = vadd.f32 1.0, %v6375_v22  ;;  %v1131_v41 = vld [vmem:[%s6585_s14 + $0x260] sm:$0xff]  ;;  %v8516_v22 = vld [vmem:[#allocation24_spill] sm:$0xff] }
 0x291   : > { %v6379_v31 = vpop.eup %6378  ;;  %6400 = vrcp.f32 %v1708_v57  ;;  %v1240_v28 = vadd.f32 %v1126_v50, %v8516_v22  ;;  %v5163_v35 = vmul.f32 -1.442695, %v1261_v8  ;;  %v8522_v8 = vld [vmem:[#allocation44_spill] sm:$0xff] }
 0x292   : > { %2378 = vperm.xlu0 %5818, %v6351_v21   ;;  %2373 = vperm.xlu1 %5819, %v6353_v34   ;;  %v6381_v59 = vpop.eup %6380  ;;  %v1689_v5 = vadd.f32 1.0, %v6379_v31  ;;  %v1124_v21 = vld [vmem:[%s6585_s14 + $0x228] sm:$0xff]  ;;  %6402 = vrcp.f32 %v1706_v53  ;;  %v1259_v34 = vadd.f32 %v1145_v29, %v8511_v11  ;;  %v8519_v11 = vld [vmem:[#allocation49_spill] sm:$0xff] }
 0x293   : > { %v7530_v12 = vpop.trf.xlu0  ;;  %v6383_v13 = vpop.eup %6382  ;;  %6404 = vpow2.f32 %v5159_v18  ;;  %v1238_v44 = vadd.f32 %v1124_v21, %v8512_v16  ;;  %v1144_v53 = vld [vmem:[%s6585_s14 + $0x2c8] sm:$0xff] }
 0x294   : > { %v6385_v4 = vpop.eup %6384  ;;  %v1693_v7 = vadd.f32 1.0, %v6383_v13  ;;  %6406 = vrcp.f32 %v1709_v24  ;;  %v5161_v32 = vmul.f32 -1.442695, %v1259_v34  ;;  %v8517_v31 = vld [vmem:[#allocation31_spill] sm:$0xff]  ;;  %v1149_v24 = vld [vmem:[%s6585_s14 + $0x2f0] sm:$0xff]  ;;  %v1258_v40 = vadd.f32 %v1144_v53, %v8518_v38 }
 0x295   : > { %v6387_v3 = vpop.eup %6386  ;;  %6408 = vpow2.f32 %v5138_v1  ;;  %v5140_v61 = vmul.f32 -1.442695, %v1238_v44  ;;  %v1245_v25 = vadd.f32 %v1131_v41, %v8517_v31  ;;  %v5142_v1 = vmul.f32 -1.442695, %v1240_v28  ;;  %v1128_v21 = vld [vmem:[%s6585_s14 + $0x248] sm:$0xff] }
 0x296   : > { %2298 = vperm.xlu0 %5818, %v6357_v55   ;;  %2293 = vperm.xlu1 %5819, %v6359_v49   ;;  %v6389_v30 = vpop.eup %6388  ;;  %v1690_v60 = vadd.f32 1.0, %v6387_v3  ;;  %6410 = vrcp.f32 %v1689_v5  ;;  %v5875_v3 = vld [vmem:[%s6590_s18 + $0x8] ss:$12 sps:$4 sm:$0xff]   ;;  %v1263_v34 = vadd.f32 %v1149_v24, %v8519_v11  ;;  %v5878_v44 = vld [vmem:[%s6590_s18 + $0xe0] ss:$12 sps:$4 sm:$0xff]  }
 0x297   : > { %v6391_v36 = vpop.eup %6390  ;;  %v7542_v49 = vpop.trf.xlu0  ;;  %6412 = vpow2.f32 %v5143_v10  ;;  %v5147_v0 = vmul.f32 -1.442695, %v1245_v25  ;;  %v5160_v54 = vmul.f32 -1.442695, %v1258_v40  ;;  %v5913_v31 = vld [vmem:[%s6590_s18 + $0x184] ss:$12 sps:$4 sm:$0xff]  }
 0x298   : > { %v6393_v55 = vpop.eup %6392  ;;  %6414 = vrcp.f32 %v1693_v7  ;;  %v1711_v15 = vadd.f32 1.0, %v6391_v36  ;;  %v1133_v36 = vld [vmem:[%s6585_s14 + $0x270] sm:$0xff]  ;;  %v1148_v40 = vld [vmem:[%s6585_s14 + $0x2e8] sm:$0xff]  ;;  %4195 = vmatprep.subr.bf16.mxu0 %v5913_v31 }
 0x299   : > { %v6395_v52 = vpop.eup %6394  ;;  %6416 = vpow2.f32 %v5156_v37  ;;  %v1691_v57 = vadd.f32 1.0, %v6393_v55  ;;  %v5890_v24 = vld [vmem:[%s6590_s18 + $0x50] ss:$12 sps:$4 sm:$0xff]  }
 0x29a   : > { %2388 = vperm.xlu0 %5818, %v6363_v63   ;;  %2383 = vperm.xlu1 %5819, %v6369_v27   ;;  %6418 = vrcp.f32 %v1690_v60  ;;  %v1695_v27 = vadd.f32 1.0, %v6395_v52  ;;  %v8520_v60 = vld [vmem:[#allocation26_spill] sm:$0xff] }
 0x29b   : > { %6420 = vpow2.f32 %v5161_v32  ;;  %v1242_v26 = vadd.f32 %v1128_v21, %v8520_v60  ;;  %v5880_v32 = vld [vmem:[%s6590_s18 + $0x20] ss:$12 sps:$4 sm:$0xff]   ;;  %v5893_v21 = vld [vmem:[%s6590_s18 + $0x128] ss:$12 sps:$4 sm:$0xff]  }
 0x29c   : > { %6422 = vrcp.f32 %v1711_v15  ;;  %v8521_v15 = vld [vmem:[#allocation33_spill] sm:$0xff]  ;;  %v1132_v60 = vld [vmem:[%s6585_s14 + $0x268] sm:$0xff] }
 0x29d   : > { %6424 = vpow2.f32 %v5140_v61  ;;  %v1247_v23 = vadd.f32 %v1133_v36, %v8521_v15  ;;  %v5165_v61 = vmul.f32 -1.442695, %v1263_v34  ;;  %v8524_v34 = vld [vmem:[#allocation46_spill] sm:$0xff]  ;;  %v5895_v36 = vld [vmem:[%s6590_s18 + $0x68] ss:$12 sps:$4 sm:$0xff]  }
 0x29e   : > { %2308 = vperm.xlu0 %5818, %v6361_v47   ;;  %2303 = vperm.xlu1 %5819, %v6373_v45   ;;  %v6397_v47 = vpop.eup %6396  ;;  %6426 = vpow2.f32 %v5145_v46  ;;  %v5883_v46 = vld [vmem:[%s6590_s18 + $0xf8] ss:$12 sps:$4 sm:$0xff]   ;;  %v5919_v15 = vld [vmem:[%s6590_s18 + $0x1b4] ss:$12 sps:$4 sm:$0xff]  }
 0x29f   : > { %v6399_v63 = vpop.eup %6398  ;;  %v1707_v2 = vadd.f32 1.0, %v6397_v47  ;;  %6428 = vrcp.f32 %v1695_v27  ;;  %v5149_v22 = vmul.f32 -1.442695, %v1247_v23 }
 0x2a0   : > { %v6401_v6 = vpop.eup %6400 }
 0x2a1   : > { %v6403_v56 = vpop.eup %6402  ;;  %6430 = vrcp.f32 %v1707_v2  ;;  %v5885_v2 = vld [vmem:[%s6590_s18 + $0x38] ss:$12 sps:$4 sm:$0xff]  }
 0x2a2   : > { %2398 = vperm.xlu0 %5818, %v6381_v59   ;;  %2393 = vperm.xlu1 %5819, %v6385_v4   ;;  %v6405_v48 = vpop.eup %6404  ;;  %6432 = vrcp.f32 %v1691_v57  ;;  %v1130_v57 = vld [vmem:[%s6585_s14 + $0x258] sm:$0xff] }
 0x2a3   : > { %v7536_v51 = vpop.trf.xlu1  ;;  %v6407_v20 = vpop.eup %6406  ;;  %v1713_v59 = vadd.f32 1.0, %v6405_v48 }
 0x2a4   : > { %5356 = vmatprep.mubr.msk.bf16.mxu1 %vm4111_vm3, %v7536_v51  ;;  %v6409_v58 = vpop.eup %6408 }
 0x2a5   : > { %v6411_v18 = vpop.eup %6410  ;;  %v1692_v5 = vadd.f32 1.0, %v6409_v58 }
 0x2a6   : > { %2318 = vperm.xlu0 %5818, %v6377_v39   ;;  %2313 = vperm.xlu1 %5819, %v6389_v30   ;;  %v5158_v39 = vmul.f32 -1.442695, %v1256_v19  ;;  %v6413_v13 = vpop.eup %6412  ;;  %v5144_v19 = vmul.f32 -1.442695, %v1242_v26 }
 0x2a7   : > { %v7546_v17 = vpop.trf.xlu1  ;;  %v6415_v4 = vpop.eup %6414  ;;  %v1697_v7 = vadd.f32 1.0, %v6413_v13  ;;  %v5911_v13 = vld [vmem:[%s6590_s18 + $0x180] ss:$12 sps:$4 sm:$0xff]  }
 0x2a8   : > { %6434 = vpow2.f32 %v5158_v39  ;;  %v6417_v10 = vpop.eup %6416  ;;  %v5888_v39 = vld [vmem:[%s6590_s18 + $0x110] ss:$12 sps:$4 sm:$0xff]  }
 0x2a9   : > { %6436 = vpow2.f32 %v5163_v35  ;;  %v6419_v30 = vpop.eup %6418  ;;  %v1710_v42 = vadd.f32 1.0, %v6417_v10  ;;  %v8523_v35 = vld [vmem:[#allocation28_spill] sm:$0xff] }
 0x2aa   : > { %2498 = vperm.xlu0 %5818, %v6401_v6   ;;  %2483 = vperm.xlu1 %5819, %v6399_v63   ;;  %6438 = vrcp.f32 %v1713_v59  ;;  %v6421_v55 = vpop.eup %6420  ;;  %v1146_v63 = vld [vmem:[%s6585_s14 + $0x2d8] sm:$0xff] }
 0x2ab   : > { %v7552_v9 = vpop.trf.xlu1  ;;  %v7554_v45 = vpop.trf.xlu0  ;;  %6440 = vpow2.f32 %v5142_v1  ;;  %v1715_v50 = vadd.f32 1.0, %v6421_v55 }
 0x2ac   : > { %4157 = vmatmul.mubr.bf16.vlgmr.msra.gmra.mrb[0].mxu0 %v7554_v45  ;;  %v6423_v52 = vpop.eup %6422  ;;  %6442 = vrcp.f32 %v1692_v5 }
 0x2ad   : > { %4166 = vmatprep.mubr.bf16.mxu0 %v7522_v14  ;;  %v6425_v47 = vpop.eup %6424  ;;  %6444 = vpow2.f32 %v5147_v0  ;;  %4196 = vmatpush1.bf16.msra.mxu0 %v5911_v13 }
 0x2ae   : > { %2503 = vperm.xlu0 %5818, %v6407_v20   ;;  %2488 = vperm.xlu1 %5819, %v6403_v56   ;;  %v6427_v6 = vpop.eup %6426  ;;  %6446 = vrcp.f32 %v1697_v7  ;;  %v1694_v43 = vadd.f32 1.0, %v6425_v47  ;;  %v1260_v56 = vadd.f32 %v1146_v63, %v8522_v8  ;;  %v8525_v63 = vld [vmem:[#allocation30_spill] sm:$0xff] }
 0x2af   : > { %v7562_v29 = vpop.trf.xlu1  ;;  %v7572_v37 = vpop.trf.xlu0  ;;  %6448 = vpow2.f32 %v5160_v54  ;;  %v1699_v20 = vadd.f32 1.0, %v6427_v6  ;;  %v5903_v8 = vld [vmem:[%s6590_s18 + $0x158] ss:$12 sps:$4 sm:$0xff]  }
 0x2b0   : > { %v6429_v62 = vpop.eup %6428  ;;  %6450 = vrcp.f32 %v1710_v42  ;;  %v5162_v59 = vmul.f32 -1.442695, %v1260_v56  ;;  %v5917_v56 = vld [vmem:[%s6590_s18 + $0x1b0] ss:$12 sps:$4 sm:$0xff]  }
 0x2b1   : > { %v6431_v27 = vpop.eup %6430  ;;  %6452 = vpow2.f32 %v5165_v61  ;;  %v1246_v61 = vadd.f32 %v1132_v60, %v8525_v63  ;;  %v5938_v63 = vld [vmem:[%s6590_s18 + $0x248] ss:$12 sps:$4 sm:$0xff]  }
 0x2b2   : > { %2423 = vperm.xlu0 %5818, %v6415_v4   ;;  %2403 = vperm.xlu1 %5819, %v6411_v18   ;;  %v6433_v48 = vpop.eup %6432  ;;  %6454 = vrcp.f32 %v1715_v50  ;;  %v1244_v18 = vadd.f32 %v1130_v57, %v8523_v35  ;;  %v5900_v50 = vld [vmem:[%s6590_s18 + $0x80] ss:$12 sps:$4 sm:$0xff]   ;;  %v1134_v35 = vld [vmem:[%s6585_s14 + $0x278] sm:$0xff] }
 0x2b3   : > { %v7569_v16 = vpop.trf.xlu1  ;;  %v6435_v28 = vpop.eup %6434  ;;  %6456 = vpow2.f32 %v5144_v19 }
 0x2b4   : > { %4370 = vmatmul.mubr.bf16.vlgmr.msra.gmra.mrb[0].mxu1 %v7569_v16  ;;  %4167 = vmatmul.mubr.bf16.gmra.mrb[4].mxu0 %v7572_v37  ;;  %v7590_v53 = vpop.trf.xlu0  ;;  %v6437_v58 = vpop.eup %6436  ;;  %6458 = vrcp.f32 %v1694_v43  ;;  %v1712_v38 = vadd.f32 1.0, %v6435_v28  ;;  %v5146_v11 = vmul.f32 -1.442695, %v1244_v18 }
 0x2b5   : > { %5652 = vmatpush3.bf16.msra.mxu1 %v5875_v3  ;;  %5357 = vmatprep.mubr.msk.bf16.mxu1 %vm4111_vm3, %v7546_v17  ;;  %v6439_v25 = vpop.eup %6438  ;;  %6460 = vpow2.f32 %v5149_v22  ;;  %v1717_v5 = vadd.f32 1.0, %v6437_v58  ;;  %v5916_v3 = vld [vmem:[%s6590_s18 + $0x19c] ss:$12 sps:$4 sm:$0xff]   ;;  %v5148_v22 = vmul.f32 -1.442695, %v1246_v61  ;;  %v8526_v58 = vld [vmem:[#allocation48_spill] sm:$0xff] }
 0x2b6   : > { %2513 = vperm.xlu0 %5818, %v6423_v52   ;;  %2408 = vperm.xlu1 %5819, %v6419_v30   ;;  %v6441_v1 = vpop.eup %6440  ;;  %6462 = vrcp.f32 %v1699_v20  ;;  %v1262_v30 = vadd.f32 %v1148_v40, %v8524_v34  ;;  %v5898_v52 = vld [vmem:[%s6590_s18 + $0x140] ss:$12 sps:$4 sm:$0xff]   ;;  %v5905_v20 = vld [vmem:[%s6590_s18 + $0x98] ss:$12 sps:$4 sm:$0xff]   ;;  %v5910_v40 = vld [vmem:[%s6590_s18 + $0xb0] ss:$12 sps:$4 sm:$0xff]  }
 0x2b7   : > { %5653 = vmatprep.subr.bf16.mxu1 %v5878_v44  ;;  %4176 = vmatprep.mubr.bf16.mxu0 %v7530_v12  ;;  %v7585_v41 = vpop.trf.xlu1  ;;  %v6443_v4 = vpop.eup %6442  ;;  %6464 = vpow2.f32 %v5162_v59  ;;  %v1696_v55 = vadd.f32 1.0, %v6441_v1  ;;  %v5908_v59 = vld [vmem:[%s6590_s18 + $0x170] ss:$12 sps:$4 sm:$0xff]   ;;  %v5932_v61 = vld [vmem:[%s6590_s18 + $0x228] ss:$12 sps:$4 sm:$0xff]  }
 0x2b8   : > { %v6445_v10 = vpop.eup %6444  ;;  %6466 = vrcp.f32 %v1712_v38  ;;  %v7610_v42 = vpop.trf.xlu0  ;;  %4197 = vmatprep.subr.bf16.mxu0 %v5916_v3  ;;  %v5164_v6 = vmul.f32 -1.442695, %v1262_v30  ;;  %v5925_v1 = vld [vmem:[%s6590_s18 + $0x1e4] ss:$12 sps:$4 sm:$0xff]   ;;  %v5928_v34 = vld [vmem:[%s6590_s18 + $0x1fc] ss:$12 sps:$4 sm:$0xff]  }
 0x2b9   : > { %5654 = vmatpush3.bf16.msra.mxu1 %v5880_v32  ;;  %v6447_v0 = vpop.eup %6446  ;;  %v1701_v54 = vadd.f32 1.0, %v6445_v10  ;;  %6468 = vrcp.f32 %v1717_v5  ;;  %v5914_v32 = vld [vmem:[%s6590_s18 + $0x198] ss:$12 sps:$4 sm:$0xff]  }
 0x2ba   : > { %2433 = vperm.xlu0 %5818, %v6429_v62   ;;  %2493 = vperm.xlu1 %5819, %v6431_v27   ;;  %v6449_v44 = vpop.eup %6448  ;;  %6470 = vpow2.f32 %v5146_v11  ;;  %v1150_v27 = vld [vmem:[%s6585_s14 + $0x2f8] sm:$0xff] }
 0x2bb   : > { %5655 = vmatprep.subr.bf16.mxu1 %v5883_v46  ;;  %v7605_v7 = vpop.trf.xlu1  ;;  %v6451_v26 = vpop.eup %6450  ;;  %6472 = vrcp.f32 %v1696_v55  ;;  %v1714_v62 = vadd.f32 1.0, %v6449_v44  ;;  %4198 = vmatpush1.bf16.msra.mxu0 %v5914_v32  ;;  %v1264_v31 = vadd.f32 %v1150_v27, %v8526_v58  ;;  %v5926_v55 = vld [vmem:[%s6590_s18 + $0x1f8] ss:$12 sps:$4 sm:$0xff]   ;;  %v5953_v58 = vld [vmem:[%s6590_s18 + $0x290] ss:$12 sps:$4 sm:$0xff]  }
 0x2bc   : > { %4380 = vmatmul.mubr.bf16.gmra.mrb[4].mxu1 %v7585_v41  ;;  %4177 = vmatmul.mubr.bf16.gmra.mrb[8].mxu0 %v7590_v53  ;;  %v6453_v47 = vpop.eup %6452  ;;  %6474 = vrcp.f32 %v1701_v54 }
 0x2bd   : > { %5656 = vmatpush3.bf16.msra.mxu1 %v5885_v2  ;;  %5358 = vmatprep.mubr.msk.bf16.mxu1 %vm4111_vm3, %v7552_v9  ;;  %v6455_v23 = vpop.eup %6454  ;;  %v1719_v43 = vadd.f32 1.0, %v6453_v47  ;;  %6476 = vpow2.f32 %v5164_v6  ;;  %v5929_v47 = vld [vmem:[%s6590_s18 + $0x210] ss:$12 sps:$4 sm:$0xff]   ;;  %v5939_v6 = vld [vmem:[%s6590_s18 + $0x188] ss:$12 sps:$4 sm:$0xff]  }
 0x2be   : > { %2523 = vperm.xlu0 %5818, %v6439_v25   ;;  %2413 = vperm.xlu1 %5819, %v6433_v48   ;;  %v6457_v46 = vpop.eup %6456  ;;  %v5922_v48 = vld [vmem:[%s6590_s18 + $0x1cc] ss:$12 sps:$4 sm:$0xff]   ;;  %6478 = vrcp.f32 %v1714_v62 }
 0x2bf   : > { %5657 = vmatprep.subr.bf16.mxu1 %v5888_v39  ;;  %4186 = vmatprep.mubr.bf16.mxu0 %v7542_v49  ;;  %v6459_v19 = vpop.eup %6458  ;;  %v7624_v28 = vpop.trf.xlu1  ;;  %v1698_v39 = vadd.f32 1.0, %v6457_v46  ;;  %6480 = vrcp.f32 %v1719_v43  ;;  %v5937_v46 = vld [vmem:[%s6590_s18 + $0x244] ss:$12 sps:$4 sm:$0xff]   ;;  %v5935_v43 = vld [vmem:[%s6590_s18 + $0x240] ss:$12 sps:$4 sm:$0xff]  }
 0x2c0   : > { %v6461_v2 = vpop.eup %6460  ;;  %4199 = vmatprep.subr.bf16.mxu0 %v5919_v15  ;;  %6482 = vpow2.f32 %v5148_v22  ;;  %v5949_v22 = vld [vmem:[%s6590_s18 + $0x1b8] ss:$12 sps:$4 sm:$0xff]  }
 0x2c1   : > { %5658 = vmatpush3.bf16.msra.mxu1 %v5890_v24  ;;  %v6463_v57 = vpop.eup %6462  ;;  %v1703_v18 = vadd.f32 1.0, %v6461_v2  ;;  %4200 = vmatpush1.bf16.msra.mxu0 %v5917_v56  ;;  %v5920_v24 = vld [vmem:[%s6590_s18 + $0x1c8] ss:$12 sps:$4 sm:$0xff]   ;;  %6484 = vrcp.f32 %v1698_v39 }
 0x2c2   : > { %2443 = vperm.xlu0 %5818, %v6447_v0   ;;  %2418 = vperm.xlu1 %5819, %v6443_v4   ;;  %v6465_v25 = vpop.eup %6464  ;;  %v8527_v4 = vld [vmem:[#allocation32_spill] sm:$0xff]  ;;  %v5923_v0 = vld [vmem:[%s6590_s18 + $0x1e0] ss:$12 sps:$4 sm:$0xff]   ;;  %v5942_v56 = vld [vmem:[%s6590_s18 + $0x25c] ss:$12 sps:$4 sm:$0xff]  }
 0x2c3   : > { %5659 = vmatprep.subr.bf16.mxu1 %v5893_v21  ;;  %v6467_v13 = vpop.eup %6466  ;;  %4201 = vmatprep.subr.bf16.mxu0 %v5922_v48  ;;  %v1248_v5 = vadd.f32 %v1134_v35, %v8527_v4  ;;  %v5166_v21 = vmul.f32 -1.442695, %v1264_v31  ;;  %6486 = vrcp.f32 %v1703_v18  ;;  %v1716_v10 = vadd.f32 1.0, %v6465_v25  ;;  %v5945_v31 = vld [vmem:[%s6590_s18 + $0x270] ss:$12 sps:$4 sm:$0xff]  }
 0x2c4   : > { %4390 = vmatmul.mubr.bf16.gmra.mrb[8].mxu1 %v7605_v7  ;;  %4187 = vmatmul.mubr.bf16.gmra.mrb[12].mxu0 %v7610_v42  ;;  %v6469_v38 = vpop.eup %6468  ;;  %v5954_v25 = vld [vmem:[%s6590_s18 + $0x1d0] ss:$12 sps:$4 sm:$0xff]   ;;  %v5952_v35 = vld [vmem:[%s6590_s18 + $0x28c] ss:$12 sps:$4 sm:$0xff]  }
 0x2c5   : > { %5660 = vmatpush3.bf16.msra.mxu1 %v5895_v36  ;;  %5359 = vmatprep.mubr.msk.bf16.mxu1 %vm4111_vm3, %v7562_v29  ;;  %v6471_v3 = vpop.eup %6470  ;;  %6488 = vpow2.f32 %v5166_v21  ;;  %v5963_v21 = vld [vmem:[%s6590_s18 + $0x2c0] ss:$12 sps:$4 sm:$0xff]  }
 0x2c6   : > { %2533 = vperm.xlu0 %5818, %v6455_v23   ;;  %2508 = vperm.xlu1 %5819, %v6451_v26   ;;  %v6473_v11 = vpop.eup %6472  ;;  %v1700_v44 = vadd.f32 1.0, %v6471_v3  ;;  %6490 = vrcp.f32 %v1716_v10  ;;  %v5931_v26 = vld [vmem:[%s6590_s18 + $0x214] ss:$12 sps:$4 sm:$0xff]   ;;  %v2016_v3 = vld [vmem:[%s6575_s8 + $0x188] sm:$0xff] }
 0x2c7   : > { %5661 = vmatprep.subr.bf16.mxu1 %v5898_v52  ;;  %4202 = vmatpush1.bf16.msra.mxu0 %v5920_v24  ;;  %v6475_v30 = vpop.eup %6474  ;;  %v5950_v24 = vld [vmem:[%s6590_s18 + $0x288] ss:$12 sps:$4 sm:$0xff]   ;;  %v5955_v10 = vld [vmem:[%s6590_s18 + $0x2a0] ss:$12 sps:$4 sm:$0xff]  }
 0x2c8   : > { %4203 = vmatprep.subr.bf16.mxu0 %v5925_v1  ;;  %v6477_v36 = vpop.eup %6476  ;;  %v5957_v1 = vld [vmem:[%s6590_s18 + $0x2a4] ss:$12 sps:$4 sm:$0xff]  }
 0x2c9   : > { %5662 = vmatpush3.bf16.msra.mxu1 %v5900_v50  ;;  %v6479_v60 = vpop.eup %6478  ;;  %v1718_v32 = vadd.f32 1.0, %v6477_v36 }
 0x2ca   : > { %2453 = vperm.xlu0 %5818, %v6463_v57   ;;  %2428 = vperm.xlu1 %5819, %v6459_v19   ;;  %v6481_v54 = vpop.eup %6480  ;;  %v5943_v19 = vld [vmem:[%s6590_s18 + $0x260] ss:$12 sps:$4 sm:$0xff]   ;;  %v5940_v57 = vld [vmem:[%s6590_s18 + $0x258] ss:$12 sps:$4 sm:$0xff]  }
 0x2cb   : > { %5663 = vmatprep.subr.bf16.mxu1 %v5903_v8  ;;  %4204 = vmatpush1.bf16.msra.mxu0 %v5923_v0  ;;  %v6483_v52 = vpop.eup %6482  ;;  %v5944_v8 = vld [vmem:[%s6590_s18 + $0x1a0] ss:$12 sps:$4 sm:$0xff]   ;;  %v5962_v0 = vld [vmem:[%s6590_s18 + $0x2bc] ss:$12 sps:$4 sm:$0xff]  }
 0x2cc   : > { %4400 = vmatmul.mubr.bf16.gmra.mrb[12].mxu1 %v7624_v28  ;;  %4205 = vmatprep.subr.bf16.mxu0 %v5928_v34  ;;  %v6485_v15 = vpop.eup %6484 }
 0x2cd   : > { %5664 = vmatpush3.bf16.msra.mxu1 %v5905_v20  ;;  %4440 = vmatprep.mubr.bf16.mxu1 %v7505_v33  ;;  %v5150_v33 = vmul.f32 -1.442695, %v1248_v5  ;;  %v6487_v23 = vpop.eup %6486  ;;  %v5947_v20 = vld [vmem:[%s6590_s18 + $0x274] ss:$12 sps:$4 sm:$0xff]  }
 0x2ce   : > { %2543 = vperm.xlu0 %5818, %v6469_v38   ;;  %2518 = vperm.xlu1 %5819, %v6467_v13   ;;  %v5959_v13 = vld [vmem:[%s6590_s18 + $0x1e8] ss:$12 sps:$4 sm:$0xff]   ;;  %v2015_v5 = vld [vmem:[%s6575_s8 + $0x180] sm:$0xff] }
 0x2cf   : > { %5665 = vmatprep.subr.bf16.mxu1 %v5908_v59  ;;  %6492 = vpow2.f32 %v5150_v33  ;;  %4206 = vmatpush1.bf16.msra.mxu0 %v5926_v55  ;;  %v6489_v50 = vpop.eup %6488  ;;  %v5968_v55 = vld [vmem:[%s6590_s18 + $0x2d8] ss:$12 sps:$4 sm:$0xff]  }
 0x2d0   : > { %6494 = vrcp.f32 %v1700_v44  ;;  %4207 = vmatprep.subr.bf16.mxu0 %v5931_v26  ;;  %v6491_v62 = vpop.eup %6490  ;;  %v1720_v27 = vadd.f32 1.0, %v6489_v50  ;;  %v2017_v44 = vld [vmem:[%s6575_s8 + $0x190] sm:$0xff]  ;;  %v5960_v26 = vld [vmem:[%s6590_s18 + $0x2b8] ss:$12 sps:$4 sm:$0xff]  }
 0x2d1   : > { %5666 = vmatpush3.bf16.msra.mxu1 %v5910_v40  ;;  %6496 = vrcp.f32 %v1718_v32  ;;  %v5974_v50 = vld [vmem:[%s6590_s18 + $0x230] ss:$12 sps:$4 sm:$0xff]  }
 0x2d2   : > { %2463 = vperm.xlu0 %5818, %v6475_v30   ;;  %2438 = vperm.xlu1 %5819, %v6473_v11  }
 0x2d3   : > { %4208 = vmatpush1.bf16.msra.mxu0 %v5929_v47  ;;  %5691 = vmatprep.subr.bf16.mxu1 %v5938_v63  ;;  %v2019_v63 = vld [vmem:[%s6575_s8 + $0x1a0] sm:$0xff] }
 0x2d4   : > { %4441 = vmatmul.mubr.bf16.vlgmr.msra.gmra.mrb[16].mxu1 %v7554_v45  ;;  %v5934_v45 = vld [vmem:[%s6590_s18 + $0x22c] ss:$12 sps:$4 sm:$0xff]  }
 0x2d5   : > { %4448 = vmatprep.mubr.bf16.mxu1 %v7522_v14  ;;  %v1702_v14 = vadd.f32 1.0, %v6483_v52  ;;  %4209 = vmatprep.subr.bf16.mxu0 %v5934_v45  ;;  %v5967_v52 = vld [vmem:[%s6590_s18 + $0x2d4] ss:$12 sps:$4 sm:$0xff]  }
 0x2d6   : > { %2553 = vperm.xlu0 %5818, %v6481_v54   ;;  %2528 = vperm.xlu1 %5819, %v6479_v60   ;;  %v2018_v60 = vld [vmem:[%s6575_s8 + $0x198] sm:$0xff] }
 0x2d7   : > { %5692 = vmatpush3.bf16.msra.mxu1 %v5939_v6  ;;  %6498 = vrcp.f32 %v1702_v14  ;;  %4210 = vmatpush1.bf16.msra.mxu0 %v5932_v61  ;;  %v5969_v54 = vld [vmem:[%s6590_s18 + $0x218] ss:$12 sps:$4 sm:$0xff]   ;;  %v5973_v14 = vld [vmem:[%s6590_s18 + $0x2f0] ss:$12 sps:$4 sm:$0xff]   ;;  %v2020_v61 = vld [vmem:[%s6575_s8 + $0x1a8] sm:$0xff] }
 0x2d8   : > { %4211 = vmatprep.subr.bf16.mxu0 %v5937_v46  ;;  %5693 = vmatprep.subr.bf16.mxu1 %v5943_v19  ;;  %6500 = vrcp.f32 %v1720_v27  ;;  %v5965_v6 = vld [vmem:[%s6590_s18 + $0x2d0] ss:$12 sps:$4 sm:$0xff]   ;;  %v5972_v46 = vld [vmem:[%s6590_s18 + $0x2ec] ss:$12 sps:$4 sm:$0xff]  }
 0x2da   : > { %2473 = vperm.xlu0 %5818, %v6487_v23   ;;  %2448 = vperm.xlu1 %5819, %v6485_v15  }
 0x2db   : > { %5694 = vmatpush3.bf16.msra.mxu1 %v5944_v8  ;;  %4212 = vmatpush1.bf16.msra.mxu0 %v5935_v43 }
 0x2dc   : > { %4449 = vmatmul.mubr.bf16.gmra.mrb[20].mxu1 %v7572_v37  ;;  %v6493_v37 = vpop.eup %6492  ;;  %4213 = vmatprep.subr.bf16.mxu0 %v5942_v56  ;;  %v5977_v56 = vld [vmem:[%s6590_s18 + $0x304] ss:$12 sps:$4 sm:$0xff]  }
 0x2dd   : > { %4456 = vmatprep.mubr.bf16.mxu1 %v7530_v12  ;;  %v6495_v2 = vpop.eup %6494  ;;  %v5948_v12 = vld [vmem:[%s6590_s18 + $0x278] ss:$12 sps:$4 sm:$0xff]   ;;  %v1704_v48 = vadd.f32 1.0, %v6493_v37  ;;  %v5970_v37 = vld [vmem:[%s6590_s18 + $0x2e8] ss:$12 sps:$4 sm:$0xff]  }
 0x2de   : > { %2538 = vperm.xlu1 %5819, %v6491_v62   ;;  %v6497_v39 = vpop.eup %6496  ;;  %5695 = vmatprep.subr.bf16.mxu1 %v5948_v12 }
 0x2df   : > { %5696 = vmatpush3.bf16.msra.mxu1 %v5949_v22  ;;  %6502 = vrcp.f32 %v1704_v48  ;;  %4214 = vmatpush1.bf16.msra.mxu0 %v5940_v57  ;;  %v2021_v57 = vld [vmem:[%s6575_s8 + $0x1b0] sm:$0xff]  ;;  %v2022_v22 = vld [vmem:[%s6575_s8 + $0x1b8] sm:$0xff] }
 0x2e0   : > { %4215 = vmatprep.subr.bf16.mxu0 %v5947_v20  ;;  %5697 = vmatprep.subr.bf16.mxu1 %v5953_v58 }
 0x2e2   : > { %2458 = vperm.xlu1 %5819, %v6495_v2  }
 0x2e3   : > { %5698 = vmatpush3.bf16.msra.mxu1 %v5954_v25  ;;  %4216 = vmatpush1.bf16.msra.mxu0 %v5945_v31 }
 0x2e4   : > { %4457 = vmatmul.mubr.bf16.gmra.mrb[24].mxu1 %v7590_v53  ;;  %v6499_v53 = vpop.eup %6498  ;;  %4217 = vmatprep.subr.bf16.mxu0 %v5952_v35 }
 0x2e5   : > { %4464 = vmatprep.mubr.bf16.mxu1 %v7542_v49  ;;  %v5958_v49 = vld [vmem:[%s6590_s18 + $0x2a8] ss:$12 sps:$4 sm:$0xff]   ;;  %v6501_v38 = vpop.eup %6500 }
 0x2e6   : > { %2548 = vperm.xlu1 %5819, %v6497_v39   ;;  %5699 = vmatprep.subr.bf16.mxu1 %v5958_v49 }
 0x2e7   : > { %5700 = vmatpush3.bf16.msra.mxu1 %v5959_v13  ;;  %4218 = vmatpush1.bf16.msra.mxu0 %v5950_v24 }
 0x2e8   : > { %4219 = vmatprep.subr.bf16.mxu0 %v5957_v1  ;;  %5701 = vmatprep.subr.bf16.mxu1 %v5963_v21 }
 0x2e9   : > { %v2324_v18 = vpop.permute.xlu1 %2323  ;;  %v2329_v59 = vpop.permute.xlu0 %2328 }
 0x2ea   : > { %2468 = vperm.xlu1 %5819, %v6499_v53   ;;  %v6503_v11 = vpop.eup %6502  ;;  %v2699_v33 = vmul.f32 %v2324_v18, %v2015_v5  ;;  %v2700_v36 = vmul.f32 %v2329_v59, %v2016_v3  ;;  %v2023_v18 = vld [vmem:[%s6575_s8 + $0x1c0] sm:$0xff]  ;;  %v2024_v59 = vld [vmem:[%s6575_s8 + $0x1c8] sm:$0xff] }
 0x2eb   : > { %4220 = vmatpush1.bf16.msra.mxu0 %v5955_v10  ;;  %v2000_v5 = vld [vmem:[%s6575_s8 + $0x108] sm:$0xff] }
 0x2ec   : > { %4465 = vmatmul.mubr.bf16.gmra.mrb[28].mxu1 %v7610_v42  ;;  %v5964_v42 = vld [vmem:[%s6590_s18 + $0x200] ss:$12 sps:$4 sm:$0xff]   ;;  %4221 = vmatprep.subr.bf16.mxu0 %v5962_v0  ;;  %v2789_v15 = vpack.c.bf16 %v2700_v36, %v2699_v33  ;;  %v2002_v33 = vld [vmem:[%s6575_s8 + $0x118] sm:$0xff] }
 0x2ed   : > { %v7669_v40 = vpop.permute.xlu1 %2243  ;;  %v7671_v4 = vpop.permute.xlu0 %2248  ;;  %5702 = vmatpush3.bf16.msra.mxu1 %v5964_v42 }
 0x2ee   : > { %2558 = vperm.xlu1 %5819, %v6501_v38   ;;  %5703 = vmatprep.subr.bf16.mxu1 %v5968_v55  ;;  %v1999_v38 = vld [vmem:[%s6575_s8 + $0x100] sm:$0xff]  ;;  %v2684_v0 = vmul.f32 %v7671_v4, %v2000_v5 }
 0x2ef   : > { %4222 = vmatpush1.bf16.msra.mxu0 %v5960_v26  ;;  %v2683_v42 = vmul.f32 %v7669_v40, %v1999_v38  ;;  %v2003_v40 = vld [vmem:[%s6575_s8 + $0x120] sm:$0xff] }
 0x2f0   : > { %4223 = vmatprep.subr.bf16.mxu0 %v5967_v52  ;;  %v2011_v5 = vld [vmem:[%s6575_s8 + $0x160] sm:$0xff] }
 0x2f1   : > { %v2334_v34 = vpop.permute.xlu1 %2333  ;;  %v2339_v30 = vpop.permute.xlu0 %2338  ;;  %5704 = vmatpush3.bf16.msra.mxu1 %v5969_v54  ;;  %v2781_v26 = vpack.c.bf16 %v2684_v0, %v2683_v42 }
 0x2f2   : > { %2478 = vperm.xlu1 %5819, %v6503_v11   ;;  %v2701_v45 = vmul.f32 %v2334_v34, %v2017_v44  ;;  %v2702_v23 = vmul.f32 %v2339_v30, %v2018_v60  ;;  %5705 = vmatprep.subr.bf16.mxu1 %v5973_v14  ;;  %v2025_v11 = vld [vmem:[%s6575_s8 + $0x1d0] sm:$0xff]  ;;  %v2026_v34 = vld [vmem:[%s6575_s8 + $0x1d8] sm:$0xff] }
 0x2f3   : > { %4224 = vmatpush1.bf16.msra.mxu0 %v5965_v6  ;;  %v2001_v30 = vld [vmem:[%s6575_s8 + $0x110] sm:$0xff]  ;;  %v2027_v6 = vld [vmem:[%s6575_s8 + $0x1e0] sm:$0xff] }
 0x2f4   : > { %v2790_v27 = vpack.c.bf16 %v2702_v23, %v2701_v45  ;;  %4225 = vmatprep.subr.bf16.mxu0 %v5972_v46  ;;  %v2005_v46 = vld [vmem:[%s6575_s8 + $0x130] sm:$0xff] }
 0x2f5   : > { %v7685_v32 = vpop.permute.xlu1 %2253  ;;  %v7687_v47 = vpop.permute.xlu0 %2258  ;;  %5706 = vmatpush3.bf16.msra.mxu1 %v5974_v50  ;;  %v2028_v50 = vld [vmem:[%s6575_s8 + $0x1e8] sm:$0xff] }
 0x2f6   : > { %v2685_v54 = vmul.f32 %v7685_v32, %v2001_v30  ;;  %v2686_v52 = vmul.f32 %v7687_v47, %v2002_v33  ;;  %v2013_v30 = vld [vmem:[%s6575_s8 + $0x170] sm:$0xff]  ;;  %v2014_v33 = vld [vmem:[%s6575_s8 + $0x178] sm:$0xff] }
 0x2f7   : > { %4226 = vmatpush1.bf16.msra.mxu0 %v5970_v37 }
 0x2f8   : > { %3119 = vxpose.xlu0.c.b16.start [1/8] (narrow) %v2789_v15, 64  ;;  %4266 = vmatprep.subr.bf16.mxu0 %v5977_v56  ;;  %v2004_v15 = vld [vmem:[%s6575_s8 + $0x128] sm:$0xff] }
 0x2f9   : > { %v2344_v62 = vpop.permute.xlu1 %2343  ;;  %v2349_v19 = vpop.permute.xlu0 %2348 }
 0x2fa   : > { %v2703_v43 = vmul.f32 %v2344_v62, %v2019_v63  ;;  %v2704_v8 = vmul.f32 %v2349_v19, %v2020_v61  ;;  %v2782_v63 = vpack.c.bf16 %v2686_v52, %v2685_v54  ;;  %v2006_v62 = vld [vmem:[%s6575_s8 + $0x138] sm:$0xff]  ;;  %v5999_v19 = vld [vmem:[%s6590_s18 + $0x3c8] ss:$12 sps:$4 sm:$0xff]   ;;  %v2047_v54 = vld [vmem:[%s6575_s8 + $0x280] sm:$0xff] }
 0x2fb   : > { %5731 = vmatprep.subr.bf16.mxu1 %v5999_v19  ;;  %v2048_v52 = vld [vmem:[%s6575_s8 + $0x288] sm:$0xff]  ;;  %v2050_v19 = vld [vmem:[%s6575_s8 + $0x298] sm:$0xff] }
 0x2fc   : > { %3120 = vxpose.xlu0.c.b16.cont [2/8] (narrow) %v2790_v27, 64  ;;  %v2791_v48 = vpack.c.bf16 %v2704_v8, %v2703_v43 }
 0x2fd   : > { %v2264_v2 = vpop.permute.xlu1 %2263  ;;  %v2269_v12 = vpop.permute.xlu0 %2268 }
 0x2fe   : > { %v2687_v14 = vmul.f32 %v2264_v2, %v2003_v40  ;;  %v2688_v61 = vmul.f32 %v2269_v12, %v2004_v15  ;;  %v2007_v2 = vld [vmem:[%s6575_s8 + $0x140] sm:$0xff]  ;;  %v2008_v12 = vld [vmem:[%s6575_s8 + $0x148] sm:$0xff] }
 0x300   : > { %3121 = vxpose.xlu0.c.b16.cont [3/8] (narrow) %v2791_v48, 64  ;;  %v2783_v8 = vpack.c.bf16 %v2688_v61, %v2687_v14 }
 0x301   : > { %v2354_v20 = vpop.permute.xlu1 %2353  ;;  %v2359_v39 = vpop.permute.xlu0 %2358 }
 0x302   : > { %v2705_v58 = vmul.f32 %v2354_v20, %v2021_v57  ;;  %v2706_v31 = vmul.f32 %v2359_v39, %v2022_v22 }
 0x304   : > { %v2792_v25 = vpack.c.bf16 %v2706_v31, %v2705_v58  ;;  %v2029_v31 = vld [vmem:[%s6575_s8 + $0x1f0] sm:$0xff] }
 0x305   : > { %v2274_v35 = vpop.permute.xlu1 %2273  ;;  %v2279_v53 = vpop.permute.xlu0 %2278 }
 0x306   : > { %3122 = vxpose.xlu0.c.b16.cont [4/8] (narrow) %v2792_v25, 64  ;;  %v2689_v37 = vmul.f32 %v2274_v35, %v2005_v46  ;;  %v2690_v56 = vmul.f32 %v2279_v53, %v2006_v62  ;;  %v2030_v25 = vld [vmem:[%s6575_s8 + $0x1f8] sm:$0xff] }
 0x308   : > { %v2784_v20 = vpack.c.bf16 %v2690_v56, %v2689_v37 }
 0x309   : > { %v2364_v49 = vpop.permute.xlu1 %2363  ;;  %v2369_v24 = vpop.permute.xlu0 %2368 }
 0x30a   : > { %v2707_v13 = vmul.f32 %v2364_v49, %v2023_v18  ;;  %v2708_v1 = vmul.f32 %v2369_v24, %v2024_v59  ;;  %v2009_v18 = vld [vmem:[%s6575_s8 + $0x150] sm:$0xff]  ;;  %v2010_v59 = vld [vmem:[%s6575_s8 + $0x158] sm:$0xff] }
 0x30c   : > { %v2793_v21 = vpack.c.bf16 %v2708_v1, %v2707_v13 }
 0x30d   : > { %v2284_v3 = vpop.permute.xlu1 %2283  ;;  %v2289_v10 = vpop.permute.xlu0 %2288 }
 0x30e   : > { %3123 = vxpose.xlu0.c.b16.cont [5/8] (narrow) %v2793_v21, 64  ;;  %v2691_v39 = vmul.f32 %v2284_v3, %v2007_v2  ;;  %v2692_v58 = vmul.f32 %v2289_v10, %v2008_v12  ;;  %v2012_v21 = vld [vmem:[%s6575_s8 + $0x168] sm:$0xff] }
 0x310   : > { %v2785_v13 = vpack.c.bf16 %v2692_v58, %v2691_v39 }
 0x311   : > { %v2374_v36 = vpop.permute.xlu1 %2373  ;;  %v2379_v44 = vpop.permute.xlu0 %2378 }
 0x312   : > { %v2709_v55 = vmul.f32 %v2374_v36, %v2025_v11  ;;  %v2710_v60 = vmul.f32 %v2379_v44, %v2026_v34 }
 0x314   : > { %v2794_v4 = vpack.c.bf16 %v2710_v60, %v2709_v55 }
 0x315   : > { %v2294_v45 = vpop.permute.xlu1 %2293  ;;  %3103 = vxpose.xlu1.c.b16.start [1/8] (narrow) %v2781_v26, 64  ;;  %v2299_v23 = vpop.permute.xlu0 %2298 }
 0x316   : > { %3124 = vxpose.xlu0.c.b16.cont [6/8] (narrow) %v2794_v4, 64  ;;  %v2693_v1 = vmul.f32 %v2294_v45, %v2009_v18  ;;  %v2694_v38 = vmul.f32 %v2299_v23, %v2010_v59  ;;  %v2052_v18 = vld [vmem:[%s6575_s8 + $0x2a8] sm:$0xff] }
 0x318   : > { %v2786_v0 = vpack.c.bf16 %v2694_v38, %v2693_v1 }
 0x319   : > { %v2384_v32 = vpop.permute.xlu1 %2383  ;;  %3104 = vxpose.xlu1.c.b16.cont [2/8] (narrow) %v2782_v63, 64  ;;  %v2389_v47 = vpop.permute.xlu0 %2388 }
 0x31a   : > { %v2711_v27 = vmul.f32 %v2384_v32, %v2027_v6  ;;  %v2712_v43 = vmul.f32 %v2389_v47, %v2028_v50  ;;  %v2031_v6 = vld [vmem:[%s6575_s8 + $0x200] sm:$0xff]  ;;  %v2032_v50 = vld [vmem:[%s6575_s8 + $0x208] sm:$0xff] }
 0x31c   : > { %v2795_v48 = vpack.c.bf16 %v2712_v43, %v2711_v27  ;;  %v2049_v27 = vld [vmem:[%s6575_s8 + $0x290] sm:$0xff] }
 0x31d   : > { %v2304_v57 = vpop.permute.xlu1 %2303  ;;  %3105 = vxpose.xlu1.c.b16.cont [3/8] (narrow) %v2783_v8, 64  ;;  %v2309_v22 = vpop.permute.xlu0 %2308 }
 0x31e   : > { %3125 = vxpose.xlu0.c.b16.cont [7/8] (narrow) %v2795_v48, 64  ;;  %v2695_v11 = vmul.f32 %v2304_v57, %v2011_v5  ;;  %v2696_v34 = vmul.f32 %v2309_v22, %v2012_v21  ;;  %v2033_v57 = vld [vmem:[%s6575_s8 + $0x210] sm:$0xff]  ;;  %v2034_v22 = vld [vmem:[%s6575_s8 + $0x218] sm:$0xff] }
 0x320   : > { %v2787_v55 = vpack.c.bf16 %v2696_v34, %v2695_v11 }
 0x321   : > { %v2394_v35 = vpop.permute.xlu1 %2393  ;;  %3106 = vxpose.xlu1.c.b16.cont [4/8] (narrow) %v2784_v20, 64  ;;  %v2399_v53 = vpop.permute.xlu0 %2398 }
 0x322   : > { %v2713_v49 = vmul.f32 %v2394_v35, %v2029_v31  ;;  %v2714_v24 = vmul.f32 %v2399_v53, %v2030_v25  ;;  %v2051_v25 = vld [vmem:[%s6575_s8 + $0x2a0] sm:$0xff] }
 0x324   : > { %v2796_v42 = vpack.c.bf16 %v2714_v24, %v2713_v49  ;;  %v2035_v24 = vld [vmem:[%s6575_s8 + $0x220] sm:$0xff] }
 0x325   : > { %v2314_v3 = vpop.permute.xlu1 %2313  ;;  %3107 = vxpose.xlu1.c.b16.cont [5/8] (narrow) %v2785_v13, 64  ;;  %v2319_v10 = vpop.permute.xlu0 %2318  ;;  %v2036_v13 = vld [vmem:[%s6575_s8 + $0x228] sm:$0xff] }
 0x326   : > { %3126 = vxpose.xlu0.c.b16.end [8/8] (narrow) %v2796_v42, 64  ;;  %v2697_v60 = vmul.f32 %v2314_v3, %v2013_v30  ;;  %v2698_v26 = vmul.f32 %v2319_v10, %v2014_v33  ;;  %v2053_v3 = vld [vmem:[%s6575_s8 + $0x2b0] sm:$0xff]  ;;  %v2054_v10 = vld [vmem:[%s6575_s8 + $0x2b8] sm:$0xff] }
 0x328   : > { %v2788_v23 = vpack.c.bf16 %v2698_v26, %v2697_v60 }
 0x329   : > { %v2484_v36 = vpop.permute.xlu1 %2483  ;;  %3108 = vxpose.xlu1.c.b16.cont [6/8] (narrow) %v2786_v0, 64  ;;  %v2499_v44 = vpop.permute.xlu0 %2498 }
 0x32a   : > { %v2731_v4 = vmul.f32 %v2484_v36, %v2047_v54  ;;  %v2734_v37 = vmul.f32 %v2499_v44, %v2050_v19  ;;  %v2037_v36 = vld [vmem:[%s6575_s8 + $0x230] sm:$0xff]  ;;  %v2038_v44 = vld [vmem:[%s6575_s8 + $0x238] sm:$0xff] }
 0x32b   : > { %v2058_v19 = vld [vmem:[%s6575_s8 + $0x2d8] sm:$0xff] }
 0x32d   : > { %v2489_v40 = vpop.permute.xlu1 %2488  ;;  %3109 = vxpose.xlu1.c.b16.cont [7/8] (narrow) %v2787_v55, 64  ;;  %v2504_v15 = vpop.permute.xlu0 %2503 }
 0x32e   : > { %v2732_v45 = vmul.f32 %v2489_v40, %v2048_v52  ;;  %v2735_v53 = vmul.f32 %v2504_v15, %v2051_v25  ;;  %v2055_v52 = vld [vmem:[%s6575_s8 + $0x2c0] sm:$0xff]  ;;  %v2056_v40 = vld [vmem:[%s6575_s8 + $0x2c8] sm:$0xff] }
 0x330   : > { %v2805_v63 = vpack.c.bf16 %v2732_v45, %v2731_v4 }
 0x331   : > { %v2404_v14 = vpop.permute.xlu1 %2403  ;;  %3110 = vxpose.xlu1.c.b16.end [8/8] (narrow) %v2788_v23, 64  ;;  %v2424_v61 = vpop.permute.xlu0 %2423 }
 0x332   : > { %3151 = vxpose.xlu0.c.b16.start [1/8] (narrow) %v2805_v63, 64  ;;  %v2715_v62 = vmul.f32 %v2404_v14, %v2031_v6  ;;  %v2719_v21 = vmul.f32 %v2424_v61, %v2035_v24  ;;  %v2039_v14 = vld [vmem:[%s6575_s8 + $0x240] sm:$0xff]  ;;  %v2040_v61 = vld [vmem:[%s6575_s8 + $0x248] sm:$0xff] }
 0x335   : > { %v2409_v46 = vpop.permute.xlu1 %2408  ;;  %v2514_v47 = vpop.permute.xlu0 %2513 }
 0x336   : > { %v2716_v32 = vmul.f32 %v2409_v46, %v2032_v50  ;;  %v2737_v34 = vmul.f32 %v2514_v47, %v2053_v3  ;;  %v2057_v47 = vld [vmem:[%s6575_s8 + $0x2d0] sm:$0xff] }
 0x338   : > { %v2797_v43 = vpack.c.bf16 %v2716_v32, %v2715_v62 }
 0x339   : > { %v2494_v8 = vpop.permute.xlu1 %2493  ;;  %v2434_v12 = vpop.permute.xlu0 %2433 }
 0x33a   : > { %v2733_v56 = vmul.f32 %v2494_v8, %v2049_v27  ;;  %3135 = vxpose.xlu1.c.b16.start [1/8] (narrow) %v2797_v43, 64  ;;  %v2721_v26 = vmul.f32 %v2434_v12, %v2037_v36 }
 0x33c   : > { %v2806_v2 = vpack.c.bf16 %v2734_v37, %v2733_v56  ;;  %v2041_v56 = vld [vmem:[%s6575_s8 + $0x250] sm:$0xff] }
 0x33d   : > { %v2414_v48 = vpop.permute.xlu1 %2413  ;;  %v2524_v58 = vpop.permute.xlu0 %2523 }
 0x33e   : > { %3152 = vxpose.xlu0.c.b16.cont [2/8] (narrow) %v2806_v2, 64  ;;  %v2717_v39 = vmul.f32 %v2414_v48, %v2033_v57  ;;  %v2739_v23 = vmul.f32 %v2524_v58, %v2055_v52  ;;  %v2042_v2 = vld [vmem:[%s6575_s8 + $0x258] sm:$0xff]  ;;  %v2060_v58 = vld [vmem:[%s6575_s8 + $0x2e8] sm:$0xff] }
 0x341   : > { %v2419_v20 = vpop.permute.xlu1 %2418  ;;  %v2444_v1 = vpop.permute.xlu0 %2443 }
 0x342   : > { %v2718_v31 = vmul.f32 %v2419_v20, %v2034_v22  ;;  %v2723_v46 = vmul.f32 %v2444_v1, %v2039_v14  ;;  %v6008_v14 = vld [vmem:[%s6590_s18 + $0x320] ss:$12 sps:$4 sm:$0xff]  }
 0x344   : > { %v2798_v59 = vpack.c.bf16 %v2718_v31, %v2717_v39  ;;  %v2059_v39 = vld [vmem:[%s6575_s8 + $0x2e0] sm:$0xff] }
 0x345   : > { %v2509_v35 = vpop.permute.xlu1 %2508  ;;  %v2534_v30 = vpop.permute.xlu0 %2533 }
 0x346   : > { %v2736_v49 = vmul.f32 %v2509_v35, %v2052_v18  ;;  %3136 = vxpose.xlu1.c.b16.cont [2/8] (narrow) %v2798_v59, 64  ;;  %v2741_v8 = vmul.f32 %v2534_v30, %v2057_v47  ;;  %v2046_v30 = vld [vmem:[%s6575_s8 + $0x278] sm:$0xff]  ;;  %v5984_v47 = vld [vmem:[%s6590_s18 + $0x348] ss:$12 sps:$4 sm:$0xff]  }
 0x348   : > { %v2807_v38 = vpack.c.bf16 %v2736_v49, %v2735_v53  ;;  %v2043_v53 = vld [vmem:[%s6575_s8 + $0x260] sm:$0xff]  ;;  %v2044_v49 = vld [vmem:[%s6575_s8 + $0x268] sm:$0xff] }
 0x349   : > { %v2429_v5 = vpop.permute.xlu1 %2428  ;;  %v2454_v15 = vpop.permute.xlu0 %2453 }
 0x34a   : > { %v2720_v42 = vmul.f32 %v2429_v5, %v2036_v13  ;;  %3153 = vxpose.xlu0.c.b16.cont [3/8] (narrow) %v2807_v38, 64  ;;  %v2725_v22 = vmul.f32 %v2454_v15, %v2041_v56  ;;  %v2061_v5 = vld [vmem:[%s6575_s8 + $0x2f0] sm:$0xff]  ;;  %v5987_v56 = vld [vmem:[%s6590_s18 + $0x360] ss:$12 sps:$4 sm:$0xff]  }
 0x34c   : > { %v2799_v0 = vpack.c.bf16 %v2720_v42, %v2719_v21  ;;  %v2062_v21 = vld [vmem:[%s6575_s8 + $0x2f8] sm:$0xff] }
 0x34d   : > { %v2519_v11 = vpop.permute.xlu1 %2518  ;;  %v2544_v62 = vpop.permute.xlu0 %2543 }
 0x34e   : > { %v2738_v33 = vmul.f32 %v2519_v11, %v2054_v10  ;;  %3137 = vxpose.xlu1.c.b16.cont [3/8] (narrow) %v2799_v0, 64  ;;  %v2743_v18 = vmul.f32 %v2544_v62, %v2059_v39  ;;  %v6009_v62 = vld [vmem:[%s6590_s18 + $0x3f8] ss:$12 sps:$4 sm:$0xff]  }
 0x34f   : > { %v5990_v39 = vld [vmem:[%s6590_s18 + $0x378] ss:$12 sps:$4 sm:$0xff]  }
 0x350   : > { %v2808_v55 = vpack.c.bf16 %v2738_v33, %v2737_v34  ;;  %v2045_v34 = vld [vmem:[%s6575_s8 + $0x270] sm:$0xff] }
 0x351   : > { %v2439_v60 = vpop.permute.xlu1 %2438  ;;  %v2464_v12 = vpop.permute.xlu0 %2463 }
 0x352   : > { %v2722_v54 = vmul.f32 %v2439_v60, %v2038_v44  ;;  %3154 = vxpose.xlu0.c.b16.cont [4/8] (narrow) %v2808_v55, 64  ;;  %v2727_v1 = vmul.f32 %v2464_v12, %v2043_v53 }
 0x354   : > { %v2800_v4 = vpack.c.bf16 %v2722_v54, %v2721_v26  ;;  %v5975_v54 = vld [vmem:[%s6590_s18 + $0x300] ss:$12 sps:$4 sm:$0xff]  }
 0x355   : > { %v2529_v45 = vpop.permute.xlu1 %2528  ;;  %v2554_v59 = vpop.permute.xlu0 %2553 }
 0x356   : > { %v2740_v63 = vmul.f32 %v2529_v45, %v2056_v40  ;;  %3138 = vxpose.xlu1.c.b16.cont [4/8] (narrow) %v2800_v4, 64  ;;  %v2745_v0 = vmul.f32 %v2554_v59, %v2061_v5  ;;  %v5980_v40 = vld [vmem:[%s6590_s18 + $0x31c] ss:$12 sps:$4 sm:$0xff]   ;;  %v6004_v45 = vld [vmem:[%s6590_s18 + $0x3e0] ss:$12 sps:$4 sm:$0xff]  }
 0x357   : > { %v6003_v4 = vld [vmem:[%s6590_s18 + $0x308] ss:$12 sps:$4 sm:$0xff]  }
 0x358   : > { %v2809_v6 = vpack.c.bf16 %v2740_v63, %v2739_v23  ;;  %v5978_v23 = vld [vmem:[%s6590_s18 + $0x318] ss:$12 sps:$4 sm:$0xff]   ;;  %v5983_v63 = vld [vmem:[%s6590_s18 + $0x334] ss:$12 sps:$4 sm:$0xff]  }
 0x359   : > { %v2449_v50 = vpop.permute.xlu1 %2448  ;;  %v2474_v42 = vpop.permute.xlu0 %2473  ;;  %v5996_v5 = vld [vmem:[%s6590_s18 + $0x3a8] ss:$12 sps:$4 sm:$0xff]  }
 0x35a   : > { %v2724_v32 = vmul.f32 %v2449_v50, %v2040_v61  ;;  %3155 = vxpose.xlu0.c.b16.cont [5/8] (narrow) %v2809_v6, 64  ;;  %v2729_v55 = vmul.f32 %v2474_v42, %v2045_v34  ;;  %v5981_v6 = vld [vmem:[%s6590_s18 + $0x330] ss:$12 sps:$4 sm:$0xff]  }
 0x35c   : > { %v2801_v27 = vpack.c.bf16 %v2724_v32, %v2723_v46  ;;  %v5986_v46 = vld [vmem:[%s6590_s18 + $0x34c] ss:$12 sps:$4 sm:$0xff]  }
 0x35d   : > { %v2539_v43 = vpop.permute.xlu1 %2538  ;;  %v6013_v32 = vld [vmem:[%s6590_s18 + $0x338] ss:$12 sps:$4 sm:$0xff]  }
 0x35e   : > { %v2742_v37 = vmul.f32 %v2539_v43, %v2058_v19  ;;  %3139 = vxpose.xlu1.c.b16.cont [5/8] (narrow) %v2801_v27, 64  ;;  %v6014_v19 = vld [vmem:[%s6590_s18 + $0x410] ss:$12 sps:$4 sm:$0xff]  }
 0x35f   : > { %v5989_v27 = vld [vmem:[%s6590_s18 + $0x364] ss:$12 sps:$4 sm:$0xff]  }
 0x360   : > { %v2810_v48 = vpack.c.bf16 %v2742_v37, %v2741_v8 }
 0x361   : > { %v2459_v57 = vpop.permute.xlu1 %2458 }
 0x362   : > { %v2726_v20 = vmul.f32 %v2459_v57, %v2042_v2  ;;  %3156 = vxpose.xlu0.c.b16.cont [6/8] (narrow) %v2810_v48, 64  ;;  %v5992_v48 = vld [vmem:[%s6590_s18 + $0x37c] ss:$12 sps:$4 sm:$0xff]  }
 0x364   : > { %v2802_v31 = vpack.c.bf16 %v2726_v20, %v2725_v22  ;;  %v6018_v22 = vld [vmem:[%s6590_s18 + $0x350] ss:$12 sps:$4 sm:$0xff]   ;;  %v6019_v20 = vld [vmem:[%s6590_s18 + $0x428] ss:$12 sps:$4 sm:$0xff]  }
 0x365   : > { %v2549_v25 = vpop.permute.xlu1 %2548 }
 0x366   : > { %v2744_v35 = vmul.f32 %v2549_v25, %v2060_v58  ;;  %3140 = vxpose.xlu1.c.b16.cont [6/8] (narrow) %v2802_v31, 64  ;;  %v5995_v58 = vld [vmem:[%s6590_s18 + $0x394] ss:$12 sps:$4 sm:$0xff]  }
 0x367   : > { %v6023_v25 = vld [vmem:[%s6590_s18 + $0x368] ss:$12 sps:$4 sm:$0xff]  }
 0x368   : > { %v2811_v24 = vpack.c.bf16 %v2744_v35, %v2743_v18  ;;  %v5993_v35 = vld [vmem:[%s6590_s18 + $0x390] ss:$12 sps:$4 sm:$0xff]  }
 0x369   : > { %v2469_v13 = vpop.permute.xlu1 %2468 }
 0x36a   : > { %v2728_v38 = vmul.f32 %v2469_v13, %v2044_v49  ;;  %3157 = vxpose.xlu0.c.b16.cont [7/8] (narrow) %v2811_v24, 64  ;;  %v6024_v49 = vld [vmem:[%s6590_s18 + $0x440] ss:$12 sps:$4 sm:$0xff]  }
 0x36b   : > { %v5998_v24 = vld [vmem:[%s6590_s18 + $0x3ac] ss:$12 sps:$4 sm:$0xff]  }
 0x36c   : > { %v2803_v3 = vpack.c.bf16 %v2728_v38, %v2727_v1  ;;  %v6028_v1 = vld [vmem:[%s6590_s18 + $0x380] ss:$12 sps:$4 sm:$0xff]   ;;  %v6029_v38 = vld [vmem:[%s6590_s18 + $0x458] ss:$12 sps:$4 sm:$0xff]  }
 0x36d   : > { %v2559_v10 = vpop.permute.xlu1 %2558 }
 0x36e   : > { %v2746_v11 = vmul.f32 %v2559_v10, %v2062_v21  ;;  %3141 = vxpose.xlu1.c.b16.cont [7/8] (narrow) %v2803_v3, 64  ;;  %v6002_v21 = vld [vmem:[%s6590_s18 + $0x3c4] ss:$12 sps:$4 sm:$0xff]  }
 0x36f   : > { %v6033_v3 = vld [vmem:[%s6590_s18 + $0x398] ss:$12 sps:$4 sm:$0xff]  }
 0x370   : > { %v2812_v33 = vpack.c.bf16 %v2746_v11, %v2745_v0  ;;  %v3127_v36 = vpop.trf.xlu0  ;;  %v6034_v11 = vld [vmem:[%s6590_s18 + $0x470] ss:$12 sps:$4 sm:$0xff]  }
 0x371   : > { %v2479_v44 = vpop.permute.xlu1 %2478  ;;  %4227 = vmatprep.mubr.bf16.mxu0 %v3127_v36  ;;  %4504 = vmatprep.mubr.bf16.mxu1 %v3127_v36 }
 0x372   : > { %v2730_v60 = vmul.f32 %v2479_v44, %v2046_v30  ;;  %3158 = vxpose.xlu0.c.b16.end [8/8] (narrow) %v2812_v33, 64  ;;  %v6000_v30 = vld [vmem:[%s6590_s18 + $0x3c0] ss:$12 sps:$4 sm:$0xff]   ;;  %v6007_v44 = vld [vmem:[%s6590_s18 + $0x3dc] ss:$12 sps:$4 sm:$0xff]  }
 0x374   : > { %v2804_v26 = vpack.c.bf16 %v2730_v60, %v2729_v55  ;;  %v3128_v52 = vpop.trf.xlu0 }
 0x376   : > { %3142 = vxpose.xlu1.c.b16.end [8/8] (narrow) %v2804_v26, 64  ;;  %v6038_v26 = vld [vmem:[%s6590_s18 + $0x3b0] ss:$12 sps:$4 sm:$0xff]  }
 0x378   : > { %v3129_v50 = vpop.trf.xlu0 }
 0x37b   : > { %v3111_v15 = vpop.trf.xlu1 }
 0x37c   : > { %4228 = vmatmul.mubr.bf16.vlgmr.msra.gmra.mrb[0].mxu0 %v3111_v15  ;;  %4505 = vmatmul.mubr.bf16.vlgmr.msra.gmra.mrb[32].mxu1 %v3111_v15  ;;  %v3130_v12 = vpop.trf.xlu0 }
 0x37d   : > { %4267 = vmatpush1.bf16.msra.mxu0 %v5975_v54  ;;  %4237 = vmatprep.mubr.bf16.mxu0 %v3128_v52  ;;  %v6005_v54 = vld [vmem:[%s6590_s18 + $0x3d8] ss:$12 sps:$4 sm:$0xff]  }
 0x37e   : > { %4512 = vmatprep.mubr.bf16.mxu1 %v3128_v52  ;;  %4268 = vmatprep.subr.bf16.mxu0 %v5980_v40  ;;  %v6012_v52 = vld [vmem:[%s6590_s18 + $0x3f4] ss:$12 sps:$4 sm:$0xff]  }
 0x37f   : > { %5732 = vmatpush3.bf16.msra.mxu1 %v6003_v4  ;;  %v3112_v61 = vpop.trf.xlu1  ;;  %v8528_v4 = vmov 0  }
 0x380   : > { %5733 = vmatprep.subr.bf16.mxu1 %v6004_v45  ;;  %v6010_v45 = vld [vmem:[%s6590_s18 + $0x3f0] ss:$12 sps:$4 sm:$0xff]  }
 0x381   : > { %4269 = vmatpush1.bf16.msra.mxu0 %v5978_v23 }
 0x382   : > { %4270 = vmatprep.subr.bf16.mxu0 %v5983_v63  ;;  %v6017_v63 = vld [vmem:[%s6590_s18 + $0x40c] ss:$12 sps:$4 sm:$0xff]  }
 0x383   : > { %5734 = vmatpush3.bf16.msra.mxu1 %v6008_v14  ;;  %v3113_v37 = vpop.trf.xlu1 }
 0x384   : > { %4238 = vmatmul.mubr.bf16.gmra.mrb[4].mxu0 %v3112_v61  ;;  %4513 = vmatmul.mubr.bf16.gmra.mrb[36].mxu1 %v3112_v61  ;;  %v6015_v61 = vld [vmem:[%s6590_s18 + $0x408] ss:$12 sps:$4 sm:$0xff]  }
 0x385   : > { %4271 = vmatpush1.bf16.msra.mxu0 %v5981_v6  ;;  %4247 = vmatprep.mubr.bf16.mxu0 %v3129_v50  ;;  %v6022_v6 = vld [vmem:[%s6590_s18 + $0x424] ss:$12 sps:$4 sm:$0xff]  }
 0x386   : > { %4520 = vmatprep.mubr.bf16.mxu1 %v3129_v50  ;;  %4272 = vmatprep.subr.bf16.mxu0 %v5986_v46 }
 0x387   : > { %5735 = vmatprep.subr.bf16.mxu1 %v6009_v62  ;;  %v7774_v43 = vpop.f32.mrb[0].mxu1  ;;  %v3114_v59 = vpop.trf.xlu1  ;;  %v6020_v62 = vld [vmem:[%s6590_s18 + $0x420] ss:$12 sps:$4 sm:$0xff]  }
 0x388   : > { %5736 = vmatpush3.bf16.msra.mxu1 %v6013_v32  ;;  %v7776_v8 = vpop.f32.mrb[1].mxu1 }
 0x389   : > { %4273 = vmatpush1.bf16.msra.mxu0 %v5984_v47  ;;  %v7779_v2 = vpop.f32.mrb[2].mxu1  ;;  %5737 = vmatprep.subr.bf16.mxu1 %v6014_v19  ;;  %v6027_v19 = vld [vmem:[%s6590_s18 + $0x43c] ss:$12 sps:$4 sm:$0xff]  }
 0x38a   : > { %4274 = vmatprep.subr.bf16.mxu0 %v5989_v27  ;;  %v7782_v57 = vpop.f32.mrb[3].mxu1 }
 0x38c   : > { %4248 = vmatmul.mubr.bf16.gmra.mrb[8].mxu0 %v3113_v37  ;;  %4521 = vmatmul.mubr.bf16.gmra.mrb[40].mxu1 %v3113_v37 }
 0x38d   : > { %4275 = vmatpush1.bf16.msra.mxu0 %v5987_v56  ;;  %4257 = vmatprep.mubr.bf16.mxu0 %v3130_v12  ;;  %v6025_v56 = vld [vmem:[%s6590_s18 + $0x438] ss:$12 sps:$4 sm:$0xff]  }
 0x38e   : > { %4528 = vmatprep.mubr.bf16.mxu1 %v3130_v12  ;;  %4276 = vmatprep.subr.bf16.mxu0 %v5992_v48  ;;  %v6032_v12 = vld [vmem:[%s6590_s18 + $0x454] ss:$12 sps:$4 sm:$0xff]  }
 0x38f   : > { %5738 = vmatpush3.bf16.msra.mxu1 %v6018_v22  ;;  %v7788_v31 = vpop.f32.mrb[4].mxu1 }
 0x390   : > { %v7791_v18 = vpop.f32.mrb[5].mxu1  ;;  %5739 = vmatprep.subr.bf16.mxu1 %v6019_v20  ;;  %v6030_v20 = vld [vmem:[%s6590_s18 + $0x450] ss:$12 sps:$4 sm:$0xff]  }
 0x391   : > { %4277 = vmatpush1.bf16.msra.mxu0 %v5990_v39  ;;  %v7794_v53 = vpop.f32.mrb[6].mxu1 }
 0x392   : > { %4278 = vmatprep.subr.bf16.mxu0 %v5995_v58  ;;  %v7798_v13 = vpop.f32.mrb[7].mxu1 }
 0x393   : > { %5740 = vmatpush3.bf16.msra.mxu1 %v6023_v25  ;;  %v6037_v25 = vld [vmem:[%s6590_s18 + $0x46c] ss:$12 sps:$4 sm:$0xff]  }
 0x394   : > { %4258 = vmatmul.mubr.bf16.gmra.mrb[16].mxu0 %v3114_v59  ;;  %4529 = vmatmul.mubr.bf16.gmra.mrb[44].mxu1 %v3114_v59 }
 0x395   : > { %4279 = vmatpush1.bf16.msra.mxu0 %v5993_v35  ;;  %5741 = vmatprep.subr.bf16.mxu1 %v6024_v49  ;;  %v6035_v49 = vld [vmem:[%s6590_s18 + $0x468] ss:$12 sps:$4 sm:$0xff]  }
 0x396   : > { %4280 = vmatprep.subr.bf16.mxu0 %v5998_v24 }
 0x397   : > { %v7804_v42 = vpop.f32.mrb[8].mxu1  ;;  %5742 = vmatpush3.bf16.msra.mxu1 %v6028_v1  ;;  %v7807_v10 = vpop.f32.mrb[12].mxu0 }
 0x398   : > { %v7809_v0 = vpop.f32.mrb[9].mxu1  ;;  %5743 = vmatprep.subr.bf16.mxu1 %v6029_v38  ;;  %v7812_v34 = vpop.f32.mrb[13].mxu0 }
 0x399   : > { %4281 = vmatpush1.bf16.msra.mxu0 %v5996_v5  ;;  %v7815_v33 = vpop.f32.mrb[10].mxu1  ;;  %v4192_v36 = vpop.f32.mrb[14].mxu0 }
 0x39a   : > { %4282 = vmatprep.subr.bf16.mxu0 %v6002_v21  ;;  %v7818_v55 = vpop.f32.mrb[11].mxu1  ;;  %v4193_v60 = vpop.f32.mrb[15].mxu0 }
 0x39b   : > { %5744 = vmatpush3.bf16.msra.mxu1 %v6033_v3 }
 0x39c   : > { %5745 = vmatprep.subr.bf16.mxu1 %v6034_v11 }
 0x39d   : > { %4283 = vmatpush1.bf16.msra.mxu0 %v6000_v30  ;;  %v6039_v30 = vld [vmem:[%s6590_s18 + $0x488] ss:$12 sps:$4 sm:$0xff]  }
 0x39e   : > { %4284 = vmatprep.subr.bf16.mxu0 %v6007_v44 }
 0x39f   : > { %v7823_v40 = vpop.f32.mrb[12].mxu1  ;;  %5746 = vmatpush3.bf16.msra.mxu1 %v6038_v26 }
 0x3a0   : > { %v7825_v15 = vpop.f32.mrb[13].mxu1  ;;  %4600 = vmatprep.subr.bf16.mxu1 %v8528_v4 }
 0x3a1   : > { %4285 = vmatpush1.bf16.msra.mxu0 %v6005_v54  ;;  %v4405_v23 = vpop.f32.mrb[14].mxu1  ;;  %v6040_v54 = vld [vmem:[%s6590_s18 + $0x4a0] ss:$12 sps:$4 sm:$0xff]  }
 0x3a2   : > { %4286 = vmatprep.subr.bf16.mxu0 %v6012_v52  ;;  %v4406_v14 = vpop.f32.mrb[15].mxu1 }
 0x3a3   : > { %v6041_v14 = vld [vmem:[%s6590_s18 + $0x4b8] ss:$12 sps:$4 sm:$0xff]  }
 0x3a5   : > { %4287 = vmatpush1.bf16.msra.mxu0 %v6010_v45 }
 0x3a6   : > { %4288 = vmatprep.subr.bf16.mxu0 %v6017_v63 }
 0x3a7   : > { %v5667_v50 = vpop.f32.mrb[16].mxu1 }
 0x3a8   : > { %v5668_v46 = vpop.f32.mrb[17].mxu1 }
 0x3a9   : > { %4289 = vmatpush1.bf16.msra.mxu0 %v6015_v61  ;;  %v7833_v32 = vadd.f32 %v5668_v46, %v5667_v50  ;;  %v5670_v47 = vpop.f32.mrb[18].mxu1  ;;  %v6043_v46 = vld [vmem:[%s6590_s18 + $0x4e8] ss:$12 sps:$4 sm:$0xff]  }
 0x3aa   : > { %4290 = vmatprep.subr.bf16.mxu0 %v6022_v6  ;;  %v5671_v27 = vpop.f32.mrb[19].mxu1  ;;  %v6042_v6 = vld [vmem:[%s6590_s18 + $0x4d0] ss:$12 sps:$4 sm:$0xff]  }
 0x3ab   : > { %v7836_v37 = vadd.f32 %v5671_v27, %v5670_v47  ;;  %v6044_v47 = vld [vmem:[%s6590_s18 + $0x500] ss:$12 sps:$4 sm:$0xff]   ;;  %v6045_v27 = vld [vmem:[%s6590_s18 + $0x518] ss:$12 sps:$4 sm:$0xff]  }
 0x3ad   : > { %4291 = vmatpush1.bf16.msra.mxu0 %v6020_v62 }
 0x3ae   : > { %4292 = vmatprep.subr.bf16.mxu0 %v6027_v19 }
 0x3af   : > { %v5673_v48 = vpop.f32.mrb[20].mxu1 }
 0x3b0   : > { %v5674_v22 = vpop.f32.mrb[21].mxu1 }
 0x3b1   : > { %4293 = vmatpush1.bf16.msra.mxu0 %v6025_v56  ;;  %v7841_v39 = vadd.f32 %v5674_v22, %v5673_v48  ;;  %v5676_v58 = vpop.f32.mrb[22].mxu1  ;;  %v6046_v56 = vld [vmem:[%s6590_s18 + $0x530] ss:$12 sps:$4 sm:$0xff]  }
 0x3b2   : > { %4294 = vmatprep.subr.bf16.mxu0 %v6032_v12  ;;  %v5677_v59 = vpop.f32.mrb[23].mxu1  ;;  %v6047_v12 = vld [vmem:[%s6590_s18 + $0x548] ss:$12 sps:$4 sm:$0xff]  }
 0x3b3   : > { %v7844_v35 = vadd.f32 %v5677_v59, %v5676_v58 }
 0x3b5   : > { %4295 = vmatpush1.bf16.msra.mxu0 %v6030_v20 }
 0x3b6   : > { %4296 = vmatprep.subr.bf16.mxu0 %v6037_v25 }
 0x3b7   : > { %v5679_v24 = vpop.f32.mrb[24].mxu1 }
 0x3b8   : > { %v5680_v1 = vpop.f32.mrb[25].mxu1 }
 0x3b9   : > { %4297 = vmatpush1.bf16.msra.mxu0 %v6035_v49  ;;  %v7847_v38 = vadd.f32 %v5680_v1, %v5679_v24  ;;  %v5682_v5 = vpop.f32.mrb[26].mxu1 }
 0x3ba   : > { %v5683_v21 = vpop.f32.mrb[27].mxu1 }
 0x3bb   : > { %v7849_v3 = vadd.f32 %v5683_v21, %v5682_v5 }
 0x3bc   : > { %v3159_v11 = vpop.trf.xlu0 }
 0x3bd   : > { %4298 = vmatprep.mubr.bf16.mxu0 %v3159_v11  ;;  %4568 = vmatprep.mubr.bf16.mxu1 %v3159_v11 }
 0x3bf   : > { %v5685_v36 = vpop.f32.mrb[28].mxu1 }
 0x3c0   : > { %v3143_v44 = vpop.trf.xlu1  ;;  %v3160_v60 = vpop.trf.xlu0 }
 0x3c1   : > { %4299 = vmatmul.mubr.bf16.vlgmr.msra.gmra.mrb[0].mxu0 %v3143_v44  ;;  %4569 = vmatmul.mubr.bf16.vlgmr.msra.gmra.mrb[48].mxu1 %v3143_v44  ;;  %v5686_v26 = vpop.f32.mrb[29].mxu1 }
 0x3c2   : > { %4601 = vmatpush1.bf16.msra.mxu1 %v6039_v30  ;;  %4308 = vmatprep.mubr.bf16.mxu0 %v3160_v60  ;;  %v7853_v52 = vadd.f32 %v5686_v26, %v5685_v36  ;;  %v5688_v45 = vpop.f32.mrb[30].mxu1 }
 0x3c3   : > { %4602 = vmatprep.subr.bf16.mxu1 %v8528_v4  ;;  %4576 = vmatprep.mubr.bf16.mxu1 %v3160_v60  ;;  %v5689_v23 = vpop.f32.mrb[31].mxu1 }
 0x3c4   : > { %v3144_v63 = vpop.trf.xlu1  ;;  %v3161_v61 = vpop.trf.xlu0 }
 0x3c6   : > { %4603 = vmatpush1.bf16.msra.mxu1 %v6040_v54 }
 0x3c7   : > { %4604 = vmatprep.subr.bf16.mxu1 %v8528_v4 }
 0x3c8   : > { %v3145_v50 = vpop.trf.xlu1  ;;  %v3162_v62 = vpop.trf.xlu0 }
 0x3c9   : > { %4309 = vmatmul.mubr.bf16.gmra.mrb[4].mxu0 %v3144_v63  ;;  %4577 = vmatmul.mubr.bf16.gmra.mrb[52].mxu1 %v3144_v63 }
 0x3ca   : > { %4605 = vmatpush1.bf16.msra.mxu1 %v6041_v14  ;;  %4318 = vmatprep.mubr.bf16.mxu0 %v3161_v61 }
 0x3cb   : > { %4606 = vmatprep.subr.bf16.mxu1 %v8528_v4  ;;  %4584 = vmatprep.mubr.bf16.mxu1 %v3161_v61 }
 0x3cc   : > { %v3146_v19 = vpop.trf.xlu1 }
 0x3ce   : > { %4607 = vmatpush1.bf16.msra.mxu1 %v6042_v6 }
 0x3cf   : > { %4608 = vmatprep.subr.bf16.mxu1 %v8528_v4 }
 0x3d1   : > { %4319 = vmatmul.mubr.bf16.gmra.mrb[8].mxu0 %v3145_v50  ;;  %4585 = vmatmul.mubr.bf16.gmra.mrb[56].mxu1 %v3145_v50 }
 0x3d2   : > { %4609 = vmatpush1.bf16.msra.mxu1 %v6043_v46  ;;  %4328 = vmatprep.mubr.bf16.mxu0 %v3162_v62 }
 0x3d3   : > { %4610 = vmatprep.subr.bf16.mxu1 %v8528_v4  ;;  %4592 = vmatprep.mubr.bf16.mxu1 %v3162_v62 }
 0x3d6   : > { %4611 = vmatpush1.bf16.msra.mxu1 %v6044_v47 }
 0x3d7   : > { %4612 = vmatprep.subr.bf16.mxu1 %v8528_v4 }
 0x3d9   : > { %4329 = vmatmul.mubr.bf16.gmra.mrb[20].mxu0 %v3146_v19  ;;  %4593 = vmatmul.mubr.bf16.gmra.mrb[60].mxu1 %v3146_v19 }
 0x3da   : > { %4613 = vmatpush1.bf16.msra.mxu1 %v6045_v27  ;;  %5360 = vmatprep.mubr.msk.bf16.mxu1 %vm4111_vm3, %v7536_v51 }
 0x3db   : > { %4614 = vmatprep.subr.bf16.mxu1 %v8528_v4 }
 0x3de   : > { %4615 = vmatpush1.bf16.msra.mxu1 %v6046_v56 }
 0x3df   : > { %4616 = vmatprep.subr.bf16.mxu1 %v8528_v4 }
 0x3e2   : > { %4617 = vmatpush1.bf16.msra.mxu1 %v6047_v12 }
 0x3e5   : > { %4633 = vmatmul.mubr.bf16.vlgmr.msra.gmra.mrb[64].mxu1 %v7569_v16 }
 0x3e6   : > { %5361 = vmatprep.mubr.msk.bf16.mxu1 %vm4111_vm3, %v7546_v17 }
 0x3ed   : > { %4641 = vmatmul.mubr.bf16.gmra.mrb[68].mxu1 %v7585_v41 }
 0x3ee   : > { %5362 = vmatprep.mubr.msk.bf16.mxu1 %vm4111_vm3, %v7552_v9 }
 0x3f5   : > { %4649 = vmatmul.mubr.bf16.gmra.mrb[72].mxu1 %v7605_v7 }
 0x3f6   : > { %5363 = vmatprep.mubr.msk.bf16.mxu1 %vm4111_vm3, %v7562_v29 }
 0x3fd   : > { %4657 = vmatmul.mubr.bf16.gmra.mrb[76].mxu1 %v7624_v28 }
 0x44f   : > { %v5707_v51 = vpop.f32.mrb[32].mxu1 }
 0x450   : > { %v5708_v4 = vpop.f32.mrb[33].mxu1 }
 0x451   : > { %v5709_v48 = vadd.f32 %v5708_v4, %v5707_v51  ;;  %v5710_v22 = vpop.f32.mrb[34].mxu1 }
 0x452   : > { %v5711_v16 = vpop.f32.mrb[35].mxu1 }
 0x453   : > { %v4507_v20 = vadd.f32 %v5709_v48, %v7833_v32  ;;  %v5712_v17 = vadd.f32 %v5711_v16, %v5710_v22 }
 0x455   : > { %v4510_v41 = vadd.f32 %v5712_v17, %v7836_v37 }
 0x457   : > { %v5713_v58 = vpop.f32.mrb[36].mxu1 }
 0x458   : > { %v5714_v25 = vpop.f32.mrb[37].mxu1 }
 0x459   : > { %v5715_v9 = vadd.f32 %v5714_v25, %v5713_v58  ;;  %v5716_v59 = vpop.f32.mrb[38].mxu1 }
 0x45a   : > { %v5717_v7 = vpop.f32.mrb[39].mxu1 }
 0x45b   : > { %v7885_v49 = vadd.f32 %v5715_v9, %v7841_v39  ;;  %v5718_v29 = vadd.f32 %v5717_v7, %v5716_v59 }
 0x45d   : > { %v7888_v28 = vadd.f32 %v5718_v29, %v7844_v35 }
 0x45f   : > { %v5719_v24 = vpop.f32.mrb[40].mxu1 }
 0x460   : > { %v5720_v1 = vpop.f32.mrb[41].mxu1 }
 0x461   : > { %v5721_v5 = vadd.f32 %v5720_v1, %v5719_v24  ;;  %v5722_v21 = vpop.f32.mrb[42].mxu1  ;;  %v2831_v1 = vld [vmem:[%s8427_s7 + $0x48] sm:$0xff] }
 0x462   : > { %v5723_v32 = vpop.f32.mrb[43].mxu1 }
 0x463   : > { %v7891_v11 = vadd.f32 %v5721_v5, %v7847_v38  ;;  %v5724_v37 = vadd.f32 %v5723_v32, %v5722_v21 }
 0x465   : > { %v7894_v30 = vadd.f32 %v5724_v37, %v7849_v3  ;;  %v2822_v3 = vld [vmem:[%s8427_s7] sm:$0xff] }
 0x467   : > { %v4259_v36 = vpop.f32.mrb[16].mxu0  ;;  %v5725_v44 = vpop.f32.mrb[44].mxu1 }
 0x468   : > { %v7897_v39 = vadd.f32 %v4259_v36, %v7807_v10  ;;  %v4261_v60 = vpop.f32.mrb[17].mxu0  ;;  %v5726_v35 = vpop.f32.mrb[45].mxu1 }
 0x469   : > { %v7900_v26 = vadd.f32 %v4261_v60, %v7812_v34  ;;  %v5727_v54 = vadd.f32 %v5726_v35, %v5725_v44  ;;  %v4263_v45 = vpop.f32.mrb[18].mxu0  ;;  %v5728_v23 = vpop.f32.mrb[46].mxu1  ;;  %v2823_v34 = vld [vmem:[%s8427_s7 + $0x8] sm:$0xff] }
 0x46a   : > { %v4264_v63 = vpop.f32.mrb[19].mxu0  ;;  %v5729_v38 = vpop.f32.mrb[47].mxu1 }
 0x46b   : > { %v7903_v14 = vadd.f32 %v5727_v54, %v7853_v52  ;;  %v2825_v52 = vld [vmem:[%s8427_s7 + $0x18] sm:$0xff] }
 0x494   : > { %v4300_v61 = vpop.f32.mrb[0].mxu0  ;;  %v5747_v10 = vpop.f32.mrb[48].mxu1 }
 0x495   : > { %v5771_v6 = vadd.f32 %v7774_v43, %v4300_v61  ;;  %v4302_v50 = vpop.f32.mrb[1].mxu0  ;;  %v5748_v46 = vpop.f32.mrb[49].mxu1  ;;  %v2826_v43 = vld [vmem:[%s8427_s7 + $0x20] sm:$0xff] }
 0x496   : > { %v5772_v62 = vadd.f32 %v7776_v8, %v4302_v50  ;;  %v5749_v47 = vadd.f32 %v5748_v46, %v5747_v10  ;;  %v4304_v19 = vpop.f32.mrb[2].mxu0  ;;  %v5750_v27 = vpop.f32.mrb[50].mxu1 }
 0x497   : > { %v4664_v56 = vadd.f32 %v5771_v6, %v2822_v3  ;;  %v5773_v12 = vadd.f32 %v7779_v2, %v4304_v19  ;;  %v4306_v51 = vpop.f32.mrb[3].mxu0  ;;  %v5751_v4 = vpop.f32.mrb[51].mxu1 }
 0x498   : > { %v4665_v48 = vadd.f32 %v5772_v62, %v2823_v34  ;;  %v5774_v22 = vadd.f32 %v7782_v57, %v4306_v51  ;;  %v5752_v8 = vadd.f32 %v5751_v4, %v5750_v27  ;;  %v7921_v16 = vadd.f32 %v5749_v47, %v4507_v20  ;;  %v2828_v57 = vld [vmem:[%s8427_s7 + $0x30] sm:$0xff]  ;;  %v2837_v34 = vld [vmem:[%s8427_s7 + $0x78] sm:$0xff] }
 0x499   : > { %4685 = vst [vmem:[%s8427_s7] sm:$0xff] %v4664_v56  ;;  %v4667_v17 = vadd.f32 %v5773_v12, %v2825_v52 }
 0x49a   : > { %4686 = vst [vmem:[%s8427_s7 + $0x8] sm:$0xff] %v4665_v48  ;;  %v4668_v2 = vadd.f32 %v5774_v22, %v2826_v43  ;;  %v7929_v58 = vadd.f32 %v5752_v8, %v4510_v41  ;;  %v2829_v41 = vld [vmem:[%s8427_s7 + $0x38] sm:$0xff]  ;;  %v2840_v8 = vld [vmem:[%s8427_s7 + $0x90] sm:$0x1] }
 0x49b   : > { %4689 = vst [vmem:[%s8427_s7 + $0x18] sm:$0xff] %v4667_v17 }
 0x49c   : > { %4690 = vst [vmem:[%s8427_s7 + $0x20] sm:$0xff] %v4668_v2  ;;  %v4310_v20 = vpop.f32.mrb[4].mxu0  ;;  %v5753_v25 = vpop.f32.mrb[52].mxu1 }
 0x49d   : > { %v5775_v9 = vadd.f32 %v7788_v31, %v4310_v20  ;;  %v4312_v59 = vpop.f32.mrb[5].mxu0  ;;  %v5754_v7 = vpop.f32.mrb[53].mxu1  ;;  %v2832_v31 = vld [vmem:[%s8427_s7 + $0x50] sm:$0xff] }
 0x49e   : > { %v5776_v29 = vadd.f32 %v7791_v18, %v4312_v59  ;;  %v5755_v24 = vadd.f32 %v5754_v7, %v5753_v25  ;;  %v4314_v5 = vpop.f32.mrb[6].mxu0  ;;  %v5756_v21 = vpop.f32.mrb[54].mxu1  ;;  %v2841_v25 = vld [vmem:[%s8427_s7 + $0x98] sm:$0x1] }
 0x49f   : > { %v4670_v32 = vadd.f32 %v5775_v9, %v2828_v57  ;;  %v5777_v37 = vadd.f32 %v7794_v53, %v4314_v5  ;;  %v4316_v36 = vpop.f32.mrb[7].mxu0  ;;  %v5757_v44 = vpop.f32.mrb[55].mxu1 }
 0x4a0   : > { %v4671_v60 = vadd.f32 %v5776_v29, %v2829_v41  ;;  %v5778_v35 = vadd.f32 %v7798_v13, %v4316_v36  ;;  %v5758_v18 = vadd.f32 %v5757_v44, %v5756_v21  ;;  %v7954_v54 = vadd.f32 %v5755_v24, %v7885_v49  ;;  %v2834_v13 = vld [vmem:[%s8427_s7 + $0x60] sm:$0xff]  ;;  %v2833_v44 = vld [vmem:[%s8427_s7 + $0x58] sm:$0xff] }
 0x4a1   : > { %4692 = vst [vmem:[%s8427_s7 + $0x30] sm:$0xff] %v4670_v32  ;;  %v4673_v45 = vadd.f32 %v5777_v37, %v2831_v1 }
 0x4a2   : > { %4693 = vst [vmem:[%s8427_s7 + $0x38] sm:$0xff] %v4671_v60  ;;  %v4674_v53 = vadd.f32 %v5778_v35, %v2832_v31  ;;  %v7963_v23 = vadd.f32 %v5758_v18, %v7888_v28  ;;  %v2835_v28 = vld [vmem:[%s8427_s7 + $0x68] sm:$0xff] }
 0x4a3   : > { %4695 = vst [vmem:[%s8427_s7 + $0x48] sm:$0xff] %v4673_v45 }
 0x4a4   : > { %4696 = vst [vmem:[%s8427_s7 + $0x50] sm:$0xff] %v4674_v53  ;;  %v4320_v49 = vpop.f32.mrb[8].mxu0  ;;  %v5759_v63 = vpop.f32.mrb[56].mxu1 }
 0x4a5   : > { %v5779_v38 = vadd.f32 %v7804_v42, %v4320_v49  ;;  %v4322_v3 = vpop.f32.mrb[9].mxu0  ;;  %v5760_v61 = vpop.f32.mrb[57].mxu1  ;;  %v2838_v42 = vld [vmem:[%s8427_s7 + $0x80] sm:$0xff] }
 0x4a6   : > { %v5780_v10 = vadd.f32 %v7809_v0, %v4322_v3  ;;  %v5761_v6 = vadd.f32 %v5760_v61, %v5759_v63  ;;  %v4324_v50 = vpop.f32.mrb[10].mxu0  ;;  %v5762_v46 = vpop.f32.mrb[58].mxu1 }
 0x4a7   : > { %v4676_v62 = vadd.f32 %v5779_v38, %v2834_v13  ;;  %v5781_v47 = vadd.f32 %v7815_v33, %v4324_v50  ;;  %v4326_v52 = vpop.f32.mrb[11].mxu0  ;;  %v5763_v19 = vpop.f32.mrb[59].mxu1 }
 0x4a8   : > { %v4677_v27 = vadd.f32 %v5780_v10, %v2835_v28  ;;  %v5782_v56 = vadd.f32 %v7818_v55, %v4326_v52  ;;  %v5764_v0 = vadd.f32 %v5763_v19, %v5762_v46  ;;  %v4587_v12 = vadd.f32 %v5761_v6, %v7891_v11  ;;  %v2842_v6 = vld [vmem:[%s8427_s7 + $0xa0] sm:$0x1]  ;;  %v8080_v19 = vld [vmem:[%s8427_s7 + $0x18] sm:$0xff] (!%p5364_p5) }
 0x4a9   : > { %4698 = vst [vmem:[%s8427_s7 + $0x60] sm:$0xff] %v4676_v62  ;;  %v4679_v43 = vadd.f32 %v5781_v47, %v2837_v34  ;;  %v8075_v52 = vld [vmem:[%s8427_s7] sm:$0xff] (!%p5364_p5) }
 0x4aa   : > { %4699 = vst [vmem:[%s8427_s7 + $0x68] sm:$0xff] %v4677_v27  ;;  %v4680_v33 = vadd.f32 %v5782_v56, %v2838_v42  ;;  %v4590_v51 = vadd.f32 %v5764_v0, %v7894_v30  ;;  %v8085_v27 = vld [vmem:[%s8427_s7 + $0x30] sm:$0xff] (!%p5364_p5)  ;;  %v4733_v56 = vadd.f32 (!%p5364_p5), %v8080_v19, %v8075_v52  ;;  %v8092_v0 = vld [vmem:[%s8427_s7 + $0x48] sm:$0xff] (!%p5364_p5) }
 0x4ab   : > { %4701 = vst [vmem:[%s8427_s7 + $0x78] sm:$0xff] %v4679_v43 }
 0x4ac   : > { %4702 = vst [vmem:[%s8427_s7 + $0x80] sm:$0xff] %v4680_v33  ;;  %v4330_v55 = vpop.f32.mrb[20].mxu0  ;;  %v5765_v11 = vpop.f32.mrb[60].mxu1  ;;  %v4734_v43 = vadd.f32 (!%p5364_p5), %v4733_v56, %v8085_v27  ;;  %v8103_v33 = vld [vmem:[%s8427_s7 + $0x20] sm:$0xff] (!%p5364_p5) }
 0x4ad   : > { %v4331_v4 = vadd.f32 %v4330_v55, %v7897_v39  ;;  %v4332_v48 = vpop.f32.mrb[21].mxu0  ;;  %v5766_v22 = vpop.f32.mrb[61].mxu1 }
 0x4ae   : > { %v4333_v30 = vadd.f32 %v4332_v48, %v7900_v26  ;;  %v5767_v17 = vadd.f32 %v5766_v22, %v5765_v11  ;;  %v4334_v2 = vpop.f32.mrb[22].mxu0  ;;  %v5768_v57 = vpop.f32.mrb[62].mxu1  ;;  %v4735_v48 = vadd.f32 (!%p5364_p5), %v4734_v43, %v8092_v0  ;;  %v8124_v22 = vld [vmem:[%s8427_s7 + $0x50] sm:$0xff] (!%p5364_p5) }
 0x4af   : > { %v4402_v20 = vadd.f32 %v7823_v40, %v4331_v4  ;;  %v4335_v9 = vpop.f32.mrb[23].mxu0  ;;  %v5769_v41 = vpop.f32.mrb[63].mxu1  ;;  %v2824_v40 = vld [vmem:[%s8427_s7 + $0x10] sm:$0xff] }
 0x4b0   : > { %v4404_v39 = vadd.f32 %v7825_v15, %v4333_v30  ;;  %v4595_v59 = vadd.f32 %v5767_v17, %v7903_v14  ;;  %v2827_v14 = vld [vmem:[%s8427_s7 + $0x28] sm:$0xff]  ;;  %v4724_v55 = vld [vmem:[%s8427_s7 + $0x60] sm:$0xff] (!%p5364_p5) }
 0x4b1   : > { %v4682_v7 = vadd.f32 %v4402_v20, %v2840_v8  ;;  %v4736_v20 = vadd.f32 (!%p5364_p5), %v4735_v48, %v4724_v55 }
 0x4b2   : > { %v4683_v29 = vadd.f32 %v4404_v39, %v2841_v25  ;;  %v4727_v17 = vld [vmem:[%s8427_s7 + $0x78] sm:$0xff] (!%p5364_p5)  ;;  %v4725_v25 = vld [vmem:[%s8427_s7 + $0x68] sm:$0xff] (!%p5364_p5) }
 0x4b3   : > { %4704 = vst [vmem:[%s8427_s7 + $0x90] sm:$0x1] %v4682_v7 }
 0x4b4   : > { %4705 = vst [vmem:[%s8427_s7 + $0x98] sm:$0x1] %v4683_v29 }
 0x4b8   : > { %v4634_v26 = vpop.f32.mrb[64].mxu1 }
 0x4b9   : > { %v4635_v24 = vadd.f32 %v4634_v26, %v7921_v16  ;;  %v4636_v15 = vpop.f32.mrb[65].mxu1  ;;  %v2830_v16 = vld [vmem:[%s8427_s7 + $0x40] sm:$0xff]  ;;  %v4737_v26 = vadd.f32 (!%p5364_p5), %v4736_v20, %v4727_v17 }
 0x4ba   : > { %v4637_v1 = vpop.f32.mrb[66].mxu1  ;;  %v8116_v11 = vld [vmem:[%s8427_s7 + $0x90] sm:$0x1] (!%p5364_p5) }
 0x4bb   : > { %v4666_v5 = vadd.f32 %v4635_v24, %v2824_v40  ;;  %v4638_v21 = vadd.f32 %v4637_v1, %v7929_v58  ;;  %v4639_v32 = vpop.f32.mrb[67].mxu1  ;;  %v4739_v39 = vsel (!%p5364_p5), %vm4738_vm6, %v8116_v11, 0.0  ;;  %v4728_v24 = vld [vmem:[%s8427_s7 + $0x80] sm:$0xff] (!%p5364_p5) }
 0x4bd   : > { %4688 = vst.msk [vmem:[%s8427_s7 + $0x10] sm:$0xff] %vm4687_vm4, %v4666_v5  ;;  %v4669_v37 = vadd.f32 %v4638_v21, %v2827_v14  ;;  %v4740_v21 = vadd.f32 (!%p5364_p5), %v4739_v39, %v4737_v26 }
 0x4bf   : > { %4691 = vst.msk [vmem:[%s8427_s7 + $0x28] sm:$0xff] %vm4687_vm4, %v4669_v37 }
 0x4c0   : > { %v4642_v31 = vpop.f32.mrb[68].mxu1 }
 0x4c1   : > { %v4643_v36 = vadd.f32 %v4642_v31, %v7954_v54  ;;  %v4644_v58 = vpop.f32.mrb[69].mxu1  ;;  %v2836_v54 = vld [vmem:[%s8427_s7 + $0x70] sm:$0xff] }
 0x4c2   : > { %v4645_v60 = vpop.f32.mrb[70].mxu1  ;;  %v4741_v58 = vrot.slane (!%p5364_p5), %v4740_v21, 4 }
 0x4c3   : > { %v4672_v35 = vadd.f32 %v4643_v36, %v2830_v16  ;;  %v4646_v18 = vadd.f32 %v4645_v60, %v7963_v23  ;;  %v4647_v45 = vpop.f32.mrb[71].mxu1  ;;  %v2839_v23 = vld [vmem:[%s8427_s7 + $0x88] sm:$0xff] }
 0x4c4   : > { %v8129_v8 = vld [vmem:[%s8427_s7 + $0x10] sm:$0xff] (!%p5364_p5)  ;;  %v4742_v45 = vadd.f32 (!%p5364_p5), %v4741_v58, %v4740_v21 }
 0x4c5   : > { %4694 = vst.msk [vmem:[%s8427_s7 + $0x40] sm:$0xff] %vm4687_vm4, %v4672_v35  ;;  %v4675_v53 = vadd.f32 %v4646_v18, %v2833_v44  ;;  %v4760_v41 = vsel (!%p5364_p5), %vm4687_vm4, %v8129_v8, 0.0 }
 0x4c6   : > { %v8134_v30 = vld [vmem:[%s8427_s7 + $0x28] sm:$0xff] (!%p5364_p5) }
 0x4c7   : > { %4697 = vst.msk [vmem:[%s8427_s7 + $0x58] sm:$0xff] %vm4687_vm4, %v4675_v53  ;;  %v4761_v29 = vsel (!%p5364_p5), %vm4687_vm4, %v8134_v30, 0.0 }
 0x4c8   : > { %v4650_v13 = vpop.f32.mrb[72].mxu1  ;;  %v4762_v14 = vadd.f32 (!%p5364_p5), %v4761_v29, %v4760_v41 }
 0x4c9   : > { %v4651_v49 = vadd.f32 %v4650_v13, %v4587_v12  ;;  %v4652_v63 = vpop.f32.mrb[73].mxu1  ;;  %v8097_v12 = vld [vmem:[%s8427_s7 + $0x8] sm:$0xff] (!%p5364_p5) }
 0x4ca   : > { %v4653_v38 = vpop.f32.mrb[74].mxu1  ;;  %v4747_v4 = vadd.f32 (!%p5364_p5), %v8103_v33, %v8097_v12 }
 0x4cb   : > { %v4678_v28 = vadd.f32 %v4651_v49, %v2836_v54  ;;  %v4654_v3 = vadd.f32 %v4653_v38, %v4590_v51  ;;  %v4655_v61 = vpop.f32.mrb[75].mxu1  ;;  %v8108_v51 = vld [vmem:[%s8427_s7 + $0x38] sm:$0xff] (!%p5364_p5)  ;;  %v4743_v49 = vrot.slane (!%p5364_p5), %v4742_v45, 2 }
 0x4cc   : > { %v4748_v2 = vadd.f32 (!%p5364_p5), %v4747_v4, %v8108_v51  ;;  %v8143_v57 = vld [vmem:[%s8427_s7 + $0x40] sm:$0xff] (!%p5364_p5) }
 0x4cd   : > { %4700 = vst.msk [vmem:[%s8427_s7 + $0x70] sm:$0xff] %vm4687_vm4, %v4678_v28  ;;  %v4681_v10 = vadd.f32 %v4654_v3, %v2839_v23  ;;  %v4763_v40 = vsel (!%p5364_p5), %vm4687_vm4, %v8143_v57, 0.0  ;;  %v4744_v38 = vadd.f32 (!%p5364_p5), %v4743_v49, %v4742_v45 }
 0x4ce   : > { %v8151_v9 = vld [vmem:[%s8427_s7 + $0x58] sm:$0xff] (!%p5364_p5)  ;;  %v4749_v7 = vadd.f32 (!%p5364_p5), %v4748_v2, %v8124_v22  ;;  %v4764_v16 = vadd.f32 (!%p5364_p5), %v4763_v40, %v4762_v14 }
 0x4cf   : > { %4703 = vst.msk [vmem:[%s8427_s7 + $0x88] sm:$0xff] %vm4687_vm4, %v4681_v10  ;;  %4711 = sbr.rel (%p5364_p5) target bundleno = 1317 (0x525), region = 56  ;;  %v4765_v5 = vsel (!%p5364_p5), %vm4687_vm4, %v8151_v9, 0.0  ;;  %v4745_v61 = vrot.slane (!%p5364_p5), %v4744_v38, 1 }
 0x4d0   : > { %v4658_v34 = vpop.f32.mrb[76].mxu1  ;;  %v4750_v1 = vadd.f32 (!%p5364_p5), %v4749_v7, %v4725_v25  ;;  %v4766_v60 = vadd.f32 (!%p5364_p5), %v4765_v5, %v4764_v16 }
 0x4d1   : > { %v4659_v50 = vadd.f32 %v4658_v34, %v4595_v59  ;;  %v4660_v46 = vpop.f32.mrb[77].mxu1  ;;  %v8160_v59 = vld [vmem:[%s8427_s7 + $0x98] sm:$0x1] (!%p5364_p5)  ;;  %v4746_v34 = vadd.f32 (!%p5364_p5), %v4745_v61, %v4744_v38 }
 0x4d2   : > { %v4661_v62 = vpop.f32.mrb[78].mxu1  ;;  %v4752_v32 = vsel (!%p5364_p5), %vm4738_vm6, %v8160_v59, 0.0  ;;  %v4751_v31 = vadd.f32 (!%p5364_p5), %v4750_v1, %v4728_v24 }
 0x4d3   : > { %v4684_v47 = vadd.f32 %v4659_v50, %v2842_v6  ;;  %v4662_v42 = vpop.f32.mrb[79].mxu1  ;;  %v4780_v46 = vmul.f32 (!%p5364_p5), 0.020408163, %v4746_v34 }
 0x4d4   : > { %v8173_v15 = vld [vmem:[%s8427_s7 + $0x70] sm:$0xff] (!%p5364_p5)  ;;  %v4753_v35 = vadd.f32 (!%p5364_p5), %v4752_v32, %v4751_v31 }
 0x4d5   : > { %4707 = vst.msk [vmem:[%s8427_s7 + $0xa0] sm:$0x1] %vm4706_vm5, %v4684_v47  ;;  %v4767_v36 = vsel (!%p5364_p5), %vm4687_vm4, %v8173_v15, 0.0  ;;  %v8196_v42 = vsub.f32 (!%p5364_p5), %v8075_v52, %v4780_v46  ;;  %v8199_v56 = vsub.f32 (!%p5364_p5), %v8080_v19, %v4780_v46  ;;  %v8202_v43 = vsub.f32 (!%p5364_p5), %v8085_v27, %v4780_v46 }
 0x4d6   : > { %v8182_v37 = vld [vmem:[%s8427_s7 + $0x88] sm:$0xff]  ;;  %v4768_v53 = vadd.f32 %v4767_v36, %v4766_v60  ;;  %v4754_v54 = vrot.slane %v4753_v35, 4  ;;  %v8205_v4 = vsub.f32 %v8092_v0, %v4780_v46  ;;  %v8207_v48 = vsub.f32 %v4724_v55, %v4780_v46 }
 0x4d7   : > { %v4769_v18 = vsel %vm4687_vm4, %v8182_v37, 0.0  ;;  %v4804_v20 = vmul.f32 %v8196_v42, %v8196_v42  ;;  %v4807_v41 = vmul.f32 %v8199_v56, %v8199_v56  ;;  %v4810_v52 = vmul.f32 %v8202_v43, %v8202_v43 }
 0x4d8   : > { %v4770_v63 = vadd.f32 %v4769_v18, %v4768_v53  ;;  %v4755_v23 = vadd.f32 %v4754_v54, %v4753_v35  ;;  %v8215_v39 = vsub.f32 %v4727_v17, %v4780_v46  ;;  %v8218_v27 = vsub.f32 %v8116_v11, %v4780_v46 }
 0x4d9   : > { %v4813_v0 = vmul.f32 %v8205_v4, %v8205_v4  ;;  %v4825_v7 = vadd.f32 %v4807_v41, %v4804_v20  ;;  %v4816_v11 = vmul.f32 %v8207_v48, %v8207_v48 }
 0x4da   : > { %v4756_v3 = vrot.slane %v4755_v23, 2 }
 0x4db   : > { %v4826_v14 = vadd.f32 %v4825_v7, %v4810_v52 }
 0x4dc   : > { %v8189_v44 = vld [vmem:[%s8427_s7 + $0xa0] sm:$0x1]  ;;  %v4757_v6 = vadd.f32 %v4756_v3, %v4755_v23 }
 0x4dd   : > { %v4771_v13 = vsel %vm4706_vm5, %v8189_v44, 0.0  ;;  %v4827_v21 = vadd.f32 %v4826_v14, %v4813_v0 }
 0x4de   : > { %v4772_v28 = vadd.f32 %v4771_v13, %v4770_v63  ;;  %v4758_v50 = vrot.slane %v4757_v6, 1 }
 0x4df   : > { %v4828_v36 = vadd.f32 %v4827_v21, %v4816_v11 }
 0x4e0   : > { %v4773_v10 = vrot.slane %v4772_v28, 4  ;;  %v4759_v47 = vadd.f32 %v4758_v50, %v4757_v6 }
 0x4e2   : > { %v4774_v62 = vadd.f32 %v4773_v10, %v4772_v28  ;;  %v4781_v2 = vmul.f32 0.020408163, %v4759_v47 }
 0x4e4   : > { %v4775_v19 = vrot.slane %v4774_v62, 2  ;;  %v8223_v55 = vsub.f32 %v8097_v12, %v4781_v2  ;;  %v8226_v29 = vsub.f32 %v8103_v33, %v4781_v2  ;;  %v8229_v40 = vsub.f32 %v8108_v51, %v4781_v2 }
 0x4e5   : > { %v8232_v26 = vsub.f32 %v8124_v22, %v4781_v2  ;;  %v8236_v17 = vsub.f32 %v4725_v25, %v4781_v2  ;;  %v4819_v51 = vmul.f32 %v8215_v39, %v8215_v39  ;;  %v4822_v22 = vmul.f32 %v8218_v27, %v8218_v27 }
 0x4e6   : > { %v4805_v12 = vmul.f32 %v8223_v55, %v8223_v55  ;;  %v4808_v1 = vmul.f32 %v8226_v29, %v8226_v29  ;;  %v4811_v33 = vmul.f32 %v8229_v40, %v8229_v40  ;;  %v8248_v5 = vsub.f32 %v4728_v24, %v4781_v2 }
 0x4e7   : > { %v8251_v25 = vsub.f32 %v8160_v59, %v4781_v2  ;;  %v4814_v32 = vmul.f32 %v8232_v26, %v8232_v26  ;;  %v4776_v31 = vadd.f32 %v4775_v19, %v4774_v62  ;;  %v4817_v58 = vmul.f32 %v8236_v17, %v8236_v17 }
 0x4e8   : > { %v4838_v16 = vadd.f32 %v4808_v1, %v4805_v12  ;;  %v4830_v18 = vsel %vm4738_vm6, %v4822_v22, 0.0  ;;  %v4829_v45 = vadd.f32 %v4828_v36, %v4819_v51  ;;  %v4820_v59 = vmul.f32 %v8248_v5, %v8248_v5 }
 0x4e9   : > { %v4777_v35 = vrot.slane %v4776_v31, 1  ;;  %v4823_v24 = vmul.f32 %v8251_v25, %v8251_v25 }
 0x4ea   : > { %v4839_v60 = vadd.f32 %v4838_v16, %v4811_v33  ;;  %v4831_v13 = vadd.f32 %v4830_v18, %v4829_v45 }
 0x4eb   : > { %v4778_v54 = vadd.f32 %v4777_v35, %v4776_v31  ;;  %v4843_v23 = vsel %vm4738_vm6, %v4823_v24, 0.0 }
 0x4ec   : > { %v4840_v53 = vadd.f32 %v4839_v60, %v4814_v32  ;;  %v4832_v38 = vrot.slane %v4831_v13, 4  ;;  %v4902_v60 = vlaneseq }
 0x4ed   : > { %v4782_v63 = vmul.f32 0.020408163, %v4778_v54 }
 0x4ee   : > { %v4841_v49 = vadd.f32 %v4840_v53, %v4817_v58  ;;  %v4833_v50 = vadd.f32 %v4832_v38, %v4831_v13  ;;  %v8305_v54 = vshrl.u32 %v4902_v60, 7  ;;  %v8311_v38 = vld [vmem:[%s8425_s5] sm:$0x7] }
 0x4ef   : > { %v8264_v3 = vsub.f32 %v8129_v8, %v4782_v63  ;;  %v8267_v61 = vsub.f32 %v8134_v30, %v4782_v63  ;;  %v8270_v10 = vsub.f32 %v8143_v57, %v4782_v63  ;;  %v8273_v6 = vsub.f32 %v8151_v9, %v4782_v63 }
 0x4f0   : > { %v4842_v28 = vadd.f32 %v4841_v49, %v4820_v59  ;;  %v8276_v34 = vsub.f32 %v8173_v15, %v4782_v63  ;;  %v8281_v8 = vsub.f32 %v8182_v37, %v4782_v63  ;;  %v4834_v47 = vrot.slane %v4833_v50, 2 }
 0x4f1   : > { %v4806_v62 = vmul.f32 %v8264_v3, %v8264_v3  ;;  %v4809_v30 = vmul.f32 %v8267_v61, %v8267_v61  ;;  %v4812_v57 = vmul.f32 %v8270_v10, %v8270_v10  ;;  %v4815_v9 = vmul.f32 %v8273_v6, %v8273_v6 }
 0x4f2   : > { %v4844_v46 = vadd.f32 %v4843_v23, %v4842_v28  ;;  %v8290_v2 = vsub.f32 %v8189_v44, %v4782_v63  ;;  %v4818_v20 = vmul.f32 %v8276_v34, %v8276_v34  ;;  %v4835_v19 = vadd.f32 %v4834_v47, %v4833_v50 }
 0x4f3   : > { %v4851_v37 = vsel %vm4687_vm4, %v4806_v62, 0.0  ;;  %v4852_v41 = vsel %vm4687_vm4, %v4809_v30, 0.0  ;;  %v4854_v52 = vsel %vm4687_vm4, %v4812_v57, 0.0  ;;  %v4821_v11 = vmul.f32 %v8281_v8, %v8281_v8 }
 0x4f4   : > { %v4845_v15 = vrot.slane %v4844_v46, 4  ;;  %v4853_v7 = vadd.f32 %v4852_v41, %v4851_v37  ;;  %v4856_v14 = vsel %vm4687_vm4, %v4815_v9, 0.0  ;;  %v4836_v12 = vrot.slane %v4835_v19, 1 }
 0x4f5   : > { %v4824_v33 = vmul.f32 %v8290_v2, %v8290_v2  ;;  %v4858_v51 = vsel %vm4687_vm4, %v4818_v20, 0.0  ;;  %v4860_v16 = vsel %vm4687_vm4, %v4821_v11, 0.0  ;;  %v4904_v23 = vsub.s32 0, %v8305_v54 }
 0x4f6   : > { %v4846_v0 = vadd.f32 %v4845_v15, %v4844_v46  ;;  %v4855_v1 = vadd.f32 %v4854_v52, %v4853_v7  ;;  %v4837_v22 = vadd.f32 %v4836_v12, %v4835_v19  ;;  %v4908_v28 = vsub.s32 1, %v8305_v54  ;;  %v8317_v46 = vld [vmem:[%s8426_s6] sm:$0x7] }
 0x4f7   : > { %v4862_v35 = vsel %vm4706_vm5, %v4824_v33, 0.0  ;;  %v4905_v30 = vrot.slane %v8311_v38, %v4904_v23  ;;  %v4943_v9 = vrot.slane %v8317_v46, %v4904_v23  ;;  %v4912_v23 = vsub.s32 2, %v8305_v54 }
 0x4f8   : > { %v4847_v44 = vrot.slane %v4846_v0, 2  ;;  %v4857_v32 = vadd.f32 %v4856_v14, %v4855_v1  ;;  %v4870_v31 = vmul.f32 0.020408163, %v4837_v22  ;;  %v4909_v47 = vrot.slane %v8311_v38, %v4908_v28 }
 0x4f9   : > { %v4947_v15 = vrot.slane %v8317_v46, %v4908_v28  ;;  %v4913_v54 = vrot.slane %v8311_v38, %v4912_v23 }
 0x4fa   : > { %v4848_v21 = vadd.f32 %v4847_v44, %v4846_v0  ;;  %v4859_v58 = vadd.f32 %v4858_v51, %v4857_v32  ;;  %v4873_v18 = vadd.f32 0.001, %v4870_v31 }
 0x4fc   : > { %v4849_v36 = vrot.slane %v4848_v21, 1  ;;  %v4861_v45 = vadd.f32 %v4860_v16, %v4859_v58  ;;  %6505 = vrsqrt.f32 %v4873_v18 }
 0x4fe   : > { %v4850_v24 = vadd.f32 %v4849_v36, %v4848_v21  ;;  %v4863_v53 = vadd.f32 %v4862_v35, %v4861_v45 }
 0x500   : > { %v4871_v59 = vmul.f32 0.020408163, %v4850_v24  ;;  %v4864_v49 = vrot.slane %v4863_v53, 4 }
 0x502   : > { %v4874_v13 = vadd.f32 0.001, %v4871_v59  ;;  %v4865_v63 = vadd.f32 %v4864_v49, %v4863_v53 }
 0x504   : > { %6507 = vrsqrt.f32 %v4874_v13  ;;  %v4866_v50 = vrot.slane %v4865_v63, 2 }
 0x506   : > { %v4867_v62 = vadd.f32 %v4866_v50, %v4865_v63  ;;  %v6506_v57 = vpop.eup %6505 }
 0x507   : > { %v4879_v37 = vmul.f32 %v6506_v57, %v8196_v42  ;;  %v4882_v41 = vmul.f32 %v6506_v57, %v8199_v56  ;;  %v4885_v52 = vmul.f32 %v6506_v57, %v8202_v43  ;;  %v4888_v19 = vmul.f32 %v6506_v57, %v8205_v4 }
 0x508   : > { %v4868_v20 = vrot.slane %v4867_v62, 1  ;;  %v4891_v7 = vmul.f32 %v6506_v57, %v8207_v48  ;;  %v4894_v11 = vmul.f32 %v6506_v57, %v8215_v39  ;;  %v4897_v14 = vmul.f32 %v6506_v57, %v8218_v27 }
 0x509   : > { %v4917_v12 = vmul.f32 %v4905_v30, %v4879_v37  ;;  %v4920_v44 = vmul.f32 %v4905_v30, %v4882_v41  ;;  %v4923_v1 = vmul.f32 %v4905_v30, %v4885_v52  ;;  %v4926_v33 = vmul.f32 %v4905_v30, %v4888_v19 }
 0x50a   : > { %v4869_v0 = vadd.f32 %v4868_v20, %v4867_v62  ;;  %v4929_v42 = vmul.f32 %v4905_v30, %v4891_v7  ;;  %v4932_v21 = vmul.f32 %v4905_v30, %v4894_v11  ;;  %v4935_v56 = vmul.f32 %v4905_v30, %v4897_v14 }
 0x50b   : > { %v4955_v32 = vadd.f32 %v4943_v9, %v4917_v12  ;;  %v4958_v4 = vadd.f32 %v4943_v9, %v4920_v44  ;;  %v4961_v31 = vadd.f32 %v4943_v9, %v4923_v1  ;;  %v4964_v27 = vadd.f32 %v4943_v9, %v4926_v33 }
 0x50c   : > { %v4872_v22 = vmul.f32 0.020408163, %v4869_v0  ;;  %v4967_v60 = vadd.f32 %v4943_v9, %v4929_v42  ;;  %v4970_v35 = vadd.f32 %v4943_v9, %v4932_v21  ;;  %v4973_v13 = vadd.f32 %v4943_v9, %v4935_v56 }
 0x50d   : > { %4976 = vst [vmem:[%s8427_s7] sm:$0xff] %v4955_v32  ;;  %4979 = vst [vmem:[%s8427_s7 + $0x18] sm:$0xff] %v4958_v4  ;;  %v4951_v30 = vrot.slane %v8317_v46, %v4912_v23 }
 0x50e   : > { %v6508_v51 = vpop.eup %6507  ;;  %v4875_v48 = vadd.f32 0.001, %v4872_v22  ;;  %4982 = vst [vmem:[%s8427_s7 + $0x30] sm:$0xff] %v4961_v31  ;;  %4985 = vst [vmem:[%s8427_s7 + $0x48] sm:$0xff] %v4964_v27 }
 0x50f   : > { %v4880_v43 = vmul.f32 %v6508_v51, %v8223_v55  ;;  %v4883_v16 = vmul.f32 %v6508_v51, %v8226_v29  ;;  %v4886_v39 = vmul.f32 %v6508_v51, %v8229_v40  ;;  %v4889_v55 = vmul.f32 %v6508_v51, %v8232_v26  ;;  %4988 = vst [vmem:[%s8427_s7 + $0x60] sm:$0xff] %v4967_v60 }
 0x510   : > { %6509 = vrsqrt.f32 %v4875_v48  ;;  %v4892_v40 = vmul.f32 %v6508_v51, %v8236_v17  ;;  %v4895_v26 = vmul.f32 %v6508_v51, %v8248_v5  ;;  %4991 = vst [vmem:[%s8427_s7 + $0x78] sm:$0xff] %v4970_v35  ;;  %v4898_v49 = vmul.f32 %v6508_v51, %v8251_v25  ;;  %4994 = vst [vmem:[%s8427_s7 + $0x90] sm:$0x1] %v4973_v13 }
 0x511   : > { %v4918_v36 = vmul.f32 %v4909_v47, %v4880_v43  ;;  %v4921_v58 = vmul.f32 %v4909_v47, %v4883_v16  ;;  %v4924_v29 = vmul.f32 %v4909_v47, %v4886_v39  ;;  %v4927_v45 = vmul.f32 %v4909_v47, %v4889_v55 }
 0x512   : > { %v4930_v53 = vmul.f32 %v4909_v47, %v4892_v40  ;;  %v4933_v63 = vmul.f32 %v4909_v47, %v4895_v26  ;;  %v4936_v25 = vmul.f32 %v4909_v47, %v4898_v49 }
 0x513   : > { %v4956_v18 = vadd.f32 %v4947_v15, %v4918_v36  ;;  %v4959_v24 = vadd.f32 %v4947_v15, %v4921_v58  ;;  %v4962_v59 = vadd.f32 %v4947_v15, %v4924_v29  ;;  %v4965_v17 = vadd.f32 %v4947_v15, %v4927_v45 }
 0x514   : > { %v4968_v5 = vadd.f32 %v4947_v15, %v4930_v53  ;;  %v4971_v28 = vadd.f32 %v4947_v15, %v4933_v63  ;;  %v4974_v50 = vadd.f32 %v4947_v15, %v4936_v25 }
 0x515   : > { %4977 = vst [vmem:[%s8427_s7 + $0x8] sm:$0xff] %v4956_v18  ;;  %4980 = vst [vmem:[%s8427_s7 + $0x20] sm:$0xff] %v4959_v24 }
 0x516   : > { %4983 = vst [vmem:[%s8427_s7 + $0x38] sm:$0xff] %v4962_v59  ;;  %4986 = vst [vmem:[%s8427_s7 + $0x50] sm:$0xff] %v4965_v17 }
 0x517   : > { %4989 = vst [vmem:[%s8427_s7 + $0x68] sm:$0xff] %v4968_v5  ;;  %4992 = vst [vmem:[%s8427_s7 + $0x80] sm:$0xff] %v4971_v28 }
 0x518   : > { %4995 = vst [vmem:[%s8427_s7 + $0x98] sm:$0x1] %v4974_v50 }
 0x51a   : > { %v6510_v62 = vpop.eup %6509 }
 0x51b   : > { %v4881_v57 = vmul.f32 %v6510_v62, %v8264_v3  ;;  %v4884_v9 = vmul.f32 %v6510_v62, %v8267_v61  ;;  %v4887_v47 = vmul.f32 %v6510_v62, %v8270_v10  ;;  %v4890_v15 = vmul.f32 %v6510_v62, %v8273_v6 }
 0x51c   : > { %v4893_v20 = vmul.f32 %v6510_v62, %v8276_v34  ;;  %v4896_v37 = vmul.f32 %v6510_v62, %v8281_v8  ;;  %v4899_v41 = vmul.f32 %v6510_v62, %v8290_v2 }
 0x51d   : > { %v4919_v52 = vmul.f32 %v4913_v54, %v4881_v57  ;;  %v4922_v19 = vmul.f32 %v4913_v54, %v4884_v9  ;;  %v4925_v38 = vmul.f32 %v4913_v54, %v4887_v47  ;;  %v4928_v0 = vmul.f32 %v4913_v54, %v4890_v15 }
 0x51e   : > { %v4931_v7 = vmul.f32 %v4913_v54, %v4893_v20  ;;  %v4934_v46 = vmul.f32 %v4913_v54, %v4896_v37  ;;  %v4937_v11 = vmul.f32 %v4913_v54, %v4899_v41 }
 0x51f   : > { %v4957_v3 = vadd.f32 %v4951_v30, %v4919_v52  ;;  %v4960_v14 = vadd.f32 %v4951_v30, %v4922_v19  ;;  %v4963_v61 = vadd.f32 %v4951_v30, %v4925_v38  ;;  %v4966_v12 = vadd.f32 %v4951_v30, %v4928_v0 }
 0x520   : > { %v4969_v10 = vadd.f32 %v4951_v30, %v4931_v7  ;;  %v4972_v44 = vadd.f32 %v4951_v30, %v4934_v46  ;;  %v4975_v6 = vadd.f32 %v4951_v30, %v4937_v11 }
 0x521   : > { %4978 = vst.msk [vmem:[%s8427_s7 + $0x10] sm:$0xff] %vm4687_vm4, %v4957_v3  ;;  %4981 = vst.msk [vmem:[%s8427_s7 + $0x28] sm:$0xff] %vm4687_vm4, %v4960_v14 }
 0x522   : > { %4984 = vst.msk [vmem:[%s8427_s7 + $0x40] sm:$0xff] %vm4687_vm4, %v4963_v61  ;;  %4987 = vst.msk [vmem:[%s8427_s7 + $0x58] sm:$0xff] %vm4687_vm4, %v4966_v12 }
 0x523   : > { %4990 = vst.msk [vmem:[%s8427_s7 + $0x70] sm:$0xff] %vm4687_vm4, %v4969_v10  ;;  %4993 = vst.msk [vmem:[%s8427_s7 + $0x88] sm:$0xff] %vm4687_vm4, %v4972_v44 }
 0x524   : > { %4996 = vst.msk [vmem:[%s8427_s7 + $0xa0] sm:$0x1] %vm4706_vm5, %v4975_v6 }
 0x525 PF: > { %s17_s24 = sadd.s32 1, %s6517_s24  }
 0x526   : > { %p14_p6 = scmp.ge.s32.totalorder %s17_s24, 4  }
 0x528   :  { %16 = sbr.rel (!%p14_p6) target bundleno = 1 (0x1), region = 91 }

</bundles_post_ra>
